<compile_context>
chip_gen: v7x
topology: tpu7x:2x2x1
jax: 0.10.0
libtpu: 0.0.40
codegen_flags: <defaults>
</compile_context>

<pallas_src>
import jax
import jax.numpy as jnp
from jax.experimental import pallas as pl
from jax.experimental.pallas import tpu as pltpu

# ---- Small BERT-like config ----
VOCAB = 100
HIDDEN = 128
N_LAYERS = 2
N_HEADS = 2
HEAD_DIM = HIDDEN // N_HEADS
INTERMEDIATE = 512
MAX_POS = 32
LN_EPS = 1e-12
B_BLK = 8            # sequences per grid step (merged into matmul M; >=8 for dense stores)

# Row layout of the packed per-layer vector slab, shape (L, 8, HIDDEN).
R_BO, R_LN1G, R_LN1B, R_B2, R_LN2G, R_LN2B, R_EMBG, R_EMBB = range(8)


# ---------------- Fused encoder kernel ----------------
def _encoder_kernel(emb_ref, bias_ref,
                    wqkv_ref, bqkv_ref, wo_ref,
                    w1_ref, b1_ref, w2_ref,
                    vec_ref, out_ref, x_ref):
    Bb, S, H = emb_ref.shape
    M = Bb * S
    DH = HEAD_DIM
    l = pl.program_id(1)
    n_layers = pl.num_programs(1)

    vecs = vec_ref[0]                              # (8, H) packed bias/LN vectors
    bo    = vecs[R_BO:R_BO + 1, :]
    ln1_g = vecs[R_LN1G:R_LN1G + 1, :]
    ln1_b = vecs[R_LN1B:R_LN1B + 1, :]
    b2    = vecs[R_B2:R_B2 + 1, :]
    ln2_g = vecs[R_LN2G:R_LN2G + 1, :]
    ln2_b = vecs[R_LN2B:R_LN2B + 1, :]

    def layer_norm(x, g, b):
        mu = jnp.mean(x, axis=-1, keepdims=True)
        xc = x - mu
        var = jnp.mean(xc * xc, axis=-1, keepdims=True)
        return xc * jax.lax.rsqrt(var + LN_EPS) * g + b

    def mm(x, w):
        # bf16 MXU operands (weights pre-cast to bf16), f32 accumulation.
        return jnp.dot(x.astype(jnp.bfloat16), w, preferred_element_type=jnp.float32)

    def gelu(x):
        # tanh-approx GELU; HF BERT uses exact erf GELU (diff < 1e-3).
        c = 0.7978845608028654  # sqrt(2/pi)
        return 0.5 * x * (1.0 + jnp.tanh(c * (x + 0.044715 * x * x * x)))

    # ---- layer 0: embeddings -> LayerNorm -> persistent activation scratch ----
    @pl.when(l == 0)
    def _init():
        e = emb_ref[...].reshape(M, H)
        x_ref[...] = layer_norm(e, vecs[R_EMBG:R_EMBG + 1, :],
                                vecs[R_EMBB:R_EMBB + 1, :])

    x = x_ref[...]                                  # (M, H) f32, VMEM-resident across layers
    bias = bias_ref[...]                            # (Bb, 1, S) additive key-mask bias

    # Fused QKV on all rows (K/V of every token are needed even in the CLS-only layer).
    # 1/sqrt(DH) is already folded into the Q weights/bias.
    qkv = mm(x, wqkv_ref[0]) + bqkv_ref[0]          # (M, 3H) f32
    qkv_bf = qkv.astype(jnp.bfloat16)               # single bf16 cast, sliced below
    wo = wo_ref[0]                                  # (H, H)  bf16
    w1 = w1_ref[0]                                  # (H, I)  bf16
    b1 = b1_ref[0]                                  # (1, I)  f32
    w2 = w2_ref[0]                                  # (I, H)  bf16

    def attention(cls_only):
        # Per-head scaled-dot-product attention, batched over the Bb sequences.
        # TODO(synk): HEAD_DIM=64 slices are half-lane-width; pad head_dim to 128
        # (zero columns) if this is scaled up to real BERT sizes.
        q_rows = 1 if cls_only else S
        ctx_heads = []
        for h in range(N_HEADS):
            lo = h * DH
            qh = qkv_bf[:, lo:lo + DH].reshape(Bb, S, DH)
            if cls_only:
                qh = qh[:, 0:1, :]                  # CLS query row only
            kh = qkv_bf[:, H + lo:H + lo + DH].reshape(Bb, S, DH)
            vh = qkv_bf[:, 2 * H + lo:2 * H + lo + DH].reshape(Bb, S, DH)
            s = jnp.einsum('bqd,bkd->bqk', qh, kh,
                           preferred_element_type=jnp.float32)       # (Bb, q, S)
            s = s + bias                            # broadcast over query rows
            s = s - jnp.max(s, axis=-1, keepdims=True)   # max-shift also guards all-masked rows
            p = jnp.exp(s)
            p = p * pl.reciprocal(jnp.sum(p, axis=-1, keepdims=True), approx=True)
            ctx_heads.append(jnp.einsum('bqk,bkd->bqd', p.astype(jnp.bfloat16), vh,
                                        preferred_element_type=jnp.float32))
        # Concat heads -> single out-projection matmul (no per-head accumulate).
        return jnp.concatenate(ctx_heads, axis=-1).reshape(Bb * q_rows, H)

    def post_attention(ctx, resid):
        x1 = layer_norm(mm(ctx, wo) + bo + resid, ln1_g, ln1_b)
        h1 = gelu(mm(x1, w1) + b1)                   # (rows, I)
        h2 = mm(h1, w2) + b2                         # (rows, H)  (N=128: native on v5e, half-MXU on v6e/v7x)
        return layer_norm(h2 + x1, ln2_g, ln2_b)

    @pl.when(l < n_layers - 1)
    def _full_layer():
        x_ref[...] = post_attention(attention(cls_only=False), x)

    @pl.when(l == n_layers - 1)
    def _last_layer_cls_only():
        # Only the CLS row is consumed downstream: out-projection / FFN / LN on (Bb, H).
        x_cls = x.reshape(Bb, S, H)[:, 0, :]
        out_ref[...] = post_attention(attention(cls_only=True),
                                      x_cls).astype(out_ref.dtype)


def encoder_pallas(emb, mask_bias, sp):
    B, S, H = emb.shape
    assert B % B_BLK == 0, "batch must be a multiple of B_BLK"
    nb = B // B_BLK
    L = N_LAYERS
    I = INTERMEDIATE

    def batch_spec(shape):
        return pl.BlockSpec(shape, lambda b, l: (b, 0, 0))

    def layer_spec(shape):
        return pl.BlockSpec(shape, lambda b, l: (l, 0, 0))

    in_specs = [
        batch_spec((B_BLK, S, H)),          # embeddings
        batch_spec((B_BLK, 1, S)),          # key-mask additive bias
        layer_spec((1, H, 3 * H)),          # wqkv (bf16, Q pre-scaled)
        layer_spec((1, 1, 3 * H)),          # bqkv
        layer_spec((1, H, H)),              # wo   (bf16)
        layer_spec((1, H, I)),              # w1   (bf16)
        layer_spec((1, 1, I)),              # b1
        layer_spec((1, I, H)),              # w2   (bf16)
        layer_spec((1, 8, H)),              # packed bias/LayerNorm vectors
    ]
    out = pl.pallas_call(
        _encoder_kernel,
        out_shape=jax.ShapeDtypeStruct((B, H), jnp.float32),
        grid=(nb, L),                                   # >=2 parallel batch programs for v7x
        in_specs=in_specs,
        out_specs=pl.BlockSpec((B_BLK, H), lambda b, l: (b, 0)),
        scratch_shapes=[pltpu.VMEM((B_BLK * S, H), jnp.float32)],   # activations, carried over layers
        compiler_params=pltpu.CompilerParams(
            dimension_semantics=("parallel", "arbitrary"),
            vmem_limit_bytes=32 * 1024 * 1024),
    )(emb, mask_bias,
      sp["wqkv"], sp["bqkv"], sp["wo"], sp["w1"], sp["b1"], sp["w2"], sp["vec"])
    return out                                           # (B, H) CLS vectors


# ---------------- Parameter packing (fused QKV, bf16 matmul weights, packed vectors) ----
def stack_params(params):
    layers = params["layers"]
    scale = 1.0 / (HEAD_DIM ** 0.5)
    emb_g = params["emb_ln_g"]
    emb_b = params["emb_ln_b"]

    def stk(fn, dtype=jnp.float32):
        return jnp.stack([fn(p) for p in layers], axis=0).astype(dtype)

    return {
        # 1/sqrt(DH) folded into the Q projection (weights and bias).
        "wqkv": stk(lambda p: jnp.concatenate(
            [p["wq"] * scale, p["wk"], p["wv"]], axis=1), jnp.bfloat16),
        "bqkv": stk(lambda p: jnp.concatenate(
            [p["bq"] * scale, p["bk"], p["bv"]])[None, :]),
        "wo": stk(lambda p: p["wo"], jnp.bfloat16),
        "w1": stk(lambda p: p["w1"], jnp.bfloat16),
        "b1": stk(lambda p: p["b1"][None, :]),
        "w2": stk(lambda p: p["w2"], jnp.bfloat16),
        # 12 tiny H-sized vectors packed into one (L, 8, H) slab -> one DMA per layer.
        # Row order must match R_* constants; emb LN rows are only read at layer 0.
        "vec": stk(lambda p: jnp.stack(
            [p["bo"], p["ln1_g"], p["ln1_b"], p["b2"], p["ln2_g"], p["ln2_b"],
             emb_g, emb_b], axis=0)),
    }


def text_encoder_forward(params, input_ids, attention_mask):
    B, S = input_ids.shape
    # TODO(synk): data-dependent vocab gather stays in plain XLA (jnp.take); not worth a
    # scalar-prefetch Pallas gather at this size.
    emb = (jnp.take(params["word_emb"], input_ids, axis=0)
           + params["pos_emb"][:S][None, :, :]
           + params["type_emb"][0][None, None, :])                  # (B, S, H)
    # Additive key-mask bias, (B, 1, S); broadcast over query rows in-kernel.
    mask_bias = ((1.0 - attention_mask.astype(jnp.float32)) * -1e9)[:, None, :]
    sp = stack_params(params)
    return encoder_pallas(emb, mask_bias, sp)                       # (B, H) CLS


# ---------------- Deterministic parameter init ----------------
def init_params(key):
    std = 0.02

    def nrm(k, shape):
        return std * jax.random.normal(k, shape, jnp.float32)

    keys = jax.random.split(key, 3 + N_LAYERS)
    params = {
        "word_emb": nrm(keys[0], (VOCAB, HIDDEN)),
        "pos_emb": nrm(keys[1], (MAX_POS, HIDDEN)),
        "type_emb": nrm(keys[2], (2, HIDDEN)),
        "emb_ln_g": jnp.ones((HIDDEN,), jnp.float32),
        "emb_ln_b": jnp.zeros((HIDDEN,), jnp.float32),
        "layers": [],
    }
    for i in range(N_LAYERS):
        lk = jax.random.split(keys[3 + i], 6)
        params["layers"].append({
            "wq": nrm(lk[0], (HIDDEN, HIDDEN)), "bq": jnp.zeros((HIDDEN,), jnp.float32),
            "wk": nrm(lk[1], (HIDDEN, HIDDEN)), "bk": jnp.zeros((HIDDEN,), jnp.float32),
            "wv": nrm(lk[2], (HIDDEN, HIDDEN)), "bv": jnp.zeros((HIDDEN,), jnp.float32),
            "wo": nrm(lk[3], (HIDDEN, HIDDEN)), "bo": jnp.zeros((HIDDEN,), jnp.float32),
            "ln1_g": jnp.ones((HIDDEN,), jnp.float32),
            "ln1_b": jnp.zeros((HIDDEN,), jnp.float32),
            "w1": nrm(lk[4], (HIDDEN, INTERMEDIATE)),
            "b1": jnp.zeros((INTERMEDIATE,), jnp.float32),
            "w2": nrm(lk[5], (INTERMEDIATE, HIDDEN)),
            "b2": jnp.zeros((HIDDEN,), jnp.float32),
            "ln2_g": jnp.ones((HIDDEN,), jnp.float32),
            "ln2_b": jnp.zeros((HIDDEN,), jnp.float32),
        })
    return params


if __name__ == "__main__":
    # TODO(synk): pretrained 'bert-base-uncased' weights + tokenizer are not loadable
    # here; a small randomly-initialized BERT-style encoder is used instead.
    key = jax.random.PRNGKey(0)
    pkey, ikey = jax.random.split(key)
    params = init_params(pkey)

    B, S = 16, 8            # B_BLK=8 -> grid=(2, N_LAYERS): 2 parallel batch programs
    input_ids = jax.random.randint(ikey, (B, S), 0, VOCAB, dtype=jnp.int32)
    lengths = jnp.array([S, S - 2] * (B // 2), dtype=jnp.int32)
    attention_mask = (jnp.arange(S)[None, :] < lengths[:, None]).astype(jnp.int32)

    out = jax.jit(text_encoder_forward)(params, input_ids, attention_mask)
    out = jax.block_until_ready(out)
    assert out.shape == (B, HIDDEN)
    assert bool(jnp.all(jnp.isfinite(out)))
    print("KERNEL_OK")
</pallas_src>

<mosaic_0001>
module attributes {stable_mosaic.version = 11 : i64} {
  func.func @_encoder_kernel(%arg0: i32, %arg1: i32, %arg2: memref<8x8x128xf32, #tpu.memory_space<vmem>>, %arg3: memref<8x1x8xf32, #tpu.memory_space<vmem>>, %arg4: memref<1x128x384xbf16, #tpu.memory_space<vmem>>, %arg5: memref<1x1x384xf32, #tpu.memory_space<vmem>>, %arg6: memref<1x128x128xbf16, #tpu.memory_space<vmem>>, %arg7: memref<1x128x512xbf16, #tpu.memory_space<vmem>>, %arg8: memref<1x1x512xf32, #tpu.memory_space<vmem>>, %arg9: memref<1x512x128xbf16, #tpu.memory_space<vmem>>, %arg10: memref<1x8x128xf32, #tpu.memory_space<vmem>>, %arg11: memref<8x128xf32, #tpu.memory_space<vmem>>, %arg12: memref<64x128xf32, #tpu.memory_space<vmem>>) attributes {dimension_semantics = [#tpu.dimension_semantics<parallel>, #tpu.dimension_semantics<arbitrary>], iteration_bounds = array<i64: 2, 2>, scalar_prefetch = 0 : i64, scratch_operands = 1 : i64, tpu.core_type = #tpu.core_type<tc>, window_params = [{transform_indices = @transform_0, window_bounds = array<i64: 8, 8, 128>}, {transform_indices = @transform_1, window_bounds = array<i64: 8, 1, 8>}, {transform_indices = @transform_2, window_bounds = array<i64: 1, 128, 384>}, {transform_indices = @transform_3, window_bounds = array<i64: 1, 1, 384>}, {transform_indices = @transform_4, window_bounds = array<i64: 1, 128, 128>}, {transform_indices = @transform_5, window_bounds = array<i64: 1, 128, 512>}, {transform_indices = @transform_6, window_bounds = array<i64: 1, 1, 512>}, {transform_indices = @transform_7, window_bounds = array<i64: 1, 512, 128>}, {transform_indices = @transform_8, window_bounds = array<i64: 1, 8, 128>}, {transform_indices = @transform_9, window_bounds = array<i64: 8, 128>}]} {
    %c0 = arith.constant 0 : index
    %c0_0 = arith.constant 0 : index
    %c0_1 = arith.constant 0 : index
    %0 = vector.load %arg10[%c0, %c0_0, %c0_1] : memref<1x8x128xf32, #tpu.memory_space<vmem>>, vector<1x8x128xf32>
    %1 = vector.shape_cast %0 : vector<1x8x128xf32> to vector<8x128xf32>
    %2 = vector.extract_strided_slice %1 {offsets = [0, 0], sizes = [1, 128], strides = [1, 1]} : vector<8x128xf32> to vector<1x128xf32>
    %3 = vector.extract_strided_slice %1 {offsets = [1, 0], sizes = [1, 128], strides = [1, 1]} : vector<8x128xf32> to vector<1x128xf32>
    %4 = vector.extract_strided_slice %1 {offsets = [2, 0], sizes = [1, 128], strides = [1, 1]} : vector<8x128xf32> to vector<1x128xf32>
    %5 = vector.extract_strided_slice %1 {offsets = [3, 0], sizes = [1, 128], strides = [1, 1]} : vector<8x128xf32> to vector<1x128xf32>
    %6 = vector.extract_strided_slice %1 {offsets = [4, 0], sizes = [1, 128], strides = [1, 1]} : vector<8x128xf32> to vector<1x128xf32>
    %7 = vector.extract_strided_slice %1 {offsets = [5, 0], sizes = [1, 128], strides = [1, 1]} : vector<8x128xf32> to vector<1x128xf32>
    %c0_i32 = arith.constant 0 : i32
    %8 = arith.cmpi eq, %arg1, %c0_i32 : i32
    %9 = arith.extui %8 : i1 to i32
    %c0_i32_2 = arith.constant 0 : i32
    %10 = arith.cmpi ne, %9, %c0_i32_2 : i32
    scf.if %10 {
      %c0_29 = arith.constant 0 : index
      %c0_30 = arith.constant 0 : index
      %c0_31 = arith.constant 0 : index
      %36 = vector.load %arg2[%c0_29, %c0_30, %c0_31] : memref<8x8x128xf32, #tpu.memory_space<vmem>>, vector<8x8x128xf32>
      %37 = vector.shape_cast %36 : vector<8x8x128xf32> to vector<64x128xf32>
      %38 = vector.extract_strided_slice %1 {offsets = [6, 0], sizes = [1, 128], strides = [1, 1]} : vector<8x128xf32> to vector<1x128xf32>
      %39 = vector.extract_strided_slice %1 {offsets = [7, 0], sizes = [1, 128], strides = [1, 1]} : vector<8x128xf32> to vector<1x128xf32>
      %cst_32 = arith.constant dense<0.000000e+00> : vector<64xf32>
      %40 = vector.multi_reduction <add>, %37, %cst_32 [1] : vector<64x128xf32> to vector<64xf32>
      %41 = vector.shape_cast %40 : vector<64xf32> to vector<64x1xf32>
      %cst_33 = arith.constant 1.280000e+02 : f32
      %42 = vector.broadcast %cst_33 : f32 to vector<64x1xf32>
      %43 = arith.divf %41, %42 : vector<64x1xf32>
      %44 = vector.broadcast %43 : vector<64x1xf32> to vector<64x128xf32>
      %45 = arith.subf %37, %44 : vector<64x128xf32>
      %46 = arith.mulf %45, %45 : vector<64x128xf32>
      %cst_34 = arith.constant dense<0.000000e+00> : vector<64xf32>
      %47 = vector.multi_reduction <add>, %46, %cst_34 [1] : vector<64x128xf32> to vector<64xf32>
      %48 = vector.shape_cast %47 : vector<64xf32> to vector<64x1xf32>
      %cst_35 = arith.constant 1.280000e+02 : f32
      %49 = vector.broadcast %cst_35 : f32 to vector<64x1xf32>
      %50 = arith.divf %48, %49 : vector<64x1xf32>
      %cst_36 = arith.constant 9.99999996E-13 : f32
      %51 = vector.broadcast %cst_36 : f32 to vector<64x1xf32>
      %52 = arith.addf %50, %51 : vector<64x1xf32>
      %53 = math.rsqrt %52 : vector<64x1xf32>
      %54 = vector.broadcast %53 : vector<64x1xf32> to vector<64x128xf32>
      %55 = arith.mulf %45, %54 : vector<64x128xf32>
      %56 = vector.broadcast %38 : vector<1x128xf32> to vector<64x128xf32>
      %57 = arith.mulf %55, %56 : vector<64x128xf32>
      %58 = vector.broadcast %39 : vector<1x128xf32> to vector<64x128xf32>
      %59 = arith.addf %57, %58 : vector<64x128xf32>
      %c0_37 = arith.constant 0 : index
      %c0_38 = arith.constant 0 : index
      %60 = vector.load %arg12[%c0_37, %c0_38] : memref<64x128xf32, #tpu.memory_space<vmem>>, vector<64x128xf32>
      tpu.vector_store %arg12[%c0_37, %c0_38], %59 {strides = array<i32>} : memref<64x128xf32, #tpu.memory_space<vmem>>, vector<64x128xf32>,
    } else {
    }
    %c0_3 = arith.constant 0 : index
    %c0_4 = arith.constant 0 : index
    %11 = vector.load %arg12[%c0_3, %c0_4] : memref<64x128xf32, #tpu.memory_space<vmem>>, vector<64x128xf32>
    %c0_5 = arith.constant 0 : index
    %c0_6 = arith.constant 0 : index
    %c0_7 = arith.constant 0 : index
    %12 = vector.load %arg3[%c0_5, %c0_6, %c0_7] : memref<8x1x8xf32, #tpu.memory_space<vmem>>, vector<8x1x8xf32>
    %c0_8 = arith.constant 0 : index
    %c0_9 = arith.constant 0 : index
    %c0_10 = arith.constant 0 : index
    %13 = vector.load %arg4[%c0_8, %c0_9, %c0_10] : memref<1x128x384xbf16, #tpu.memory_space<vmem>>, vector<1x128x384xbf16>
    %14 = vector.shape_cast %13 : vector<1x128x384xbf16> to vector<128x384xbf16>
    %15 = arith.truncf %11 : vector<64x128xf32> to vector<64x128xbf16>
    %cst = arith.constant dense<0.000000e+00> : vector<64x384xf32>
    %16 = tpu.matmul %15, %14, %cst {dimension_numbers = #tpu.dot_dimension_numbers<[1], [0], [0], [1], [0, 0, 1, 1], [], []>} : vector<64x128xbf16>, vector<128x384xbf16>, vector<64x384xf32> -> vector<64x384xf32>
    %c0_11 = arith.constant 0 : index
    %c0_12 = arith.constant 0 : index
    %c0_13 = arith.constant 0 : index
    %17 = vector.load %arg5[%c0_11, %c0_12, %c0_13] : memref<1x1x384xf32, #tpu.memory_space<vmem>>, vector<1x1x384xf32>
    %18 = vector.shape_cast %17 : vector<1x1x384xf32> to vector<1x384xf32>
    %19 = vector.broadcast %18 : vector<1x384xf32> to vector<64x384xf32>
    %20 = arith.addf %16, %19 : vector<64x384xf32>
    %21 = arith.truncf %20 : vector<64x384xf32> to vector<64x384xbf16>
    %c0_14 = arith.constant 0 : index
    %c0_15 = arith.constant 0 : index
    %c0_16 = arith.constant 0 : index
    %22 = vector.load %arg6[%c0_14, %c0_15, %c0_16] : memref<1x128x128xbf16, #tpu.memory_space<vmem>>, vector<1x128x128xbf16>
    %23 = vector.shape_cast %22 : vector<1x128x128xbf16> to vector<128x128xbf16>
    %c0_17 = arith.constant 0 : index
    %c0_18 = arith.constant 0 : index
    %c0_19 = arith.constant 0 : index
    %24 = vector.load %arg7[%c0_17, %c0_18, %c0_19] : memref<1x128x512xbf16, #tpu.memory_space<vmem>>, vector<1x128x512xbf16>
    %25 = vector.shape_cast %24 : vector<1x128x512xbf16> to vector<128x512xbf16>
    %c0_20 = arith.constant 0 : index
    %c0_21 = arith.constant 0 : index
    %c0_22 = arith.constant 0 : index
    %26 = vector.load %arg8[%c0_20, %c0_21, %c0_22] : memref<1x1x512xf32, #tpu.memory_space<vmem>>, vector<1x1x512xf32>
    %27 = vector.shape_cast %26 : vector<1x1x512xf32> to vector<1x512xf32>
    %c0_23 = arith.constant 0 : index
    %c0_24 = arith.constant 0 : index
    %c0_25 = arith.constant 0 : index
    %28 = vector.load %arg9[%c0_23, %c0_24, %c0_25] : memref<1x512x128xbf16, #tpu.memory_space<vmem>>, vector<1x512x128xbf16>
    %29 = vector.shape_cast %28 : vector<1x512x128xbf16> to vector<512x128xbf16>
    %c1_i32 = arith.constant 1 : i32
    %30 = arith.cmpi slt, %arg1, %c1_i32 : i32
    %31 = arith.extui %30 : i1 to i32
    %c0_i32_26 = arith.constant 0 : i32
    %32 = arith.cmpi ne, %31, %c0_i32_26 : i32
    scf.if %32 {
      %36 = vector.extract_strided_slice %21 {offsets = [0, 0], sizes = [64, 64], strides = [1, 1]} : vector<64x384xbf16> to vector<64x64xbf16>
      %37 = vector.shape_cast %36 : vector<64x64xbf16> to vector<8x8x64xbf16>
      %38 = vector.extract_strided_slice %21 {offsets = [0, 128], sizes = [64, 64], strides = [1, 1]} : vector<64x384xbf16> to vector<64x64xbf16>
      %39 = vector.shape_cast %38 : vector<64x64xbf16> to vector<8x8x64xbf16>
      %40 = vector.extract_strided_slice %21 {offsets = [0, 256], sizes = [64, 64], strides = [1, 1]} : vector<64x384xbf16> to vector<64x64xbf16>
      %41 = vector.shape_cast %40 : vector<64x64xbf16> to vector<8x8x64xbf16>
      "tpu.trace_start"() <{level = 10 : i32, message = "bqd,bkd->bqk"}> : () -> ()
      %cst_29 = arith.constant dense<0.000000e+00> : vector<8x8x8xf32>
      %42 = tpu.matmul %37, %39, %cst_29 {dimension_numbers = #tpu.dot_dimension_numbers<[2], [2], [1], [1], [0, 0, 0, 1, 1, 1], [0], [0]>} : vector<8x8x64xbf16>, vector<8x8x64xbf16>, vector<8x8x8xf32> -> vector<8x8x8xf32>
      "tpu.trace_stop"() : () -> ()
      %43 = vector.broadcast %12 : vector<8x1x8xf32> to vector<8x8x8xf32>
      %44 = arith.addf %42, %43 : vector<8x8x8xf32>
      %cst_30 = arith.constant dense<0xFF800000> : vector<8x8xf32>
      %45 = vector.multi_reduction <maximumf>, %44, %cst_30 [2] : vector<8x8x8xf32> to vector<8x8xf32>
      %46 = vector.shape_cast %45 : vector<8x8xf32> to vector<8x8x1xf32>
      %47 = vector.broadcast %46 : vector<8x8x1xf32> to vector<8x8x8xf32>
      %48 = arith.subf %44, %47 : vector<8x8x8xf32>
      %49 = math.exp %48 : vector<8x8x8xf32>
      %cst_31 = arith.constant dense<0.000000e+00> : vector<8x8xf32>
      %50 = vector.multi_reduction <add>, %49, %cst_31 [2] : vector<8x8x8xf32> to vector<8x8xf32>
      %51 = vector.shape_cast %50 : vector<8x8xf32> to vector<8x8x1xf32>
      %52 = tpu.reciprocal %51 {approx = true} : vector<8x8x1xf32> -> vector<8x8x1xf32>
      %53 = vector.broadcast %52 : vector<8x8x1xf32> to vector<8x8x8xf32>
      %54 = arith.mulf %49, %53 : vector<8x8x8xf32>
      %55 = arith.truncf %54 : vector<8x8x8xf32> to vector<8x8x8xbf16>
      "tpu.trace_start"() <{level = 10 : i32, message = "bqk,bkd->bqd"}> : () -> ()
      %cst_32 = arith.constant dense<0.000000e+00> : vector<8x8x64xf32>
      %56 = tpu.matmul %55, %41, %cst_32 {dimension_numbers = #tpu.dot_dimension_numbers<[2], [1], [1], [2], [0, 0, 0, 1, 1, 2], [0], [0]>} : vector<8x8x8xbf16>, vector<8x8x64xbf16>, vector<8x8x64xf32> -> vector<8x8x64xf32>
      "tpu.trace_stop"() : () -> ()
      %57 = vector.extract_strided_slice %21 {offsets = [0, 64], sizes = [64, 64], strides = [1, 1]} : vector<64x384xbf16> to vector<64x64xbf16>
      %58 = vector.shape_cast %57 : vector<64x64xbf16> to vector<8x8x64xbf16>
      %59 = vector.extract_strided_slice %21 {offsets = [0, 192], sizes = [64, 64], strides = [1, 1]} : vector<64x384xbf16> to vector<64x64xbf16>
      %60 = vector.shape_cast %59 : vector<64x64xbf16> to vector<8x8x64xbf16>
      %61 = vector.extract_strided_slice %21 {offsets = [0, 320], sizes = [64, 64], strides = [1, 1]} : vector<64x384xbf16> to vector<64x64xbf16>
      %62 = vector.shape_cast %61 : vector<64x64xbf16> to vector<8x8x64xbf16>
      "tpu.trace_start"() <{level = 10 : i32, message = "bqd,bkd->bqk"}> : () -> ()
      %cst_33 = arith.constant dense<0.000000e+00> : vector<8x8x8xf32>
      %63 = tpu.matmul %58, %60, %cst_33 {dimension_numbers = #tpu.dot_dimension_numbers<[2], [2], [1], [1], [0, 0, 0, 1, 1, 1], [0], [0]>} : vector<8x8x64xbf16>, vector<8x8x64xbf16>, vector<8x8x8xf32> -> vector<8x8x8xf32>
      "tpu.trace_stop"() : () -> ()
      %64 = vector.broadcast %12 : vector<8x1x8xf32> to vector<8x8x8xf32>
      %65 = arith.addf %63, %64 : vector<8x8x8xf32>
      %cst_34 = arith.constant dense<0xFF800000> : vector<8x8xf32>
      %66 = vector.multi_reduction <maximumf>, %65, %cst_34 [2] : vector<8x8x8xf32> to vector<8x8xf32>
      %67 = vector.shape_cast %66 : vector<8x8xf32> to vector<8x8x1xf32>
      %68 = vector.broadcast %67 : vector<8x8x1xf32> to vector<8x8x8xf32>
      %69 = arith.subf %65, %68 : vector<8x8x8xf32>
      %70 = math.exp %69 : vector<8x8x8xf32>
      %cst_35 = arith.constant dense<0.000000e+00> : vector<8x8xf32>
      %71 = vector.multi_reduction <add>, %70, %cst_35 [2] : vector<8x8x8xf32> to vector<8x8xf32>
      %72 = vector.shape_cast %71 : vector<8x8xf32> to vector<8x8x1xf32>
      %73 = tpu.reciprocal %72 {approx = true} : vector<8x8x1xf32> -> vector<8x8x1xf32>
      %74 = vector.broadcast %73 : vector<8x8x1xf32> to vector<8x8x8xf32>
      %75 = arith.mulf %70, %74 : vector<8x8x8xf32>
      %76 = arith.truncf %75 : vector<8x8x8xf32> to vector<8x8x8xbf16>
      "tpu.trace_start"() <{level = 10 : i32, message = "bqk,bkd->bqd"}> : () -> ()
      %cst_36 = arith.constant dense<0.000000e+00> : vector<8x8x64xf32>
      %77 = tpu.matmul %76, %62, %cst_36 {dimension_numbers = #tpu.dot_dimension_numbers<[2], [1], [1], [2], [0, 0, 0, 1, 1, 2], [0], [0]>} : vector<8x8x8xbf16>, vector<8x8x64xbf16>, vector<8x8x64xf32> -> vector<8x8x64xf32>
      "tpu.trace_stop"() : () -> ()
      %78 = tpu.concatenate %56, %77 in 2 : vector<8x8x64xf32>, vector<8x8x64xf32> -> vector<8x8x128xf32>
      %79 = vector.shape_cast %78 : vector<8x8x128xf32> to vector<64x128xf32>
      %80 = arith.truncf %79 : vector<64x128xf32> to vector<64x128xbf16>
      %cst_37 = arith.constant dense<0.000000e+00> : vector<64x128xf32>
      %81 = tpu.matmul %80, %23, %cst_37 {dimension_numbers = #tpu.dot_dimension_numbers<[1], [0], [0], [1], [0, 0, 1, 1], [], []>} : vector<64x128xbf16>, vector<128x128xbf16>, vector<64x128xf32> -> vector<64x128xf32>
      %82 = vector.broadcast %2 : vector<1x128xf32> to vector<64x128xf32>
      %83 = arith.addf %81, %82 : vector<64x128xf32>
      %84 = arith.addf %83, %11 : vector<64x128xf32>
      %cst_38 = arith.constant dense<0.000000e+00> : vector<64xf32>
      %85 = vector.multi_reduction <add>, %84, %cst_38 [1] : vector<64x128xf32> to vector<64xf32>
      %86 = vector.shape_cast %85 : vector<64xf32> to vector<64x1xf32>
      %cst_39 = arith.constant 1.280000e+02 : f32
      %87 = vector.broadcast %cst_39 : f32 to vector<64x1xf32>
      %88 = arith.divf %86, %87 : vector<64x1xf32>
      %89 = vector.broadcast %88 : vector<64x1xf32> to vector<64x128xf32>
      %90 = arith.subf %84, %89 : vector<64x128xf32>
      %91 = arith.mulf %90, %90 : vector<64x128xf32>
      %cst_40 = arith.constant dense<0.000000e+00> : vector<64xf32>
      %92 = vector.multi_reduction <add>, %91, %cst_40 [1] : vector<64x128xf32> to vector<64xf32>
      %93 = vector.shape_cast %92 : vector<64xf32> to vector<64x1xf32>
      %cst_41 = arith.constant 1.280000e+02 : f32
      %94 = vector.broadcast %cst_41 : f32 to vector<64x1xf32>
      %95 = arith.divf %93, %94 : vector<64x1xf32>
      %cst_42 = arith.constant 9.99999996E-13 : f32
      %96 = vector.broadcast %cst_42 : f32 to vector<64x1xf32>
      %97 = arith.addf %95, %96 : vector<64x1xf32>
      %98 = math.rsqrt %97 : vector<64x1xf32>
      %99 = vector.broadcast %98 : vector<64x1xf32> to vector<64x128xf32>
      %100 = arith.mulf %90, %99 : vector<64x128xf32>
      %101 = vector.broadcast %3 : vector<1x128xf32> to vector<64x128xf32>
      %102 = arith.mulf %100, %101 : vector<64x128xf32>
      %103 = vector.broadcast %4 : vector<1x128xf32> to vector<64x128xf32>
      %104 = arith.addf %102, %103 : vector<64x128xf32>
      %105 = arith.truncf %104 : vector<64x128xf32> to vector<64x128xbf16>
      %cst_43 = arith.constant dense<0.000000e+00> : vector<64x512xf32>
      %106 = tpu.matmul %105, %25, %cst_43 {dimension_numbers = #tpu.dot_dimension_numbers<[1], [0], [0], [1], [0, 0, 1, 1], [], []>} : vector<64x128xbf16>, vector<128x512xbf16>, vector<64x512xf32> -> vector<64x512xf32>
      %107 = vector.broadcast %27 : vector<1x512xf32> to vector<64x512xf32>
      %108 = arith.addf %106, %107 : vector<64x512xf32>
      %cst_44 = arith.constant 5.000000e-01 : f32
      %109 = vector.broadcast %cst_44 : f32 to vector<64x512xf32>
      %110 = arith.mulf %109, %108 : vector<64x512xf32>
      %cst_45 = arith.constant 4.471500e-02 : f32
      %111 = vector.broadcast %cst_45 : f32 to vector<64x512xf32>
      %112 = arith.mulf %111, %108 : vector<64x512xf32>
      %113 = arith.mulf %112, %108 : vector<64x512xf32>
      %114 = arith.mulf %113, %108 : vector<64x512xf32>
      %115 = arith.addf %108, %114 : vector<64x512xf32>
      %cst_46 = arith.constant 0.797884583 : f32
      %116 = vector.broadcast %cst_46 : f32 to vector<64x512xf32>
      %117 = arith.mulf %116, %115 : vector<64x512xf32>
      %118 = math.tanh %117 : vector<64x512xf32>
      %cst_47 = arith.constant 1.000000e+00 : f32
      %119 = vector.broadcast %cst_47 : f32 to vector<64x512xf32>
      %120 = arith.addf %119, %118 : vector<64x512xf32>
      %121 = arith.mulf %110, %120 : vector<64x512xf32>
      %122 = arith.truncf %121 : vector<64x512xf32> to vector<64x512xbf16>
      %cst_48 = arith.constant dense<0.000000e+00> : vector<64x128xf32>
      %123 = tpu.matmul %122, %29, %cst_48 {dimension_numbers = #tpu.dot_dimension_numbers<[1], [0], [0], [1], [0, 0, 1, 1], [], []>} : vector<64x512xbf16>, vector<512x128xbf16>, vector<64x128xf32> -> vector<64x128xf32>
      %124 = vector.broadcast %5 : vector<1x128xf32> to vector<64x128xf32>
      %125 = arith.addf %123, %124 : vector<64x128xf32>
      %126 = arith.addf %125, %104 : vector<64x128xf32>
      %cst_49 = arith.constant dense<0.000000e+00> : vector<64xf32>
      %127 = vector.multi_reduction <add>, %126, %cst_49 [1] : vector<64x128xf32> to vector<64xf32>
      %128 = vector.shape_cast %127 : vector<64xf32> to vector<64x1xf32>
      %cst_50 = arith.constant 1.280000e+02 : f32
      %129 = vector.broadcast %cst_50 : f32 to vector<64x1xf32>
      %130 = arith.divf %128, %129 : vector<64x1xf32>
      %131 = vector.broadcast %130 : vector<64x1xf32> to vector<64x128xf32>
      %132 = arith.subf %126, %131 : vector<64x128xf32>
      %133 = arith.mulf %132, %132 : vector<64x128xf32>
      %cst_51 = arith.constant dense<0.000000e+00> : vector<64xf32>
      %134 = vector.multi_reduction <add>, %133, %cst_51 [1] : vector<64x128xf32> to vector<64xf32>
      %135 = vector.shape_cast %134 : vector<64xf32> to vector<64x1xf32>
      %cst_52 = arith.constant 1.280000e+02 : f32
      %136 = vector.broadcast %cst_52 : f32 to vector<64x1xf32>
      %137 = arith.divf %135, %136 : vector<64x1xf32>
      %cst_53 = arith.constant 9.99999996E-13 : f32
      %138 = vector.broadcast %cst_53 : f32 to vector<64x1xf32>
      %139 = arith.addf %137, %138 : vector<64x1xf32>
      %140 = math.rsqrt %139 : vector<64x1xf32>
      %141 = vector.broadcast %140 : vector<64x1xf32> to vector<64x128xf32>
      %142 = arith.mulf %132, %141 : vector<64x128xf32>
      %143 = vector.broadcast %6 : vector<1x128xf32> to vector<64x128xf32>
      %144 = arith.mulf %142, %143 : vector<64x128xf32>
      %145 = vector.broadcast %7 : vector<1x128xf32> to vector<64x128xf32>
      %146 = arith.addf %144, %145 : vector<64x128xf32>
      %c0_54 = arith.constant 0 : index
      %c0_55 = arith.constant 0 : index
      %147 = vector.load %arg12[%c0_54, %c0_55] : memref<64x128xf32, #tpu.memory_space<vmem>>, vector<64x128xf32>
      tpu.vector_store %arg12[%c0_54, %c0_55], %146 {strides = array<i32>} : memref<64x128xf32, #tpu.memory_space<vmem>>, vector<64x128xf32>,
    } else {
    }
    %c1_i32_27 = arith.constant 1 : i32
    %33 = arith.cmpi eq, %arg1, %c1_i32_27 : i32
    %34 = arith.extui %33 : i1 to i32
    %c0_i32_28 = arith.constant 0 : i32
    %35 = arith.cmpi ne, %34, %c0_i32_28 : i32
    scf.if %35 {
      %36 = vector.shape_cast %11 : vector<64x128xf32> to vector<8x8x128xf32>
      %37 = vector.extract_strided_slice %36 {offsets = [0, 0, 0], sizes = [8, 1, 128], strides = [1, 1, 1]} : vector<8x8x128xf32> to vector<8x1x128xf32>
      %38 = vector.shape_cast %37 : vector<8x1x128xf32> to vector<8x128xf32>
      %39 = vector.extract_strided_slice %21 {offsets = [0, 0], sizes = [64, 64], strides = [1, 1]} : vector<64x384xbf16> to vector<64x64xbf16>
      %40 = vector.shape_cast %39 : vector<64x64xbf16> to vector<8x8x64xbf16>
      %41 = vector.extract_strided_slice %40 {offsets = [0, 0, 0], sizes = [8, 1, 64], strides = [1, 1, 1]} : vector<8x8x64xbf16> to vector<8x1x64xbf16>
      %42 = vector.extract_strided_slice %21 {offsets = [0, 128], sizes = [64, 64], strides = [1, 1]} : vector<64x384xbf16> to vector<64x64xbf16>
      %43 = vector.shape_cast %42 : vector<64x64xbf16> to vector<8x8x64xbf16>
      %44 = vector.extract_strided_slice %21 {offsets = [0, 256], sizes = [64, 64], strides = [1, 1]} : vector<64x384xbf16> to vector<64x64xbf16>
      %45 = vector.shape_cast %44 : vector<64x64xbf16> to vector<8x8x64xbf16>
      "tpu.trace_start"() <{level = 10 : i32, message = "bqd,bkd->bqk"}> : () -> ()
      %cst_29 = arith.constant dense<0.000000e+00> : vector<8x1x8xf32>
      %46 = tpu.matmul %41, %43, %cst_29 {dimension_numbers = #tpu.dot_dimension_numbers<[2], [2], [1], [1], [0, 0, 0, 1, 1, 1], [0], [0]>} : vector<8x1x64xbf16>, vector<8x8x64xbf16>, vector<8x1x8xf32> -> vector<8x1x8xf32>
      "tpu.trace_stop"() : () -> ()
      %47 = arith.addf %46, %12 : vector<8x1x8xf32>
      %cst_30 = arith.constant dense<0xFF800000> : vector<8x1xf32>
      %48 = vector.multi_reduction <maximumf>, %47, %cst_30 [2] : vector<8x1x8xf32> to vector<8x1xf32>
      %49 = vector.shape_cast %48 : vector<8x1xf32> to vector<8x1x1xf32>
      %50 = vector.broadcast %49 : vector<8x1x1xf32> to vector<8x1x8xf32>
      %51 = arith.subf %47, %50 : vector<8x1x8xf32>
      %52 = math.exp %51 : vector<8x1x8xf32>
      %cst_31 = arith.constant dense<0.000000e+00> : vector<8x1xf32>
      %53 = vector.multi_reduction <add>, %52, %cst_31 [2] : vector<8x1x8xf32> to vector<8x1xf32>
      %54 = vector.shape_cast %53 : vector<8x1xf32> to vector<8x1x1xf32>
      %55 = tpu.reciprocal %54 {approx = true} : vector<8x1x1xf32> -> vector<8x1x1xf32>
      %56 = vector.broadcast %55 : vector<8x1x1xf32> to vector<8x1x8xf32>
      %57 = arith.mulf %52, %56 : vector<8x1x8xf32>
      %58 = arith.truncf %57 : vector<8x1x8xf32> to vector<8x1x8xbf16>
      "tpu.trace_start"() <{level = 10 : i32, message = "bqk,bkd->bqd"}> : () -> ()
      %cst_32 = arith.constant dense<0.000000e+00> : vector<8x1x64xf32>
      %59 = tpu.matmul %58, %45, %cst_32 {dimension_numbers = #tpu.dot_dimension_numbers<[2], [1], [1], [2], [0, 0, 0, 1, 1, 2], [0], [0]>} : vector<8x1x8xbf16>, vector<8x8x64xbf16>, vector<8x1x64xf32> -> vector<8x1x64xf32>
      "tpu.trace_stop"() : () -> ()
      %60 = vector.extract_strided_slice %21 {offsets = [0, 64], sizes = [64, 64], strides = [1, 1]} : vector<64x384xbf16> to vector<64x64xbf16>
      %61 = vector.shape_cast %60 : vector<64x64xbf16> to vector<8x8x64xbf16>
      %62 = vector.extract_strided_slice %61 {offsets = [0, 0, 0], sizes = [8, 1, 64], strides = [1, 1, 1]} : vector<8x8x64xbf16> to vector<8x1x64xbf16>
      %63 = vector.extract_strided_slice %21 {offsets = [0, 192], sizes = [64, 64], strides = [1, 1]} : vector<64x384xbf16> to vector<64x64xbf16>
      %64 = vector.shape_cast %63 : vector<64x64xbf16> to vector<8x8x64xbf16>
      %65 = vector.extract_strided_slice %21 {offsets = [0, 320], sizes = [64, 64], strides = [1, 1]} : vector<64x384xbf16> to vector<64x64xbf16>
      %66 = vector.shape_cast %65 : vector<64x64xbf16> to vector<8x8x64xbf16>
      "tpu.trace_start"() <{level = 10 : i32, message = "bqd,bkd->bqk"}> : () -> ()
      %cst_33 = arith.constant dense<0.000000e+00> : vector<8x1x8xf32>
      %67 = tpu.matmul %62, %64, %cst_33 {dimension_numbers = #tpu.dot_dimension_numbers<[2], [2], [1], [1], [0, 0, 0, 1, 1, 1], [0], [0]>} : vector<8x1x64xbf16>, vector<8x8x64xbf16>, vector<8x1x8xf32> -> vector<8x1x8xf32>
      "tpu.trace_stop"() : () -> ()
      %68 = arith.addf %67, %12 : vector<8x1x8xf32>
      %cst_34 = arith.constant dense<0xFF800000> : vector<8x1xf32>
      %69 = vector.multi_reduction <maximumf>, %68, %cst_34 [2] : vector<8x1x8xf32> to vector<8x1xf32>
      %70 = vector.shape_cast %69 : vector<8x1xf32> to vector<8x1x1xf32>
      %71 = vector.broadcast %70 : vector<8x1x1xf32> to vector<8x1x8xf32>
      %72 = arith.subf %68, %71 : vector<8x1x8xf32>
      %73 = math.exp %72 : vector<8x1x8xf32>
      %cst_35 = arith.constant dense<0.000000e+00> : vector<8x1xf32>
      %74 = vector.multi_reduction <add>, %73, %cst_35 [2] : vector<8x1x8xf32> to vector<8x1xf32>
      %75 = vector.shape_cast %74 : vector<8x1xf32> to vector<8x1x1xf32>
      %76 = tpu.reciprocal %75 {approx = true} : vector<8x1x1xf32> -> vector<8x1x1xf32>
      %77 = vector.broadcast %76 : vector<8x1x1xf32> to vector<8x1x8xf32>
      %78 = arith.mulf %73, %77 : vector<8x1x8xf32>
      %79 = arith.truncf %78 : vector<8x1x8xf32> to vector<8x1x8xbf16>
      "tpu.trace_start"() <{level = 10 : i32, message = "bqk,bkd->bqd"}> : () -> ()
      %cst_36 = arith.constant dense<0.000000e+00> : vector<8x1x64xf32>
      %80 = tpu.matmul %79, %66, %cst_36 {dimension_numbers = #tpu.dot_dimension_numbers<[2], [1], [1], [2], [0, 0, 0, 1, 1, 2], [0], [0]>} : vector<8x1x8xbf16>, vector<8x8x64xbf16>, vector<8x1x64xf32> -> vector<8x1x64xf32>
      "tpu.trace_stop"() : () -> ()
      %81 = tpu.concatenate %59, %80 in 2 : vector<8x1x64xf32>, vector<8x1x64xf32> -> vector<8x1x128xf32>
      %82 = vector.shape_cast %81 : vector<8x1x128xf32> to vector<8x128xf32>
      %83 = arith.truncf %82 : vector<8x128xf32> to vector<8x128xbf16>
      %cst_37 = arith.constant dense<0.000000e+00> : vector<8x128xf32>
      %84 = tpu.matmul %83, %23, %cst_37 {dimension_numbers = #tpu.dot_dimension_numbers<[1], [0], [0], [1], [0, 0, 1, 1], [], []>} : vector<8x128xbf16>, vector<128x128xbf16>, vector<8x128xf32> -> vector<8x128xf32>
      %85 = vector.broadcast %2 : vector<1x128xf32> to vector<8x128xf32>
      %86 = arith.addf %84, %85 : vector<8x128xf32>
      %87 = arith.addf %86, %38 : vector<8x128xf32>
      %cst_38 = arith.constant dense<0.000000e+00> : vector<8xf32>
      %88 = vector.multi_reduction <add>, %87, %cst_38 [1] : vector<8x128xf32> to vector<8xf32>
      %89 = vector.shape_cast %88 : vector<8xf32> to vector<8x1xf32>
      %cst_39 = arith.constant 1.280000e+02 : f32
      %90 = vector.broadcast %cst_39 : f32 to vector<8x1xf32>
      %91 = arith.divf %89, %90 : vector<8x1xf32>
      %92 = vector.broadcast %91 : vector<8x1xf32> to vector<8x128xf32>
      %93 = arith.subf %87, %92 : vector<8x128xf32>
      %94 = arith.mulf %93, %93 : vector<8x128xf32>
      %cst_40 = arith.constant dense<0.000000e+00> : vector<8xf32>
      %95 = vector.multi_reduction <add>, %94, %cst_40 [1] : vector<8x128xf32> to vector<8xf32>
      %96 = vector.shape_cast %95 : vector<8xf32> to vector<8x1xf32>
      %cst_41 = arith.constant 1.280000e+02 : f32
      %97 = vector.broadcast %cst_41 : f32 to vector<8x1xf32>
      %98 = arith.divf %96, %97 : vector<8x1xf32>
      %cst_42 = arith.constant 9.99999996E-13 : f32
      %99 = vector.broadcast %cst_42 : f32 to vector<8x1xf32>
      %100 = arith.addf %98, %99 : vector<8x1xf32>
      %101 = math.rsqrt %100 : vector<8x1xf32>
      %102 = vector.broadcast %101 : vector<8x1xf32> to vector<8x128xf32>
      %103 = arith.mulf %93, %102 : vector<8x128xf32>
      %104 = vector.broadcast %3 : vector<1x128xf32> to vector<8x128xf32>
      %105 = arith.mulf %103, %104 : vector<8x128xf32>
      %106 = vector.broadcast %4 : vector<1x128xf32> to vector<8x128xf32>
      %107 = arith.addf %105, %106 : vector<8x128xf32>
      %108 = arith.truncf %107 : vector<8x128xf32> to vector<8x128xbf16>
      %cst_43 = arith.constant dense<0.000000e+00> : vector<8x512xf32>
      %109 = tpu.matmul %108, %25, %cst_43 {dimension_numbers = #tpu.dot_dimension_numbers<[1], [0], [0], [1], [0, 0, 1, 1], [], []>} : vector<8x128xbf16>, vector<128x512xbf16>, vector<8x512xf32> -> vector<8x512xf32>
      %110 = vector.broadcast %27 : vector<1x512xf32> to vector<8x512xf32>
      %111 = arith.addf %109, %110 : vector<8x512xf32>
      %cst_44 = arith.constant 5.000000e-01 : f32
      %112 = vector.broadcast %cst_44 : f32 to vector<8x512xf32>
      %113 = arith.mulf %112, %111 : vector<8x512xf32>
      %cst_45 = arith.constant 4.471500e-02 : f32
      %114 = vector.broadcast %cst_45 : f32 to vector<8x512xf32>
      %115 = arith.mulf %114, %111 : vector<8x512xf32>
      %116 = arith.mulf %115, %111 : vector<8x512xf32>
      %117 = arith.mulf %116, %111 : vector<8x512xf32>
      %118 = arith.addf %111, %117 : vector<8x512xf32>
      %cst_46 = arith.constant 0.797884583 : f32
      %119 = vector.broadcast %cst_46 : f32 to vector<8x512xf32>
      %120 = arith.mulf %119, %118 : vector<8x512xf32>
      %121 = math.tanh %120 : vector<8x512xf32>
      %cst_47 = arith.constant 1.000000e+00 : f32
      %122 = vector.broadcast %cst_47 : f32 to vector<8x512xf32>
      %123 = arith.addf %122, %121 : vector<8x512xf32>
      %124 = arith.mulf %113, %123 : vector<8x512xf32>
      %125 = arith.truncf %124 : vector<8x512xf32> to vector<8x512xbf16>
      %cst_48 = arith.constant dense<0.000000e+00> : vector<8x128xf32>
      %126 = tpu.matmul %125, %29, %cst_48 {dimension_numbers = #tpu.dot_dimension_numbers<[1], [0], [0], [1], [0, 0, 1, 1], [], []>} : vector<8x512xbf16>, vector<512x128xbf16>, vector<8x128xf32> -> vector<8x128xf32>
      %127 = vector.broadcast %5 : vector<1x128xf32> to vector<8x128xf32>
      %128 = arith.addf %126, %127 : vector<8x128xf32>
      %129 = arith.addf %128, %107 : vector<8x128xf32>
      %cst_49 = arith.constant dense<0.000000e+00> : vector<8xf32>
      %130 = vector.multi_reduction <add>, %129, %cst_49 [1] : vector<8x128xf32> to vector<8xf32>
      %131 = vector.shape_cast %130 : vector<8xf32> to vector<8x1xf32>
      %cst_50 = arith.constant 1.280000e+02 : f32
      %132 = vector.broadcast %cst_50 : f32 to vector<8x1xf32>
      %133 = arith.divf %131, %132 : vector<8x1xf32>
      %134 = vector.broadcast %133 : vector<8x1xf32> to vector<8x128xf32>
      %135 = arith.subf %129, %134 : vector<8x128xf32>
      %136 = arith.mulf %135, %135 : vector<8x128xf32>
      %cst_51 = arith.constant dense<0.000000e+00> : vector<8xf32>
      %137 = vector.multi_reduction <add>, %136, %cst_51 [1] : vector<8x128xf32> to vector<8xf32>
      %138 = vector.shape_cast %137 : vector<8xf32> to vector<8x1xf32>
      %cst_52 = arith.constant 1.280000e+02 : f32
      %139 = vector.broadcast %cst_52 : f32 to vector<8x1xf32>
      %140 = arith.divf %138, %139 : vector<8x1xf32>
      %cst_53 = arith.constant 9.99999996E-13 : f32
      %141 = vector.broadcast %cst_53 : f32 to vector<8x1xf32>
      %142 = arith.addf %140, %141 : vector<8x1xf32>
      %143 = math.rsqrt %142 : vector<8x1xf32>
      %144 = vector.broadcast %143 : vector<8x1xf32> to vector<8x128xf32>
      %145 = arith.mulf %135, %144 : vector<8x128xf32>
      %146 = vector.broadcast %6 : vector<1x128xf32> to vector<8x128xf32>
      %147 = arith.mulf %145, %146 : vector<8x128xf32>
      %148 = vector.broadcast %7 : vector<1x128xf32> to vector<8x128xf32>
      %149 = arith.addf %147, %148 : vector<8x128xf32>
      %c0_54 = arith.constant 0 : index
      %c0_55 = arith.constant 0 : index
      %150 = vector.load %arg11[%c0_54, %c0_55] : memref<8x128xf32, #tpu.memory_space<vmem>>, vector<8x128xf32>
      tpu.vector_store %arg11[%c0_54, %c0_55], %149 {strides = array<i32>} : memref<8x128xf32, #tpu.memory_space<vmem>>, vector<8x128xf32>,
    } else {
    }
    return
  }
  func.func @transform_0(%arg0: i32, %arg1: i32) -> (i32, i32, i32) {
    %c0_i32 = arith.constant 0 : i32
    %c0_i32_0 = arith.constant 0 : i32
    %c0_i32_1 = arith.constant 0 : i32
    return %arg0, %c0_i32, %c0_i32_0 : i32, i32, i32
  }
  func.func @transform_1(%arg0: i32, %arg1: i32) -> (i32, i32, i32) {
    %c0_i32 = arith.constant 0 : i32
    %c0_i32_0 = arith.constant 0 : i32
    %c0_i32_1 = arith.constant 0 : i32
    return %arg0, %c0_i32, %c0_i32_0 : i32, i32, i32
  }
  func.func @transform_2(%arg0: i32, %arg1: i32) -> (i32, i32, i32) {
    %c0_i32 = arith.constant 0 : i32
    %c0_i32_0 = arith.constant 0 : i32
    %c0_i32_1 = arith.constant 0 : i32
    return %arg1, %c0_i32, %c0_i32_0 : i32, i32, i32
  }
  func.func @transform_3(%arg0: i32, %arg1: i32) -> (i32, i32, i32) {
    %c0_i32 = arith.constant 0 : i32
    %c0_i32_0 = arith.constant 0 : i32
    %c0_i32_1 = arith.constant 0 : i32
    return %arg1, %c0_i32, %c0_i32_0 : i32, i32, i32
  }
  func.func @transform_4(%arg0: i32, %arg1: i32) -> (i32, i32, i32) {
    %c0_i32 = arith.constant 0 : i32
    %c0_i32_0 = arith.constant 0 : i32
    %c0_i32_1 = arith.constant 0 : i32
    return %arg1, %c0_i32, %c0_i32_0 : i32, i32, i32
  }
  func.func @transform_5(%arg0: i32, %arg1: i32) -> (i32, i32, i32) {
    %c0_i32 = arith.constant 0 : i32
    %c0_i32_0 = arith.constant 0 : i32
    %c0_i32_1 = arith.constant 0 : i32
    return %arg1, %c0_i32, %c0_i32_0 : i32, i32, i32
  }
  func.func @transform_6(%arg0: i32, %arg1: i32) -> (i32, i32, i32) {
    %c0_i32 = arith.constant 0 : i32
    %c0_i32_0 = arith.constant 0 : i32
    %c0_i32_1 = arith.constant 0 : i32
    return %arg1, %c0_i32, %c0_i32_0 : i32, i32, i32
  }
  func.func @transform_7(%arg0: i32, %arg1: i32) -> (i32, i32, i32) {
    %c0_i32 = arith.constant 0 : i32
    %c0_i32_0 = arith.constant 0 : i32
    %c0_i32_1 = arith.constant 0 : i32
    return %arg1, %c0_i32, %c0_i32_0 : i32, i32, i32
  }
  func.func @transform_8(%arg0: i32, %arg1: i32) -> (i32, i32, i32) {
    %c0_i32 = arith.constant 0 : i32
    %c0_i32_0 = arith.constant 0 : i32
    %c0_i32_1 = arith.constant 0 : i32
    return %arg1, %c0_i32, %c0_i32_0 : i32, i32, i32
  }
  func.func @transform_9(%arg0: i32, %arg1: i32) -> (i32, i32) {
    %c0_i32 = arith.constant 0 : i32
    %c0_i32_0 = arith.constant 0 : i32
    return %arg0, %c0_i32 : i32, i32
  }
}

</mosaic_0001>

<bundles_post_ra>
// kernel: text_encoder_forward.1
= control target key start
LH: loop header
LB: loop body
LE: loop exit
PB: predicated region body
PF: predicated region fallthrough
CT: control target
= control target key end

     0   :  { %s11437_s0 = inlined_call_operand.vmem [shape: f32[16,8,128], index: 0, kind: input, shape index: {}]   ;;  %s11438_s1 = inlined_call_operand.vmem [shape: f32[16,1,8], index: 1, kind: input, shape index: {}]   ;;  %s11439_s2 = inlined_call_operand.vmem [shape: bf16[2,128,384], index: 2, kind: input, shape index: {}]   ;;  %s11440_s3 = inlined_call_operand.vmem [shape: f32[2,1,384], index: 3, kind: input, shape index: {}]   ;;  %s11441_s4 = inlined_call_operand.vmem [shape: bf16[2,128,128], index: 4, kind: input, shape index: {}]   ;;  %s11442_s5 = inlined_call_operand.vmem [shape: bf16[2,128,512], index: 5, kind: input, shape index: {}]   ;;  %s11443_s6 = inlined_call_operand.vmem [shape: f32[2,1,512], index: 6, kind: input, shape index: {}]   ;;  %s11444_s7 = inlined_call_operand.vmem [shape: bf16[2,512,128], index: 7, kind: input, shape index: {}]   ;;  %s11445_s8 = inlined_call_operand.vmem [shape: f32[2,8,128], index: 8, kind: input, shape index: {}]   ;;  %s11446_s9 = inlined_call_operand.hbm [shape: f32[16,128], index: 9, kind: output, shape index: {}]  }
   0x1   :  { %11630 = sst [smem:[#allocation207_spill]] %s11437_s0 }
   0x2   :  { %11631 = sst [smem:[#allocation208_spill]] %s11438_s1 }
   0x3   :  { %11632 = sst [smem:[#allocation209_spill]] %s11439_s2 }
   0x4   :  { %11633 = sst [smem:[#allocation210_spill]] %s11446_s9 }
   0x5   :  { %14 = vsyncpa [#allocation4], 0 }
   0x6   :  { %16 = vsyncpa [#allocation4 + $0x1], 0  ;;  %s8744_s30 = smov 0   ;;  %s8746_s10 = smov 0  }
   0x7   :  { %s8748_s11 = smov 0   ;;  %s8750_s12 = smov 0  }
   0x8   :  { %s8752_s13 = smov 0   ;;  %s8754_s14 = smov 0  }
   0x9   :  { %s8756_s15 = smov 0   ;;  %s8758_s16 = smov 0  }
   0xa LB: > { %11634 = sst [smem:[#allocation6_spill]] %s8654_s30  ;;  %s7073_s17 = sadd.s32 4294967295, %s8682_s16   ;;  %s8682_s16 = sphi %s8758_s16, %s22_s16   ;;  %s8678_s15 = sphi %s8756_s15, %s12168_s15   ;;  %s8674_s14 = sphi %s8754_s14, %s12163_s14   ;;  %s8670_s13 = sphi %s8752_s13, %s12162_s13   ;;  %s8666_s12 = sphi %s8750_s12, %s12167_s12   ;;  %s8662_s11 = sphi %s8748_s11, %s12160_s11   ;;  %s8658_s10 = sphi %s8746_s10, %s12166_s10   ;;  %s8654_s30 = sphi %s8744_s30, %s12165_s30  }
   0xb   : > { %11635 = sst [smem:[#allocation7_spill]] %s8662_s11  ;;  %s7074_s18 = sadd.s32 4294967294, %s8682_s16  }
   0xc   : > { %11636 = sst [smem:[#allocation8_spill]] %s8674_s14  ;;  %s31_s19 = sadd.s32 1, %s8674_s14 }
   0xd   : > { %11637 = sst [smem:[#allocation9_spill]] %s8678_s15  ;;  %p32_p0 = scmp.ge.s32.totalorder %s31_s19, 2 }
   0xe   : > { %11638 = sst [smem:[#allocation10_spill]] %s8682_s16  ;;  %s34_s20 = sadd.s32 1, %s8678_s15 }
   0xf   : > { %p285_p1 = scmp.ne.s32.totalorder %s8662_s11, %s8658_s10  ;;  %p286_p2 = scmp.eq.s32.totalorder %s7073_s17, 3 }
  0x10   : > { %s12170_s19 = smov (%p32_p0, %s31_s19), 0  ;;  %s12172_s20 = smov (!%p32_p0, %s34_s20), %s8678_s15 }
  0x11   : > { %11639 = sst [smem:[#allocation11_spill]] %s12170_s19  ;;  %p8793_p3 = por %p286_p2, %p285_p1 }
  0x12   : > { %p291_p4 = scmp.ne.s32.totalorder %s8658_s10, %s8654_s30  ;;  %p36_p5 = scmp.ge.s32.totalorder %s12172_s20, 2 }
  0x13   : > { %s11640_s21 = scalar_select %p8793_p3, 1, 0 }
  0x14   : > { %p292_p6 = scmp.eq.s32.totalorder %s7074_s18, 3  ;;  %p7077_p7 = scmp.ge.s32.totalorder %s8682_s16, 1 }
  0x15   : > { %11641 = sst [smem:[#allocation12_spill]] %s11640_s21  ;;  %p380_p8 = scmp.lt.s32.totalorder %s8682_s16, 5 }
  0x16   : > { %s12174_s20 = smov (%p36_p5, %s12172_s20), 0  ;;  %p8803_p9 = por %p292_p6, %p291_p4 }
  0x17   : > { %11642 = sst [smem:[#allocation13_spill]] %s12174_s20  ;;  %p381_p10 = pnand %p7077_p7, %p380_p8 }
  0x18   : > { %s11643_s22 = scalar_select %p8803_p9, 1, 0 }
  0x19   : > { %s272_s23 = ssub.s32 %s8678_s15, %s12174_s20  ;;  %s275_s24 = sadd.s32 1, %s8662_s11 }
  0x1a   : > { %11644 = sst [smem:[#allocation14_spill]] %s11643_s22  ;;  %p273_p11 = scmp.eq.s32.totalorder %s272_s23, 0 }
  0x1b   : > { %384 = sbr.rel (%p381_p10) target bundleno = 6518 (0x1976), region = 56 }
  0x1c   : > { %s8811_s25 = scalar_select %p273_p11, %s8662_s11, %s275_s24  }
  0x1e   : > { %11645 = sst [smem:[#allocation15_spill]] %s8811_s25 }
  0x22   : > { %s11450_s26 = sand.u32 1, %s8658_s10   ;;  %s7079_s27 = sshll.u32 %s8670_s13, 3 }
  0x23   : > { %s8817_s28 = sshll.u32 %s11450_s26, 3  ;;  %p453_p12 = scmp.lt.s32.totalorder %s7079_s27, 15 }
  0x24   : > { %p463_p13 = scmp.lt.s32.totalorder %s8666_s12, 1  ;;  %s11646_s1 = sld [smem:[#allocation208_spill]] }
  0x25   : > { %s12176_s27 = smov (!%p453_p12, %s7079_s27), 15  ;;  %s11647_s0 = sld [smem:[#allocation207_spill]] }
  0x26   : > { %s464_s29 = scalar_select %p463_p13, %s8666_s12, 1 }
  0x27   : > { %s7080_s17 = sshll.u32 %s12176_s27, 3  ;;  %s11648_s2 = sld [smem:[#allocation209_spill]] }
  0x28   : > { %s8182_s14 = smul.u32 192, %s464_s29  ;;  %s7378_s26 = sshll.u32 %s464_s29, 6 }
  0x29   : > { %s8183_s25 = smul.u32 3, %s464_s29  ;;  %s8839_s18 = scalar_lea.vmem %s11441_s4, %s7378_s26 }
  0x2a   : > { %s8824_s24 = scalar_lea.vmem %s11646_s1, %s12176_s27  ;;  %s7379_s20 = sshll.u32 %s464_s29, 8 }
  0x2b   : > { %s8829_s15 = scalar_lea.vmem %s11647_s0, %s7080_s17  ;;  %s8844_s19 = scalar_lea.vmem %s11440_s3, %s8183_s25 }
  0x2c   : > { %s8849_s1 = scalar_lea.vmem %s11442_s5, %s7379_s20  ;;  %s7087_s21 = sshll.u32 %s464_s29, 2 }
  0x2d   : > { %s8834_s30 = scalar_lea.vmem %s11648_s2, %s8182_s14  ;;  %s8854_s22 = scalar_lea.vmem %s11443_s6, %s7087_s21 }
  0x2e   : > { %s8859_s26 = scalar_lea.vmem %s11444_s7, %s7379_s20  ;;  %s7090_s27 = sshll.u32 %s464_s29, 3 }
  0x2f   : > { %s494_s2 = scalar_lea.vmem %s11445_s8, %s7090_s27  ;;  %s451_s0 = scalar_lea.vmem [#allocation3], %s8817_s28 }
  0x30   : > { %v8864_v0 = vld [vmem:[%s494_s2] sm:$0xff]  ;;  %p7091_p0 = scmp.ne.s32.totalorder %s8666_s12, 0 }
  0x31   : > { %11649 = vst [vmem:[#allocation16_spill] sm:$0xff] %v8864_v0  ;;  %v501_v1 = vld [vmem:[%s8829_s15] sm:$0xff] (!%p7091_p0)  ;;  %v503_v2 = vld [vmem:[%s8829_s15 + $0x10] sm:$0xff] (!%p7091_p0)  ;;  %v502_v3 = vld [vmem:[%s8829_s15 + $0x8] sm:$0xff] (!%p7091_p0)  ;;  %v598_v43 = vlaneseq (!%p7091_p0) }
  0x32   : > { %500 = sbr.rel (%p7091_p0) target bundleno = 378 (0x17a), region = 60  ;;  %509 = vadd.xlane.f32.xlu0 (!%p7091_p0), %v501_v1  ;;  %513 = vadd.xlane.f32.xlu1 (!%p7091_p0), %v503_v2  ;;  %v504_v4 = vld [vmem:[%s8829_s15 + $0x18] sm:$0xff] (!%p7091_p0)  ;;  %v505_v5 = vld [vmem:[%s8829_s15 + $0x20] sm:$0xff] (!%p7091_p0)  ;;  %v506_v6 = vld [vmem:[%s8829_s15 + $0x28] sm:$0xff] (!%p7091_p0) }
  0x33   : > { %v507_v7 = vld [vmem:[%s8829_s15 + $0x30] sm:$0xff] (!%p7091_p0)  ;;  %v508_v8 = vld [vmem:[%s8829_s15 + $0x38] sm:$0xff] (!%p7091_p0)  ;;  %v599_v49 = vshrl.u32 (!%p7091_p0), %v598_v43, 7 }
  0x35   : > { %v600_v56 = vsub.s32 (!%p7091_p0), 6, %v599_v49  ;;  %v612_v59 = vsub.s32 (!%p7091_p0), 7, %v599_v49 }
  0x36   : > { %511 = vadd.xlane.f32.xlu0 (!%p7091_p0), %v502_v3  ;;  %515 = vadd.xlane.f32.xlu1 (!%p7091_p0), %v504_v4 }
  0x3a   : > { %517 = vadd.xlane.f32.xlu0 %v505_v5  ;;  %519 = vadd.xlane.f32.xlu1 %v506_v6 }
  0x3e   : > { %521 = vadd.xlane.f32.xlu0 %v507_v7  ;;  %523 = vadd.xlane.f32.xlu1 %v508_v8 }
  0xbf   : > { %v510_v9 = vpop.xlane.xlu0 %509  ;;  %v514_v10 = vpop.xlane.xlu1 %513 }
  0xc0   : > { %v526_v11 = vmul.f32 0.0078125, %v510_v9  ;;  %v528_v12 = vmul.f32 0.0078125, %v514_v10 }
  0xc2   : > { %v8876_v13 = vsub.f32 %v501_v1, %v526_v11  ;;  %v8878_v14 = vsub.f32 %v503_v2, %v528_v12  ;;  %v601_v1 = vrot.slane %v8864_v0, %v600_v56 }
  0xc3   : > { %v512_v15 = vpop.xlane.xlu0 %511  ;;  %v516_v16 = vpop.xlane.xlu1 %515 }
  0xc4   : > { %v527_v17 = vmul.f32 0.0078125, %v512_v15  ;;  %v542_v18 = vmul.f32 %v8876_v13, %v8876_v13  ;;  %v529_v19 = vmul.f32 0.0078125, %v516_v16  ;;  %v544_v22 = vmul.f32 %v8878_v14, %v8878_v14 }
  0xc6   : > { %v8882_v20 = vsub.f32 %v502_v3, %v527_v17  ;;  %550 = vadd.xlane.f32.xlu0 %v542_v18  ;;  %v8884_v21 = vsub.f32 %v504_v4, %v529_v19 }
  0xc7   : > { %v518_v23 = vpop.xlane.xlu0 %517  ;;  %v520_v24 = vpop.xlane.xlu1 %519 }
  0xc8   : > { %v530_v25 = vmul.f32 0.0078125, %v518_v23  ;;  %v543_v26 = vmul.f32 %v8882_v20, %v8882_v20  ;;  %v531_v27 = vmul.f32 0.0078125, %v520_v24  ;;  %v545_v30 = vmul.f32 %v8884_v21, %v8884_v21 }
  0xca   : > { %v8890_v28 = vsub.f32 %v505_v5, %v530_v25  ;;  %554 = vadd.xlane.f32.xlu0 %v544_v22  ;;  %552 = vadd.xlane.f32.xlu1 %v543_v26  ;;  %v8892_v29 = vsub.f32 %v506_v6, %v531_v27  ;;  %v613_v5 = vrot.slane %v8864_v0, %v612_v59 }
  0xcb   : > { %v522_v31 = vpop.xlane.xlu0 %521  ;;  %v524_v32 = vpop.xlane.xlu1 %523 }
  0xcc   : > { %v532_v33 = vmul.f32 0.0078125, %v522_v31  ;;  %v546_v34 = vmul.f32 %v8890_v28, %v8890_v28  ;;  %v533_v35 = vmul.f32 0.0078125, %v524_v32  ;;  %v547_v38 = vmul.f32 %v8892_v29, %v8892_v29 }
  0xce   : > { %v8898_v36 = vsub.f32 %v507_v7, %v532_v33  ;;  %556 = vadd.xlane.f32.xlu1 %v545_v30  ;;  %558 = vadd.xlane.f32.xlu0 %v546_v34  ;;  %v8900_v37 = vsub.f32 %v508_v8, %v533_v35 }
  0xd0   : > { %v548_v39 = vmul.f32 %v8898_v36, %v8898_v36  ;;  %v549_v40 = vmul.f32 %v8900_v37, %v8900_v37 }
  0xd2   : > { %560 = vadd.xlane.f32.xlu1 %v547_v38  ;;  %562 = vadd.xlane.f32.xlu0 %v548_v39 }
  0xd6   : > { %564 = vadd.xlane.f32.xlu1 %v549_v40 }
 0x153   : > { %v551_v41 = vpop.xlane.xlu0 %550 }
 0x154   : > { %v566_v42 = vmul.f32 0.0078125, %v551_v41 }
 0x156   : > { %v574_v44 = vadd.f32 1e-12, %v566_v42 }
 0x157   : > { %v553_v45 = vpop.xlane.xlu1 %552  ;;  %v555_v46 = vpop.xlane.xlu0 %554 }
 0x158   : > { %8264 = vrsqrt.f32 %v574_v44  ;;  %v567_v47 = vmul.f32 0.0078125, %v553_v45  ;;  %v568_v48 = vmul.f32 0.0078125, %v555_v46 }
 0x15a   : > { %v575_v50 = vadd.f32 1e-12, %v567_v47  ;;  %v576_v51 = vadd.f32 1e-12, %v568_v48 }
 0x15b   : > { %v557_v52 = vpop.xlane.xlu1 %556  ;;  %v559_v53 = vpop.xlane.xlu0 %558 }
 0x15c   : > { %8266 = vrsqrt.f32 %v575_v50  ;;  %v569_v54 = vmul.f32 0.0078125, %v557_v52  ;;  %v570_v55 = vmul.f32 0.0078125, %v559_v53 }
 0x15d   : > { %8268 = vrsqrt.f32 %v576_v51 }
 0x15e   : > { %v577_v57 = vadd.f32 1e-12, %v569_v54  ;;  %v578_v58 = vadd.f32 1e-12, %v570_v55 }
 0x15f   : > { %v561_v60 = vpop.xlane.xlu1 %560  ;;  %v563_v61 = vpop.xlane.xlu0 %562 }
 0x160   : > { %8270 = vrsqrt.f32 %v577_v57  ;;  %v571_v62 = vmul.f32 0.0078125, %v561_v60  ;;  %v572_v63 = vmul.f32 0.0078125, %v563_v61 }
 0x161   : > { %8272 = vrsqrt.f32 %v578_v58 }
 0x162   : > { %v8265_v2 = vpop.eup %8264  ;;  %v579_v3 = vadd.f32 1e-12, %v571_v62  ;;  %v580_v4 = vadd.f32 1e-12, %v572_v63 }
 0x163   : > { %v590_v6 = vmul.f32 %v8265_v2, %v8876_v13  ;;  %v565_v7 = vpop.xlane.xlu1 %564 }
 0x164   : > { %8274 = vrsqrt.f32 %v579_v3  ;;  %v573_v8 = vmul.f32 0.0078125, %v565_v7 }
 0x165   : > { %v602_v9 = vmul.f32 %v601_v1, %v590_v6  ;;  %8276 = vrsqrt.f32 %v580_v4 }
 0x166   : > { %v8267_v10 = vpop.eup %8266  ;;  %v581_v11 = vadd.f32 1e-12, %v573_v8 }
 0x167   : > { %v8269_v12 = vpop.eup %8268  ;;  %v614_v15 = vadd.f32 %v613_v5, %v602_v9  ;;  %v591_v16 = vmul.f32 %v8267_v10, %v8882_v20 }
 0x168   : > { %v592_v17 = vmul.f32 %v8269_v12, %v8878_v14  ;;  %8278 = vrsqrt.f32 %v581_v11 }
 0x169   : > { %622 = vst [vmem:[#allocation2] sm:$0xff] %v614_v15  ;;  %v603_v18 = vmul.f32 %v601_v1, %v591_v16 }
 0x16a   : > { %v8271_v19 = vpop.eup %8270  ;;  %v604_v22 = vmul.f32 %v601_v1, %v592_v17 }
 0x16b   : > { %v8273_v23 = vpop.eup %8272  ;;  %v615_v13 = vadd.f32 %v613_v5, %v603_v18  ;;  %v593_v24 = vmul.f32 %v8271_v19, %v8884_v21 }
 0x16c   : > { %v616_v25 = vadd.f32 %v613_v5, %v604_v22  ;;  %v594_v26 = vmul.f32 %v8273_v23, %v8890_v28 }
 0x16d   : > { %623 = vst [vmem:[#allocation2 + $0x8] sm:$0xff] %v615_v13  ;;  %v605_v27 = vmul.f32 %v601_v1, %v593_v24 }
 0x16e   : > { %v8275_v30 = vpop.eup %8274  ;;  %624 = vst [vmem:[#allocation2 + $0x10] sm:$0xff] %v616_v25  ;;  %v606_v31 = vmul.f32 %v601_v1, %v594_v26 }
 0x16f   : > { %v8277_v20 = vpop.eup %8276  ;;  %v617_v32 = vadd.f32 %v613_v5, %v605_v27  ;;  %v595_v14 = vmul.f32 %v8275_v30, %v8892_v29 }
 0x170   : > { %v618_v33 = vadd.f32 %v613_v5, %v606_v31  ;;  %v596_v34 = vmul.f32 %v8277_v20, %v8898_v36 }
 0x171   : > { %625 = vst [vmem:[#allocation2 + $0x18] sm:$0xff] %v617_v32  ;;  %v607_v35 = vmul.f32 %v601_v1, %v595_v14 }
 0x172   : > { %v8279_v38 = vpop.eup %8278  ;;  %626 = vst [vmem:[#allocation2 + $0x20] sm:$0xff] %v618_v33  ;;  %v608_v21 = vmul.f32 %v601_v1, %v596_v34 }
 0x173   : > { %v619_v39 = vadd.f32 %v613_v5, %v607_v35  ;;  %v597_v28 = vmul.f32 %v8279_v38, %v8900_v37 }
 0x174   : > { %v620_v40 = vadd.f32 %v613_v5, %v608_v21 }
 0x175   : > { %627 = vst [vmem:[#allocation2 + $0x28] sm:$0xff] %v619_v39  ;;  %v609_v41 = vmul.f32 %v601_v1, %v597_v28 }
 0x176   : > { %628 = vst [vmem:[#allocation2 + $0x30] sm:$0xff] %v620_v40 }
 0x177   : > { %v621_v42 = vadd.f32 %v613_v5, %v609_v41 }
 0x179   : > { %629 = vst [vmem:[#allocation2 + $0x38] sm:$0xff] %v621_v42 }
 0x17a PF: > { %v8919_v29 = vld [vmem:[%s8824_s24] sm:$0x1]  ;;  %v8922_v36 = vld [vmem:[%s8824_s24 + $0x1] sm:$0x1]  ;;  %v8925_v37 = vld [vmem:[%s8824_s24 + $0x2] sm:$0x1] }
 0x17b   : > { %11650 = vst [vmem:[#allocation17_spill] sm:$0xff] %v8919_v29  ;;  %11651 = vst [vmem:[#allocation18_spill] sm:$0xff] %v8922_v36  ;;  %v8928_v43 = vld [vmem:[%s8824_s24 + $0x3] sm:$0x1]  ;;  %v8931_v44 = vld [vmem:[%s8824_s24 + $0x4] sm:$0x1] }
 0x17c   : > { %11652 = vst [vmem:[#allocation19_spill] sm:$0xff] %v8925_v37  ;;  %11653 = vst [vmem:[#allocation20_spill] sm:$0xff] %v8928_v43  ;;  %v8934_v45 = vld [vmem:[%s8824_s24 + $0x5] sm:$0x1]  ;;  %v8937_v46 = vld [vmem:[%s8824_s24 + $0x6] sm:$0x1] }
 0x17d   : > { %11654 = vst [vmem:[#allocation21_spill] sm:$0xff] %v8931_v44  ;;  %11655 = vst [vmem:[#allocation22_spill] sm:$0xff] %v8934_v45  ;;  %v8940_v47 = vld [vmem:[%s8824_s24 + $0x7] sm:$0x1]  ;;  %v8282_v49 = vld [vmem:[%s8834_s30] ss:$12 sps:$4 sm:$0xff]  }
 0x17e   : > { %11656 = vst [vmem:[#allocation23_spill] sm:$0xff] %v8937_v46  ;;  %11657 = vst [vmem:[#allocation24_spill] sm:$0xff] %v8940_v47  ;;  %v8280_v48 = vld [vmem:[%s8834_s30 + $0x4] ss:$12 sps:$4 sm:$0xff]   ;;  %v8684_v50 = vmov 0   ;;  %v8959_v1 = vld [vmem:[#allocation2 + $0x8] sm:$0xff] }
 0x17f   : > { %859 = vmatprep.mubr.bf16.mxu0 %v8684_v50  ;;  %v8283_v51 = vld [vmem:[%s8834_s30 + $0x1c] ss:$12 sps:$4 sm:$0xff]   ;;  %827 = vmatprep.subr.bf16.mxu0 %v8280_v48  ;;  %v8285_v52 = vld [vmem:[%s8834_s30 + $0x18] ss:$12 sps:$4 sm:$0xff]   ;;  %v8286_v53 = vld [vmem:[%s8834_s30 + $0x34] ss:$12 sps:$4 sm:$0xff]  }
 0x180   : > { %828 = vmatpush1.bf16.msra.mxu0 %v8282_v49  ;;  %v8292_v54 = vld [vmem:[%s8834_s30 + $0x8] ss:$12 sps:$4 sm:$0xff]   ;;  %v8288_v55 = vld [vmem:[%s8834_s30 + $0x30] ss:$12 sps:$4 sm:$0xff]   ;;  %v8289_v56 = vld [vmem:[%s8834_s30 + $0x4c] ss:$12 sps:$4 sm:$0xff]  }
 0x181   : > { %829 = vmatprep.subr.bf16.mxu0 %v8283_v51  ;;  %7714 = vmatprep.subr.bf16.mxu1 %v8292_v54  ;;  %v8296_v57 = vld [vmem:[%s8834_s30 + $0x20] ss:$12 sps:$4 sm:$0xff]   ;;  %v8300_v58 = vld [vmem:[%s8834_s30 + $0x38] ss:$12 sps:$4 sm:$0xff]   ;;  %v8291_v59 = vld [vmem:[%s8834_s30 + $0x48] ss:$12 sps:$4 sm:$0xff]  }
 0x182   : > { %7715 = vmatpush3.bf16.msra.mxu1 %v8292_v54  ;;  %v8293_v60 = vld [vmem:[%s8834_s30 + $0x64] ss:$12 sps:$4 sm:$0xff]   ;;  %v8295_v62 = vld [vmem:[%s8834_s30 + $0x60] ss:$12 sps:$4 sm:$0xff]   ;;  %11659 = vst [vmem:[#allocation26_spill] sm:$0xff] %v8959_v1  ;;  %v8975_v16 = vld [vmem:[#allocation2 + $0x18] sm:$0xff] }
 0x183   : > { %7716 = vmatprep.subr.bf16.mxu1 %v8296_v57  ;;  %v8304_v61 = vld [vmem:[%s8834_s30 + $0x50] ss:$12 sps:$4 sm:$0xff]   ;;  %v8957_v63 = vld [vmem:[#allocation2] sm:$0xff]  ;;  %v8308_v4 = vld [vmem:[%s8834_s30 + $0x68] ss:$12 sps:$4 sm:$0xff]   ;;  %11661 = vst [vmem:[#allocation28_spill] sm:$0xff] %v8975_v16 }
 0x184   : > { %830 = vmatpush1.bf16.msra.mxu0 %v8285_v52  ;;  %11658 = vst [vmem:[#allocation25_spill] sm:$0xff] %v8957_v63  ;;  %v8297_v2 = vld [vmem:[%s8834_s30 + $0x7c] ss:$12 sps:$4 sm:$0xff]   ;;  %v678_v3 = vpack.c.bf16 %v8959_v1, %v8957_v63  ;;  %v8299_v5 = vld [vmem:[%s8834_s30 + $0x78] ss:$12 sps:$4 sm:$0xff]   ;;  %v8973_v15 = vld [vmem:[#allocation2 + $0x10] sm:$0xff] }
 0x185   : > { %831 = vmatprep.subr.bf16.mxu0 %v8286_v53  ;;  %v8301_v6 = vld [vmem:[%s8834_s30 + $0x94] ss:$12 sps:$4 sm:$0xff]   ;;  %v8303_v8 = vld [vmem:[%s8834_s30 + $0x90] ss:$12 sps:$4 sm:$0xff]   ;;  %v8305_v9 = vld [vmem:[%s8834_s30 + $0xac] ss:$12 sps:$4 sm:$0xff]   ;;  %v679_v19 = vpack.c.bf16 %v8975_v16, %v8973_v15 }
 0x186   : > { %7717 = vmatpush3.bf16.msra.mxu1 %v8296_v57  ;;  %7730 = vmatprep.mubr.bf16.mxu1 %v678_v3  ;;  %v8309_v7 = vld [vmem:[%s8834_s30 + $0x80] ss:$12 sps:$4 sm:$0xff]   ;;  %v8310_v10 = vld [vmem:[%s8834_s30 + $0x98] ss:$12 sps:$4 sm:$0xff]   ;;  %v8307_v11 = vld [vmem:[%s8834_s30 + $0xa8] ss:$12 sps:$4 sm:$0xff]  }
 0x187   : > { %7718 = vmatprep.subr.bf16.mxu1 %v8300_v58  ;;  %v8311_v12 = vld [vmem:[%s8834_s30 + $0xb0] ss:$12 sps:$4 sm:$0xff]   ;;  %11660 = vst [vmem:[#allocation27_spill] sm:$0xff] %v8973_v15  ;;  %v8978_v17 = vld [vmem:[#allocation2 + $0x20] sm:$0xff]  ;;  %v8980_v18 = vld [vmem:[#allocation2 + $0x28] sm:$0xff]  ;;  %p7116_p1 = scmp.ge.s32.totalorder %s8666_s12, 1 }
 0x188   : > { %832 = vmatpush1.bf16.msra.mxu0 %v8288_v55  ;;  %11662 = vst [vmem:[#allocation29_spill] sm:$0xff] %v8978_v17  ;;  %11663 = vst [vmem:[#allocation30_spill] sm:$0xff] %v8980_v18  ;;  %v680_v22 = vpack.c.bf16 %v8980_v18, %v8978_v17  ;;  %v8986_v23 = vld [vmem:[#allocation2 + $0x30] sm:$0xff]  ;;  %v8988_v13 = vld [vmem:[#allocation2 + $0x38] sm:$0xff] }
 0x189   : > { %833 = vmatprep.subr.bf16.mxu0 %v8289_v56  ;;  %11664 = vst [vmem:[#allocation31_spill] sm:$0xff] %v8986_v23  ;;  %11665 = vst [vmem:[#allocation32_spill] sm:$0xff] %v8988_v13  ;;  %v681_v24 = vpack.c.bf16 %v8988_v13, %v8986_v23  ;;  %v8995_v25 = vld [vmem:[%s8839_s18] sm:$0xf]  ;;  %v8998_v26 = vld [vmem:[%s8839_s18 + $0x4] sm:$0xf] }
 0x18a   : > { %7719 = vmatpush3.bf16.msra.mxu1 %v8300_v58  ;;  %11666 = vst [vmem:[#allocation33_spill] sm:$0xff] %v8995_v25  ;;  %11667 = vst [vmem:[#allocation34_spill] sm:$0xff] %v8998_v26  ;;  %v9001_v27 = vld [vmem:[%s8839_s18 + $0x8] sm:$0xf]  ;;  %v9004_v30 = vld [vmem:[%s8839_s18 + $0xc] sm:$0xf] }
 0x18b   : > { %7720 = vmatprep.subr.bf16.mxu1 %v8304_v61  ;;  %11668 = vst [vmem:[#allocation35_spill] sm:$0xff] %v9001_v27  ;;  %11669 = vst [vmem:[#allocation36_spill] sm:$0xff] %v9004_v30  ;;  %v9007_v31 = vld [vmem:[%s8839_s18 + $0x10] sm:$0xf]  ;;  %v9010_v20 = vld [vmem:[%s8839_s18 + $0x14] sm:$0xf] }
 0x18c   : > { %834 = vmatpush1.bf16.msra.mxu0 %v8291_v59  ;;  %11670 = vst [vmem:[#allocation37_spill] sm:$0xff] %v9007_v31  ;;  %11671 = vst [vmem:[#allocation38_spill] sm:$0xff] %v9010_v20  ;;  %v9013_v32 = vld [vmem:[%s8839_s18 + $0x18] sm:$0xf]  ;;  %v9016_v14 = vld [vmem:[%s8839_s18 + $0x1c] sm:$0xf] }
 0x18d   : > { %835 = vmatprep.subr.bf16.mxu0 %v8293_v60  ;;  %11672 = vst [vmem:[#allocation39_spill] sm:$0xff] %v9013_v32  ;;  %11673 = vst [vmem:[#allocation40_spill] sm:$0xff] %v9016_v14  ;;  %v9019_v33 = vld [vmem:[%s8839_s18 + $0x20] sm:$0xf]  ;;  %v9022_v34 = vld [vmem:[%s8839_s18 + $0x24] sm:$0xf] }
 0x18e   : > { %7721 = vmatpush3.bf16.msra.mxu1 %v8304_v61  ;;  %11674 = vst [vmem:[#allocation41_spill] sm:$0xff] %v9019_v33  ;;  %11675 = vst [vmem:[#allocation42_spill] sm:$0xff] %v9022_v34  ;;  %v9025_v35 = vld [vmem:[%s8839_s18 + $0x28] sm:$0xf]  ;;  %v9028_v38 = vld [vmem:[%s8839_s18 + $0x2c] sm:$0xf] }
 0x18f   : > { %7722 = vmatprep.subr.bf16.mxu1 %v8308_v4  ;;  %11676 = vst [vmem:[#allocation43_spill] sm:$0xff] %v9025_v35  ;;  %11677 = vst [vmem:[#allocation44_spill] sm:$0xff] %v9028_v38  ;;  %v9031_v21 = vld [vmem:[%s8839_s18 + $0x30] sm:$0xf]  ;;  %v9034_v39 = vld [vmem:[%s8839_s18 + $0x34] sm:$0xf] }
 0x190   : > { %836 = vmatpush1.bf16.msra.mxu0 %v8295_v62  ;;  %11678 = vst [vmem:[#allocation45_spill] sm:$0xff] %v9031_v21  ;;  %11679 = vst [vmem:[#allocation46_spill] sm:$0xff] %v9034_v39  ;;  %v9037_v28 = vld [vmem:[%s8839_s18 + $0x38] sm:$0xf]  ;;  %v9040_v40 = vld [vmem:[%s8839_s18 + $0x3c] sm:$0xf] }
 0x191   : > { %837 = vmatprep.subr.bf16.mxu0 %v8297_v2  ;;  %11680 = vst [vmem:[#allocation47_spill] sm:$0xff] %v9037_v28  ;;  %11681 = vst [vmem:[#allocation48_spill] sm:$0xff] %v9040_v40  ;;  %v9043_v41 = vld [vmem:[%s8849_s1] sm:$0xff]  ;;  %v9046_v42 = vld [vmem:[%s8849_s1 + $0x8] sm:$0xff] }
 0x192   : > { %7723 = vmatpush3.bf16.msra.mxu1 %v8308_v4  ;;  %11682 = vst [vmem:[#allocation49_spill] sm:$0xff] %v9043_v41  ;;  %11683 = vst [vmem:[#allocation50_spill] sm:$0xff] %v9046_v42  ;;  %v9049_v48 = vld [vmem:[%s8849_s1 + $0x10] sm:$0xff]  ;;  %v9052_v49 = vld [vmem:[%s8849_s1 + $0x18] sm:$0xff] }
 0x193   : > { %7724 = vmatprep.subr.bf16.mxu1 %v8309_v7  ;;  %11684 = vst [vmem:[#allocation51_spill] sm:$0xff] %v9049_v48  ;;  %11685 = vst [vmem:[#allocation52_spill] sm:$0xff] %v9052_v49  ;;  %v9058_v51 = vld [vmem:[%s8849_s1 + $0x28] sm:$0xff]  ;;  %v9061_v52 = vld [vmem:[%s8849_s1 + $0x30] sm:$0xff] }
 0x194   : > { %838 = vmatpush1.bf16.msra.mxu0 %v8299_v5  ;;  %11687 = vst [vmem:[#allocation54_spill] sm:$0xff] %v9058_v51  ;;  %11688 = vst [vmem:[#allocation55_spill] sm:$0xff] %v9061_v52  ;;  %v9064_v53 = vld [vmem:[%s8849_s1 + $0x38] sm:$0xff]  ;;  %v9067_v54 = vld [vmem:[%s8849_s1 + $0x40] sm:$0xff] }
 0x195   : > { %839 = vmatprep.subr.bf16.mxu0 %v8301_v6  ;;  %11689 = vst [vmem:[#allocation56_spill] sm:$0xff] %v9064_v53  ;;  %11690 = vst [vmem:[#allocation57_spill] sm:$0xff] %v9067_v54  ;;  %v9070_v55 = vld [vmem:[%s8849_s1 + $0x48] sm:$0xff]  ;;  %v9073_v56 = vld [vmem:[%s8849_s1 + $0x50] sm:$0xff] }
 0x196   : > { %7725 = vmatpush3.bf16.msra.mxu1 %v8309_v7  ;;  %11691 = vst [vmem:[#allocation58_spill] sm:$0xff] %v9070_v55  ;;  %11692 = vst [vmem:[#allocation59_spill] sm:$0xff] %v9073_v56  ;;  %v9076_v57 = vld [vmem:[%s8849_s1 + $0x58] sm:$0xff]  ;;  %v9079_v58 = vld [vmem:[%s8849_s1 + $0x60] sm:$0xff] }
 0x197   : > { %7726 = vmatprep.subr.bf16.mxu1 %v8310_v10  ;;  %11693 = vst [vmem:[#allocation60_spill] sm:$0xff] %v9076_v57  ;;  %11694 = vst [vmem:[#allocation61_spill] sm:$0xff] %v9079_v58  ;;  %v9082_v59 = vld [vmem:[%s8849_s1 + $0x68] sm:$0xff]  ;;  %v9085_v60 = vld [vmem:[%s8849_s1 + $0x70] sm:$0xff] }
 0x198   : > { %840 = vmatpush1.bf16.msra.mxu0 %v8303_v8  ;;  %11695 = vst [vmem:[#allocation62_spill] sm:$0xff] %v9082_v59  ;;  %11696 = vst [vmem:[#allocation63_spill] sm:$0xff] %v9085_v60  ;;  %v9088_v61 = vld [vmem:[%s8849_s1 + $0x78] sm:$0xff]  ;;  %v9091_v62 = vld [vmem:[%s8849_s1 + $0x80] sm:$0xff] }
 0x199   : > { %841 = vmatprep.subr.bf16.mxu0 %v8305_v9  ;;  %11697 = vst [vmem:[#allocation64_spill] sm:$0xff] %v9088_v61  ;;  %11698 = vst [vmem:[#allocation65_spill] sm:$0xff] %v9091_v62  ;;  %v9094_v2 = vld [vmem:[%s8849_s1 + $0x88] sm:$0xff]  ;;  %v9100_v4 = vld [vmem:[%s8849_s1 + $0x98] sm:$0xff] }
 0x19a   : > { %7727 = vmatpush3.bf16.msra.mxu1 %v8310_v10  ;;  %11699 = vst [vmem:[#allocation66_spill] sm:$0xff] %v9094_v2  ;;  %11701 = vst [vmem:[#allocation68_spill] sm:$0xff] %v9100_v4  ;;  %v9103_v5 = vld [vmem:[%s8849_s1 + $0xa0] sm:$0xff]  ;;  %v9106_v6 = vld [vmem:[%s8849_s1 + $0xa8] sm:$0xff] }
 0x19b   : > { %7728 = vmatprep.subr.bf16.mxu1 %v8311_v12  ;;  %11702 = vst [vmem:[#allocation69_spill] sm:$0xff] %v9103_v5  ;;  %11703 = vst [vmem:[#allocation70_spill] sm:$0xff] %v9106_v6  ;;  %v9109_v7 = vld [vmem:[%s8849_s1 + $0xb0] sm:$0xff]  ;;  %v9112_v8 = vld [vmem:[%s8849_s1 + $0xb8] sm:$0xff] }
 0x19c   : > { %842 = vmatpush1.bf16.msra.mxu0 %v8307_v11  ;;  %11704 = vst [vmem:[#allocation71_spill] sm:$0xff] %v9109_v7  ;;  %11705 = vst [vmem:[#allocation72_spill] sm:$0xff] %v9112_v8  ;;  %v9115_v9 = vld [vmem:[%s8849_s1 + $0xc0] sm:$0xff]  ;;  %v9118_v10 = vld [vmem:[%s8849_s1 + $0xc8] sm:$0xff] }
 0x19d   : > { %11706 = vst [vmem:[#allocation73_spill] sm:$0xff] %v9115_v9  ;;  %11707 = vst [vmem:[#allocation74_spill] sm:$0xff] %v9118_v10  ;;  %v9121_v11 = vld [vmem:[%s8849_s1 + $0xd0] sm:$0xff]  ;;  %v9136_v9 = vld [vmem:[%s8849_s1 + $0xf8] sm:$0xff] }
 0x19e   : > { %7729 = vmatpush3.bf16.msra.mxu1 %v8311_v12  ;;  %11708 = vst [vmem:[#allocation75_spill] sm:$0xff] %v9121_v11  ;;  %v9124_v12 = vld [vmem:[%s8849_s1 + $0xd8] sm:$0xff]  ;;  %11713 = vst [vmem:[#allocation80_spill] sm:$0xff] %v9136_v9  ;;  %v9139_v10 = vld [vmem:[%s8854_s22] sm:$0xf] }
 0x19f   : > { %860 = vmatmul.mubr.bf16.vlgmr.msra.gmra.mrb[0].mxu0 %v678_v3  ;;  %v9097_v3 = vld [vmem:[%s8849_s1 + $0x90] sm:$0xff]  ;;  %11709 = vst [vmem:[#allocation76_spill] sm:$0xff] %v9124_v12  ;;  %11714 = vst [vmem:[#allocation81_spill] sm:$0xff] %v9139_v10  ;;  %v9142_v11 = vld [vmem:[%s8859_s26] sm:$0xf] }
 0x1a0   : > { %869 = vmatprep.mubr.bf16.mxu0 %v8684_v50  ;;  %11700 = vst [vmem:[#allocation67_spill] sm:$0xff] %v9097_v3  ;;  %11715 = vst [vmem:[#allocation82_spill] sm:$0xff] %v9142_v11  ;;  %v9145_v12 = vld [vmem:[%s8859_s26 + $0x4] sm:$0xf]  ;;  %v9157_v9 = vld [vmem:[%s8859_s26 + $0x14] sm:$0xf] }
 0x1a1   : > { %7731 = vmatmul.mubr.bf16.vlgmr.msra.gmra.mrb[0].mxu1 %v679_v19  ;;  %11716 = vst [vmem:[#allocation83_spill] sm:$0xff] %v9145_v12  ;;  %11720 = vst [vmem:[#allocation87_spill] sm:$0xff] %v9157_v9  ;;  %v9160_v10 = vld [vmem:[%s8859_s26 + $0x18] sm:$0xf]  ;;  %v9163_v11 = vld [vmem:[%s8859_s26 + $0x1c] sm:$0xf] }
 0x1a2   : > { %7734 = vmatprep.mubr.bf16.mxu1 %v680_v22  ;;  %11721 = vst [vmem:[#allocation88_spill] sm:$0xff] %v9160_v10  ;;  %11722 = vst [vmem:[#allocation89_spill] sm:$0xff] %v9163_v11  ;;  %v9166_v12 = vld [vmem:[%s8859_s26 + $0x20] sm:$0xf]  ;;  %v9178_v9 = vld [vmem:[%s8859_s26 + $0x30] sm:$0xf] }
 0x1a3   : > { %11723 = vst [vmem:[#allocation90_spill] sm:$0xff] %v9166_v12  ;;  %11727 = vst [vmem:[#allocation94_spill] sm:$0xff] %v9178_v9  ;;  %v9181_v10 = vld [vmem:[%s8859_s26 + $0x34] sm:$0xf]  ;;  %v9184_v11 = vld [vmem:[%s8859_s26 + $0x38] sm:$0xf] }
 0x1a4   : > { %11728 = vst [vmem:[#allocation95_spill] sm:$0xff] %v9181_v10  ;;  %11729 = vst [vmem:[#allocation96_spill] sm:$0xff] %v9184_v11  ;;  %v9187_v12 = vld [vmem:[%s8859_s26 + $0x3c] sm:$0xf]  ;;  %v9199_v9 = vld [vmem:[%s8859_s26 + $0x4c] sm:$0xf] }
 0x1a5   : > { %11730 = vst [vmem:[#allocation97_spill] sm:$0xff] %v9187_v12  ;;  %11734 = vst [vmem:[#allocation101_spill] sm:$0xff] %v9199_v9  ;;  %v9202_v10 = vld [vmem:[%s8859_s26 + $0x50] sm:$0xf]  ;;  %v9205_v11 = vld [vmem:[%s8859_s26 + $0x54] sm:$0xf] }
 0x1a6   : > { %11735 = vst [vmem:[#allocation102_spill] sm:$0xff] %v9202_v10  ;;  %11736 = vst [vmem:[#allocation103_spill] sm:$0xff] %v9205_v11  ;;  %v9208_v12 = vld [vmem:[%s8859_s26 + $0x58] sm:$0xf]  ;;  %v9220_v9 = vld [vmem:[%s8859_s26 + $0x68] sm:$0xf] }
 0x1a7   : > { %870 = vmatmul.mubr.bf16.gmra.mrb[4].mxu0 %v679_v19  ;;  %v9127_v19 = vld [vmem:[%s8849_s1 + $0xe0] sm:$0xff]  ;;  %11737 = vst [vmem:[#allocation104_spill] sm:$0xff] %v9208_v12  ;;  %11741 = vst [vmem:[#allocation108_spill] sm:$0xff] %v9220_v9  ;;  %v9223_v10 = vld [vmem:[%s8859_s26 + $0x6c] sm:$0xf] }
 0x1a8   : > { %879 = vmatprep.mubr.bf16.mxu0 %v8684_v50  ;;  %11710 = vst [vmem:[#allocation77_spill] sm:$0xff] %v9127_v19  ;;  %v9148_v19 = vld [vmem:[%s8859_s26 + $0x8] sm:$0xf]  ;;  %11742 = vst [vmem:[#allocation109_spill] sm:$0xff] %v9223_v10  ;;  %v9226_v11 = vld [vmem:[%s8859_s26 + $0x70] sm:$0xf] }
 0x1a9   : > { %7735 = vmatmul.mubr.bf16.gmra.mrb[4].mxu1 %v681_v24  ;;  %11717 = vst [vmem:[#allocation84_spill] sm:$0xff] %v9148_v19  ;;  %v9169_v19 = vld [vmem:[%s8859_s26 + $0x24] sm:$0xf]  ;;  %11743 = vst [vmem:[#allocation110_spill] sm:$0xff] %v9226_v11  ;;  %v9229_v12 = vld [vmem:[%s8859_s26 + $0x74] sm:$0xf] }
 0x1aa   : > { %11724 = vst [vmem:[#allocation91_spill] sm:$0xff] %v9169_v19  ;;  %v9190_v19 = vld [vmem:[%s8859_s26 + $0x40] sm:$0xf]  ;;  %11744 = vst [vmem:[#allocation111_spill] sm:$0xff] %v9229_v12  ;;  %v9241_v9 = vld [vmem:[%s8859_s26 + $0x84] sm:$0xf] }
 0x1ab   : > { %11731 = vst [vmem:[#allocation98_spill] sm:$0xff] %v9190_v19  ;;  %v9211_v19 = vld [vmem:[%s8859_s26 + $0x5c] sm:$0xf]  ;;  %11748 = vst [vmem:[#allocation115_spill] sm:$0xff] %v9241_v9  ;;  %v9244_v10 = vld [vmem:[%s8859_s26 + $0x88] sm:$0xf] }
 0x1ac   : > { %11738 = vst [vmem:[#allocation105_spill] sm:$0xff] %v9211_v19  ;;  %v9232_v19 = vld [vmem:[%s8859_s26 + $0x78] sm:$0xf]  ;;  %11749 = vst [vmem:[#allocation116_spill] sm:$0xff] %v9244_v10  ;;  %v9247_v11 = vld [vmem:[%s8859_s26 + $0x8c] sm:$0xf] }
 0x1ad   : > { %11745 = vst [vmem:[#allocation112_spill] sm:$0xff] %v9232_v19  ;;  %11750 = vst [vmem:[#allocation117_spill] sm:$0xff] %v9247_v11  ;;  %v9250_v12 = vld [vmem:[%s8859_s26 + $0x90] sm:$0xf]  ;;  %v9253_v19 = vld [vmem:[%s8859_s26 + $0x94] sm:$0xf] }
 0x1ae   : > { %11751 = vst [vmem:[#allocation118_spill] sm:$0xff] %v9250_v12  ;;  %11752 = vst [vmem:[#allocation119_spill] sm:$0xff] %v9253_v19  ;;  %v9262_v9 = vld [vmem:[%s8859_s26 + $0xa0] sm:$0xf]  ;;  %v9265_v10 = vld [vmem:[%s8859_s26 + $0xa4] sm:$0xf] }
 0x1af   : > { %880 = vmatmul.mubr.bf16.gmra.mrb[8].mxu0 %v680_v22  ;;  %v9130_v22 = vld [vmem:[%s8849_s1 + $0xe8] sm:$0xff]  ;;  %11755 = vst [vmem:[#allocation122_spill] sm:$0xff] %v9262_v9  ;;  %11756 = vst [vmem:[#allocation123_spill] sm:$0xff] %v9265_v10  ;;  %v9274_v19 = vld [vmem:[%s8859_s26 + $0xb0] sm:$0xf] }
 0x1b0   : > { %889 = vmatprep.mubr.bf16.mxu0 %v8684_v50  ;;  %v9055_v50 = vld [vmem:[%s8849_s1 + $0x20] sm:$0xff]  ;;  %11711 = vst [vmem:[#allocation78_spill] sm:$0xff] %v9130_v22  ;;  %v9151_v22 = vld [vmem:[%s8859_s26 + $0xc] sm:$0xf]  ;;  %v9268_v11 = vld [vmem:[%s8859_s26 + $0xa8] sm:$0xf] }
 0x1b1   : > { %11686 = vst [vmem:[#allocation53_spill] sm:$0xff] %v9055_v50  ;;  %11718 = vst [vmem:[#allocation85_spill] sm:$0xff] %v9151_v22  ;;  %v9172_v22 = vld [vmem:[%s8859_s26 + $0x28] sm:$0xf]  ;;  %v9271_v12 = vld [vmem:[%s8859_s26 + $0xac] sm:$0xf] }
 0x1b2   : > { %11725 = vst [vmem:[#allocation92_spill] sm:$0xff] %v9172_v22  ;;  %v9193_v22 = vld [vmem:[%s8859_s26 + $0x44] sm:$0xf]  ;;  %11757 = vst [vmem:[#allocation124_spill] sm:$0xff] %v9268_v11  ;;  %v9283_v9 = vld [vmem:[%s8859_s26 + $0xbc] sm:$0xf] }
 0x1b3   : > { %11732 = vst [vmem:[#allocation99_spill] sm:$0xff] %v9193_v22  ;;  %v9214_v22 = vld [vmem:[%s8859_s26 + $0x60] sm:$0xf]  ;;  %11758 = vst [vmem:[#allocation125_spill] sm:$0xff] %v9271_v12  ;;  %v9289_v6 = vld [vmem:[%s8859_s26 + $0xc4] sm:$0xf] }
 0x1b4   : > { %11739 = vst [vmem:[#allocation106_spill] sm:$0xff] %v9214_v22  ;;  %v9235_v22 = vld [vmem:[%s8859_s26 + $0x7c] sm:$0xf]  ;;  %11759 = vst [vmem:[#allocation126_spill] sm:$0xff] %v9274_v19  ;;  %v9286_v10 = vld [vmem:[%s8859_s26 + $0xc0] sm:$0xf] }
 0x1b5   : > { %11746 = vst [vmem:[#allocation113_spill] sm:$0xff] %v9235_v22  ;;  %v9256_v22 = vld [vmem:[%s8859_s26 + $0x98] sm:$0xf]  ;;  %11762 = vst [vmem:[#allocation129_spill] sm:$0xff] %v9283_v9  ;;  %v9292_v11 = vld [vmem:[%s8859_s26 + $0xc8] sm:$0xf] }
 0x1b6   : > { %11753 = vst [vmem:[#allocation120_spill] sm:$0xff] %v9256_v22  ;;  %v9277_v22 = vld [vmem:[%s8859_s26 + $0xb4] sm:$0xf]  ;;  %11763 = vst [vmem:[#allocation130_spill] sm:$0xff] %v9286_v10  ;;  %v9295_v12 = vld [vmem:[%s8859_s26 + $0xcc] sm:$0xf] }
 0x1b7   : > { %890 = vmatmul.mubr.bf16.gmra.mrb[12].mxu0 %v681_v24  ;;  %v9133_v24 = vld [vmem:[%s8849_s1 + $0xf0] sm:$0xff]  ;;  %11760 = vst [vmem:[#allocation127_spill] sm:$0xff] %v9277_v22  ;;  %11764 = vst [vmem:[#allocation131_spill] sm:$0xff] %v9289_v6  ;;  %v9304_v22 = vld [vmem:[%s8859_s26 + $0xd8] sm:$0xf] }
 0x1b8   : > { %11712 = vst [vmem:[#allocation79_spill] sm:$0xff] %v9133_v24  ;;  %v9154_v24 = vld [vmem:[%s8859_s26 + $0x10] sm:$0xf]  ;;  %11765 = vst [vmem:[#allocation132_spill] sm:$0xff] %v9292_v11  ;;  %v9301_v8 = vld [vmem:[%s8859_s26 + $0xd4] sm:$0xf] }
 0x1b9   : > { %11719 = vst [vmem:[#allocation86_spill] sm:$0xff] %v9154_v24  ;;  %v9175_v24 = vld [vmem:[%s8859_s26 + $0x2c] sm:$0xf]  ;;  %11766 = vst [vmem:[#allocation133_spill] sm:$0xff] %v9295_v12  ;;  %v9298_v19 = vld [vmem:[%s8859_s26 + $0xd0] sm:$0xf] }
 0x1ba   : > { %11726 = vst [vmem:[#allocation93_spill] sm:$0xff] %v9175_v24  ;;  %v9196_v24 = vld [vmem:[%s8859_s26 + $0x48] sm:$0xf]  ;;  %11767 = vst [vmem:[#allocation134_spill] sm:$0xff] %v9298_v19  ;;  %v9310_v5 = vld [vmem:[%s8859_s26 + $0xe0] sm:$0xf] }
 0x1bb   : > { %11733 = vst [vmem:[#allocation100_spill] sm:$0xff] %v9196_v24  ;;  %v9217_v24 = vld [vmem:[%s8859_s26 + $0x64] sm:$0xf]  ;;  %11768 = vst [vmem:[#allocation135_spill] sm:$0xff] %v9301_v8  ;;  %v9316_v10 = vld [vmem:[%s8859_s26 + $0xe8] sm:$0xf]  ;;  %v684_v8 = vlaneseq }
 0x1bc   : > { %11740 = vst [vmem:[#allocation107_spill] sm:$0xff] %v9217_v24  ;;  %v9238_v24 = vld [vmem:[%s8859_s26 + $0x80] sm:$0xf]  ;;  %11769 = vst [vmem:[#allocation136_spill] sm:$0xff] %v9304_v22  ;;  %v9313_v9 = vld [vmem:[%s8859_s26 + $0xe4] sm:$0xf] }
 0x1bd   : > { %11747 = vst [vmem:[#allocation114_spill] sm:$0xff] %v9238_v24  ;;  %v9259_v24 = vld [vmem:[%s8859_s26 + $0x9c] sm:$0xf]  ;;  %11771 = vst [vmem:[#allocation138_spill] sm:$0xff] %v9310_v5  ;;  %v9319_v6 = vld [vmem:[%s8859_s26 + $0xec] sm:$0xf] }
 0x1be   : > { %11754 = vst [vmem:[#allocation121_spill] sm:$0xff] %v9259_v24  ;;  %v9280_v24 = vld [vmem:[%s8859_s26 + $0xb8] sm:$0xf]  ;;  %11772 = vst [vmem:[#allocation139_spill] sm:$0xff] %v9313_v9  ;;  %v9322_v11 = vld [vmem:[%s8859_s26 + $0xf0] sm:$0xf] }
 0x1bf   : > { %11761 = vst [vmem:[#allocation128_spill] sm:$0xff] %v9280_v24  ;;  %v9307_v24 = vld [vmem:[%s8859_s26 + $0xdc] sm:$0xf]  ;;  %11773 = vst [vmem:[#allocation140_spill] sm:$0xff] %v9316_v10  ;;  %v9325_v12 = vld [vmem:[%s8859_s26 + $0xf4] sm:$0xf] }
 0x1c0   : > { %11770 = vst [vmem:[#allocation137_spill] sm:$0xff] %v9307_v24  ;;  %11774 = vst [vmem:[#allocation141_spill] sm:$0xff] %v9319_v6  ;;  %v9328_v7 = vld [vmem:[%s8859_s26 + $0xf8] sm:$0xf]  ;;  %v9331_v19 = vld [vmem:[%s8859_s26 + $0xfc] sm:$0xf] }
 0x1c1   : > { %11775 = vst [vmem:[#allocation142_spill] sm:$0xff] %v9322_v11  ;;  %11776 = vst [vmem:[#allocation143_spill] sm:$0xff] %v9325_v12  ;;  %v9333_v22 = vshrl.u32 %v684_v8, 7  ;;  %v682_v5 = vld [vmem:[%s8844_s19] sm:$0x7] }
 0x1c2   : > { %11777 = vst [vmem:[#allocation144_spill] sm:$0xff] %v9328_v7  ;;  %11778 = vst [vmem:[#allocation145_spill] sm:$0xff] %v9331_v19 }
 0x1c3   : > { %11779 = vst [vmem:[#allocation146_spill] sm:$0xff] %v9333_v22  ;;  %v9336_v24 = vsub.s32 0, %v9333_v22  ;;  %v9340_v9 = vsub.s32 1, %v9333_v22  ;;  %v9345_v12 = vsub.s32 2, %v9333_v22 }
 0x1c5   : > { %11780 = vst [vmem:[#allocation147_spill] sm:$0xff] %v9336_v24  ;;  %11781 = vst [vmem:[#allocation148_spill] sm:$0xff] %v9340_v9  ;;  %v687_v10 = vrot.slane %v682_v5, %v9336_v24  ;;  %v691_v11 = vrot.slane %v682_v5, %v9340_v9  ;;  %v695_v4 = vrot.slane %v682_v5, %v9345_v12 }
 0x1c6   : > { %11782 = vst [vmem:[#allocation149_spill] sm:$0xff] %v9345_v12 }
 0x272   : > { %v861_v7 = vpop.f32.mrb[0].mxu0 }
 0x273   : > { %v9347_v6 = vadd.f32 %v861_v7, %v687_v10  ;;  %v863_v19 = vpop.f32.mrb[1].mxu0 }
 0x274   : > { %v9349_v8 = vadd.f32 %v863_v19, %v691_v11  ;;  %v865_v2 = vpop.f32.mrb[2].mxu0  ;;  %v7732_v61 = vpop.f32.mrb[0].mxu1 }
 0x275   : > { %11783 = vst [vmem:[#allocation150_spill] sm:$0xff] %v9347_v6  ;;  %v9352_v62 = vadd.f32 %v865_v2, %v687_v10  ;;  %v867_v3 = vpop.f32.mrb[3].mxu0  ;;  %v9356_v58 = vadd.f32 %v7732_v61, %v695_v4  ;;  %v934_v9 = vpop.f32.mrb[1].mxu1 }
 0x276   : > { %11784 = vst [vmem:[#allocation151_spill] sm:$0xff] %v9349_v8  ;;  %v9354_v59 = vadd.f32 %v867_v3, %v691_v11  ;;  %v9358_v22 = vadd.f32 %v934_v9, %v695_v4  ;;  %v7733_v60 = vpop.f32.mrb[2].mxu1 }
 0x277   : > { %11785 = vst [vmem:[#allocation152_spill] sm:$0xff] %v9352_v62  ;;  %11787 = vst [vmem:[#allocation154_spill] sm:$0xff] %v9356_v58  ;;  %v9360_v55 = vadd.f32 %v7733_v60, %v695_v4  ;;  %v937_v19 = vpop.f32.mrb[3].mxu1 }
 0x278   : > { %11786 = vst [vmem:[#allocation153_spill] sm:$0xff] %v9354_v59  ;;  %11788 = vst [vmem:[#allocation155_spill] sm:$0xff] %v9358_v22  ;;  %v9364_v5 = vadd.f32 %v937_v19, %v695_v4 }
 0x279   : > { %11789 = vst [vmem:[#allocation156_spill] sm:$0xff] %v9360_v55 }
 0x27a   : > { %v871_v7 = vpop.f32.mrb[4].mxu0  ;;  %11791 = vst [vmem:[#allocation158_spill] sm:$0xff] %v9364_v5 }
 0x27b   : > { %v9362_v57 = vadd.f32 %v871_v7, %v687_v10  ;;  %v873_v54 = vpop.f32.mrb[5].mxu0 }
 0x27c   : > { %v9366_v2 = vadd.f32 %v873_v54, %v691_v11  ;;  %v875_v3 = vpop.f32.mrb[6].mxu0  ;;  %v7736_v9 = vpop.f32.mrb[4].mxu1 }
 0x27d   : > { %11790 = vst [vmem:[#allocation157_spill] sm:$0xff] %v9362_v57  ;;  %v9368_v12 = vadd.f32 %v875_v3, %v687_v10  ;;  %v877_v61 = vpop.f32.mrb[7].mxu0  ;;  %v9372_v51 = vadd.f32 %v7736_v9, %v695_v4  ;;  %v950_v53 = vpop.f32.mrb[5].mxu1 }
 0x27e   : > { %11792 = vst [vmem:[#allocation159_spill] sm:$0xff] %v9366_v2  ;;  %v9370_v56 = vadd.f32 %v877_v61, %v691_v11  ;;  %v9374_v60 = vadd.f32 %v950_v53, %v695_v4  ;;  %v7737_v50 = vpop.f32.mrb[6].mxu1 }
 0x27f   : > { %11793 = vst [vmem:[#allocation160_spill] sm:$0xff] %v9368_v12  ;;  %11795 = vst [vmem:[#allocation162_spill] sm:$0xff] %v9372_v51  ;;  %v9376_v52 = vadd.f32 %v7737_v50, %v695_v4  ;;  %v953_v19 = vpop.f32.mrb[7].mxu1 }
 0x280   : > { %11794 = vst [vmem:[#allocation161_spill] sm:$0xff] %v9370_v56  ;;  %11796 = vst [vmem:[#allocation163_spill] sm:$0xff] %v9374_v60  ;;  %v9380_v49 = vadd.f32 %v953_v19, %v695_v4 }
 0x281   : > { %11797 = vst [vmem:[#allocation164_spill] sm:$0xff] %v9376_v52 }
 0x282   : > { %v881_v7 = vpop.f32.mrb[8].mxu0  ;;  %11799 = vst [vmem:[#allocation166_spill] sm:$0xff] %v9380_v49 }
 0x283   : > { %v9378_v42 = vadd.f32 %v881_v7, %v687_v10  ;;  %v883_v54 = vpop.f32.mrb[9].mxu0 }
 0x284   : > { %v9382_v3 = vadd.f32 %v883_v54, %v691_v11  ;;  %v885_v61 = vpop.f32.mrb[10].mxu0 }
 0x285   : > { %11798 = vst [vmem:[#allocation165_spill] sm:$0xff] %v9378_v42  ;;  %v9384_v41 = vadd.f32 %v885_v61, %v687_v10  ;;  %v887_v9 = vpop.f32.mrb[11].mxu0 }
 0x286   : > { %11800 = vst [vmem:[#allocation167_spill] sm:$0xff] %v9382_v3  ;;  %v9386_v48 = vadd.f32 %v887_v9, %v691_v11 }
 0x287   : > { %11801 = vst [vmem:[#allocation168_spill] sm:$0xff] %v9384_v41 }
 0x288   : > { %11802 = vst [vmem:[#allocation169_spill] sm:$0xff] %v9386_v48 }
 0x28a   : > { %v891_v53 = vpop.f32.mrb[12].mxu0  ;;  %1093 = sbr.rel (%p7116_p1) target bundleno = 3574 (0xdf6), region = 64 }
 0x28b   : > { %v9388_v13 = vadd.f32 %v891_v53, %v687_v10  ;;  %v893_v23 = vpop.f32.mrb[13].mxu0 }
 0x28c   : > { %v9390_v50 = vadd.f32 %v893_v23, %v691_v11  ;;  %v895_v18 = vpop.f32.mrb[14].mxu0 }
 0x28d   : > { %11803 = vst [vmem:[#allocation170_spill] sm:$0xff] %v9388_v13  ;;  %v9392_v7 = vadd.f32 %v895_v18, %v687_v10  ;;  %v897_v17 = vpop.f32.mrb[15].mxu0 }
 0x28e   : > { %11804 = vst [vmem:[#allocation171_spill] sm:$0xff] %v9390_v50  ;;  %v9394_v4 = vadd.f32 %v897_v17, %v691_v11 }
 0x28f   : > { %11805 = vst [vmem:[#allocation172_spill] sm:$0xff] %v9392_v7 }
 0x290   : > { %11806 = vst [vmem:[#allocation173_spill] sm:$0xff] %v9394_v4 }
 0x291   : > { %v9399_v19 = vpack.c.bf16 %v9349_v8, %v9349_v8  ;;  %vm1202_vm0 = vcmask 523264   ;;  %v9403_v54 = vpack.c.bf16 %v9354_v59, %v9354_v59  ;;  %v11555_v23 = vmov 0.0   ;;  %s8687_s1 = smov 64  }
 0x292   : > { %7738 = vmatprep.subr.bf16.mxu0 %v11555_v23  ;;  %7744 = vmatprep.subr.bf16.mxu1 %v11555_v23  ;;  %vm8686_vm1 = vmmov 0   ;;  %v9419_v10 = vpack.c.bf16 %v9366_v2, %v9366_v2  ;;  %v9423_v11 = vpack.c.bf16 %v9370_v56, %v9370_v56  ;;  %v9427_v61 = vpack.c.bf16 %v9347_v6, %v9347_v6 }
 0x293   : > { %v1207_v17 = vsel %vm1202_vm0, %v9399_v19, 0  ;;  %v1253_v18 = vsel %vm1202_vm0, %v9403_v54, 0  ;;  %7740 = vmatprep.mubr.msk.bf16.mxu0 %vm8686_vm1, %v11555_v23  ;;  %7746 = vmatprep.mubr.msk.bf16.mxu1 %vm8686_vm1, %v11555_v23  ;;  %v9431_v9 = vpack.c.bf16 %v9352_v62, %v9352_v62  ;;  %v9451_v56 = vpack.c.bf16 %v9386_v48, %v9386_v48 }
 0x294   : > { %7739 = vmatpush3.bf16.xpose.msra.mxu0 %v1207_v17  ;;  %7745 = vmatpush3.bf16.xpose.msra.mxu1 %v1253_v18  ;;  %v1299_v53 = vsel %vm1202_vm0, %v9419_v10, 0  ;;  %v1345_v17 = vsel %vm1202_vm0, %v9423_v11, 0  ;;  %v9447_v18 = vpack.c.bf16 %v9382_v3, %v9382_v3  ;;  %v9481_v48 = vpack.c.bf16 %v9394_v4, %v9394_v4 }
 0x295   : > { %7750 = vmatprep.subr.bf16.mxu0 %v11555_v23  ;;  %7756 = vmatprep.subr.bf16.mxu1 %v11555_v23  ;;  %v1437_v2 = vsel %vm1202_vm0, %v9451_v56, 0  ;;  %v9513_v4 = vpack.c.bf16 %v9392_v7, %v9392_v7  ;;  %vm1571_vm2 = vcmask 64512   ;;  %v9540_v1 = vrot.slane %v8928_v43, %v9336_v24 }
 0x296   : > { %v1391_v62 = vsel %vm1202_vm0, %v9447_v18, 0  ;;  %v9548_v43 = vrot.slane %v8934_v45, %v9336_v24  ;;  %vm1671_vm3 = vcmask 1043456  }
 0x29b   : > { %7741 = vmatmul.mubr.msk.bf16.vlgmr.msra.gmra.mrb[0].mxu0 %vm1202_vm0, %v9427_v61  ;;  %7747 = vmatmul.mubr.msk.bf16.vlgmr.msra.gmra.mrb[0].mxu1 %vm1202_vm0, %v9431_v9 }
 0x29c   : > { %7751 = vmatpush3.bf16.xpose.msra.mxu0 %v1299_v53  ;;  %7757 = vmatpush3.bf16.xpose.msra.mxu1 %v1345_v17  ;;  %v9457_v53 = vpack.c.bf16 %v9362_v57, %v9362_v57  ;;  %v9461_v17 = vpack.c.bf16 %v9368_v12, %v9368_v12  ;;  %v9477_v12 = vpack.c.bf16 %v9390_v50, %v9390_v50  ;;  %v1529_v50 = vsel %vm1202_vm0, %v9481_v48, 0 }
 0x29d   : > { %7752 = vmatprep.mubr.msk.bf16.mxu0 %vm8686_vm1, %v11555_v23  ;;  %7758 = vmatprep.mubr.msk.bf16.mxu1 %vm8686_vm1, %v11555_v23 }
 0x29e   : > { %7762 = vmatprep.subr.bf16.mxu0 %v11555_v23  ;;  %7768 = vmatprep.subr.bf16.mxu1 %v11555_v23  ;;  %v1483_v57 = vsel %vm1202_vm0, %v9477_v12, 0 }
 0x2a3   : > { %7753 = vmatmul.mubr.msk.bf16.vlgmr.msra.gmra.mrb[4].mxu0 %vm1202_vm0, %v9457_v53  ;;  %7759 = vmatmul.mubr.msk.bf16.vlgmr.msra.gmra.mrb[4].mxu1 %vm1202_vm0, %v9461_v17 }
 0x2a4   : > { %7763 = vmatpush3.bf16.xpose.msra.mxu0 %v1391_v62  ;;  %7769 = vmatpush3.bf16.xpose.msra.mxu1 %v1437_v2  ;;  %v9487_v62 = vpack.c.bf16 %v9378_v42, %v9378_v42  ;;  %v9491_v2 = vpack.c.bf16 %v9384_v41, %v9384_v41  ;;  %v9509_v41 = vpack.c.bf16 %v9388_v13, %v9388_v13 }
 0x2a5   : > { %7764 = vmatprep.mubr.msk.bf16.mxu0 %vm8686_vm1, %v11555_v23  ;;  %7770 = vmatprep.mubr.msk.bf16.mxu1 %vm8686_vm1, %v11555_v23 }
 0x2a6   : > { %7774 = vmatprep.subr.bf16.mxu0 %v11555_v23  ;;  %7780 = vmatprep.subr.bf16.mxu1 %v11555_v23 }
 0x2ab   : > { %7765 = vmatmul.mubr.msk.bf16.vlgmr.msra.gmra.mrb[8].mxu0 %vm1202_vm0, %v9487_v62  ;;  %7771 = vmatmul.mubr.msk.bf16.vlgmr.msra.gmra.mrb[8].mxu1 %vm1202_vm0, %v9491_v2 }
 0x2ac   : > { %7775 = vmatpush3.bf16.xpose.msra.mxu0 %v1483_v57  ;;  %7781 = vmatpush3.bf16.xpose.msra.mxu1 %v1529_v50  ;;  %v9525_v57 = vrot.slane %v8919_v29, %v9336_v24  ;;  %v9529_v50 = vrot.slane %v8922_v36, %v9336_v24  ;;  %v9536_v36 = vrot.slane %v8925_v37, %v9336_v24 }
 0x2ad   : > { %7776 = vmatprep.mubr.msk.bf16.mxu0 %vm8686_vm1, %v11555_v23  ;;  %7782 = vmatprep.mubr.msk.bf16.mxu1 %vm8686_vm1, %v11555_v23 }
 0x2ae   : > { %7786 = vmatprep.subr.bf16.mxu0 %v11555_v23  ;;  %7792 = vmatprep.subr.bf16.mxu1 %v11555_v23 }
 0x2b3   : > { %7777 = vmatmul.mubr.msk.bf16.vlgmr.msra.gmra.mrb[12].mxu0 %vm1202_vm0, %v9509_v41  ;;  %7783 = vmatmul.mubr.msk.bf16.vlgmr.msra.gmra.mrb[12].mxu1 %vm1202_vm0, %v9513_v4 }
 0x2b4   : > { %7788 = vmatprep.mubr.msk.bf16.mxu0 %vm8686_vm1, %v11555_v23  ;;  %7794 = vmatprep.mubr.msk.bf16.mxu1 %vm8686_vm1, %v11555_v23 }
 0x36e   : > { %v1243_v7 = vpop.f32.mrb[0].mxu0  ;;  %v1289_v13 = vpop.f32.mrb[0].mxu1 }
 0x36f   : > { %v1244_v42 = vadd.f32 %v1243_v7, %v9525_v57  ;;  %v7742_v6 = vpop.f32.mrb[1].mxu0  ;;  %v7748_v59 = vpop.f32.mrb[1].mxu1  ;;  %v1290_v16 = vadd.f32 %v1289_v13, %v9529_v50 }
 0x370   : > { %v1246_v3 = vpop.f32.mrb[2].mxu0  ;;  %v1292_v8 = vpop.f32.mrb[2].mxu1 }
 0x371   : > { %v7743_v23 = vpop.f32.mrb[3].mxu0  ;;  %v7749_v15 = vpop.f32.mrb[3].mxu1  ;;  %v1572_v29 = vsel %vm1571_vm2, %v1244_v42, -inf  ;;  %v1575_v6 = vsel %vm1571_vm2, %v1290_v16, -inf }
 0x372   : > { %1573 = vmax.xlane.f32.xlu0 %v1572_v29 }
 0x376   : > { %v1381_v59 = vpop.f32.mrb[4].mxu1  ;;  %1576 = vmax.xlane.f32.xlu0 %v1575_v6  ;;  %v1335_v8 = vpop.f32.mrb[4].mxu0  ;;  %v9552_v6 = vrot.slane %v8931_v44, %v9336_v24 }
 0x377   : > { %v1336_v13 = vadd.f32 %v1335_v8, %v9536_v36  ;;  %v7754_v3 = vpop.f32.mrb[5].mxu0  ;;  %v7760_v15 = vpop.f32.mrb[5].mxu1  ;;  %v1382_v29 = vadd.f32 %v1381_v59, %v9540_v1 }
 0x378   : > { %v1338_v7 = vpop.f32.mrb[6].mxu0  ;;  %v1384_v23 = vpop.f32.mrb[6].mxu1 }
 0x379   : > { %v7755_v63 = vpop.f32.mrb[7].mxu0  ;;  %v7761_v37 = vpop.f32.mrb[7].mxu1  ;;  %v1578_v0 = vsel %vm1571_vm2, %v1336_v13, -inf  ;;  %v1581_v8 = vsel %vm1571_vm2, %v1382_v29, -inf }
 0x37a   : > { %1579 = vmax.xlane.f32.xlu1 %v1578_v0 }
 0x37e   : > { %v1473_v3 = vpop.f32.mrb[8].mxu1  ;;  %1582 = vmax.xlane.f32.xlu1 %v1581_v8  ;;  %v1427_v15 = vpop.f32.mrb[8].mxu0  ;;  %v9561_v8 = vrot.slane %v8937_v46, %v9336_v24 }
 0x37f   : > { %v1474_v59 = vadd.f32 %v1473_v3, %v9548_v43  ;;  %v1428_v37 = vadd.f32 %v1427_v15, %v9552_v6  ;;  %v7772_v63 = vpop.f32.mrb[9].mxu1  ;;  %v7766_v7 = vpop.f32.mrb[9].mxu0  ;;  %v9565_v3 = vrot.slane %v8940_v47, %v9336_v24 }
 0x380   : > { %v1476_v0 = vpop.f32.mrb[10].mxu1  ;;  %v1430_v23 = vpop.f32.mrb[10].mxu0 }
 0x381   : > { %v7773_v28 = vpop.f32.mrb[11].mxu1  ;;  %v1587_v45 = vsel %vm1571_vm2, %v1474_v59, -inf  ;;  %v1584_v40 = vsel %vm1571_vm2, %v1428_v37, -inf  ;;  %v7767_v44 = vpop.f32.mrb[11].mxu0 }
 0x382   : > { %1588 = vmax.xlane.f32.xlu1 %v1587_v45  ;;  %1585 = vmax.xlane.f32.xlu0 %v1584_v40 }
 0x386   : > { %v1519_v15 = vpop.f32.mrb[12].mxu0  ;;  %v1565_v63 = vpop.f32.mrb[12].mxu1 }
 0x387   : > { %v1520_v7 = vadd.f32 %v1519_v15, %v9561_v8  ;;  %v9569_v28 = vadd.f32 %v1565_v63, %v9565_v3  ;;  %v7784_v0 = vpop.f32.mrb[13].mxu1  ;;  %v7778_v23 = vpop.f32.mrb[13].mxu0 }
 0x388   : > { %v1568_v44 = vpop.f32.mrb[14].mxu1  ;;  %v1522_v45 = vpop.f32.mrb[14].mxu0 }
 0x389   : > { %v1593_v40 = vsel %vm1571_vm2, %v9569_v28, -inf  ;;  %v1590_v46 = vsel %vm1571_vm2, %v1520_v7, -inf  ;;  %v7785_v21 = vpop.f32.mrb[15].mxu1  ;;  %v7779_v39 = vpop.f32.mrb[15].mxu0 }
 0x38a   : > { %1594 = vmax.xlane.f32.xlu1 %v1593_v40  ;;  %1591 = vmax.xlane.f32.xlu0 %v1590_v46 }
 0x3ff   : > { %v1574_v47 = vpop.xlane.xlu0 %1573 }
 0x400   : > { %v1596_v24 = vsub.f32 %v1244_v42, %v1574_v47 }
 0x402   : > { %v1604_v35 = vmul.f32 1.442695, %v1596_v24 }
 0x403   : > { %v1577_v15 = vpop.xlane.xlu0 %1576 }
 0x404   : > { %8332 = vpow2.f32 %v1604_v35  ;;  %v1597_v63 = vsub.f32 %v1290_v16, %v1577_v15 }
 0x406   : > { %v1606_v38 = vmul.f32 1.442695, %v1597_v63 }
 0x407   : > { %v1580_v0 = vpop.xlane.xlu1 %1579 }
 0x408   : > { %8334 = vpow2.f32 %v1606_v38  ;;  %v1598_v23 = vsub.f32 %v1336_v13, %v1580_v0 }
 0x40a   : > { %v1608_v44 = vmul.f32 1.442695, %v1598_v23 }
 0x40b   : > { %v1583_v45 = vpop.xlane.xlu1 %1582 }
 0x40c   : > { %8336 = vpow2.f32 %v1608_v44  ;;  %v1599_v33 = vsub.f32 %v1382_v29, %v1583_v45 }
 0x40e   : > { %v9574_v34 = vpop.eup %8332  ;;  %v1610_v21 = vmul.f32 1.442695, %v1599_v33 }
 0x40f   : > { %v1589_v39 = vpop.xlane.xlu1 %1588  ;;  %v1586_v40 = vpop.xlane.xlu0 %1585  ;;  %v1620_v46 = vsel %vm1571_vm2, %v9574_v34, 0.0 }
 0x410   : > { %8338 = vpow2.f32 %v1610_v21  ;;  %v1601_v47 = vsub.f32 %v1474_v59, %v1589_v39  ;;  %v1600_v35 = vsub.f32 %v1428_v37, %v1586_v40  ;;  %1621 = vadd.xlane.f32.xlu0 %v1620_v46  ;;  %v9604_v39 = vpack.c.bf16 %v9358_v22, %v9358_v22 }
 0x411   : > { %v9610_v46 = vpack.c.bf16 %v9364_v5, %v9364_v5 }
 0x412   : > { %v9578_v16 = vpop.eup %8334  ;;  %v1614_v38 = vmul.f32 1.442695, %v1601_v47  ;;  %v1612_v42 = vmul.f32 1.442695, %v1600_v35  ;;  %v1673_v40 = vsel %vm1671_vm3, %v9604_v39, 0  ;;  %v11807_v47 = vmov 0.0  }
 0x413   : > { %v1623_v24 = vsel %vm1571_vm2, %v9578_v16, 0.0  ;;  %7787 = vmatpush3.bf16.msra.mxu0 %v1673_v40  ;;  %v1719_v35 = vsel %vm1671_vm3, %v9610_v46, 0 }
 0x414   : > { %8340 = vpow2.f32 %v1614_v38  ;;  %1624 = vadd.xlane.f32.xlu1 %v1623_v24  ;;  %7798 = vmatprep.subr.bf16.mxu0 %v11807_v47 }
 0x415   : > { %8342 = vpow2.f32 %v1612_v42  ;;  %7793 = vmatpush3.bf16.msra.mxu1 %v1719_v35 }
 0x416   : > { %v9582_v33 = vpop.eup %8336  ;;  %7804 = vmatprep.subr.bf16.mxu1 %v11807_v47 }
 0x417   : > { %v1592_v13 = vpop.xlane.xlu0 %1591  ;;  %v1626_v29 = vsel %vm1571_vm2, %v9582_v33, 0.0  ;;  %v1595_v38 = vpop.xlane.xlu1 %1594 }
 0x418   : > { %v1602_v15 = vsub.f32 %v1520_v7, %v1592_v13  ;;  %1627 = vadd.xlane.f32.xlu0 %v1626_v29  ;;  %v1603_v42 = vsub.f32 %v9569_v28, %v1595_v38  ;;  %v9673_v13 = vpack.c.bf16 %v9374_v60, %v9374_v60  ;;  %v9695_v38 = vpack.c.bf16 %v9372_v51, %v9372_v51 }
 0x41a   : > { %v9586_v59 = vpop.eup %8338  ;;  %v1616_v37 = vmul.f32 1.442695, %v1602_v15  ;;  %v1618_v24 = vmul.f32 1.442695, %v1603_v42 }
 0x41b   : > { %v1629_v63 = vsel %vm1571_vm2, %v9586_v59, 0.0 }
 0x41c   : > { %1630 = vadd.xlane.f32.xlu1 %v1629_v63  ;;  %8344 = vpow2.f32 %v1616_v37  ;;  %v1857_v37 = vsel %vm1671_vm3, %v9673_v13, 0  ;;  %v9684_v63 = vpack.c.bf16 %v9380_v49, %v9380_v49 }
 0x41d   : > { %8346 = vpow2.f32 %v1618_v24 }
 0x41e   : > { %v9590_v0 = vpop.eup %8340  ;;  %v1903_v40 = vsel %vm1671_vm3, %v9684_v63, 0 }
 0x41f   : > { %v9592_v23 = vpop.eup %8342  ;;  %v1635_v44 = vsel %vm1571_vm2, %v9590_v0, 0.0 }
 0x420   : > { %1636 = vadd.xlane.f32.xlu1 %v1635_v44  ;;  %v1632_v7 = vsel %vm1571_vm2, %v9592_v23, 0.0 }
 0x421   : > { %1633 = vadd.xlane.f32.xlu0 %v1632_v7 }
 0x426   : > { %v9598_v45 = vpop.eup %8344 }
 0x427   : > { %v1638_v21 = vsel %vm1571_vm2, %v9598_v45, 0.0 }
 0x428   : > { %1639 = vadd.xlane.f32.xlu0 %v1638_v21 }
 0x431   : > { %2089 = vrot.lane.b32.xlu1 %v9403_v54, %s8687_s1 }
 0x435   : > { %2037 = vrot.lane.b32.xlu1 %v9427_v61, %s8687_s1 }
 0x43e   : > { %2039 = vrot.lane.b32.xlu0 %v9399_v19, %s8687_s1  ;;  %v9633_v19 = vpop.eup %8346 }
 0x43f   : > { %v1641_v54 = vsel %vm1571_vm2, %v9633_v19, 0.0 }
 0x442   : > { %2139 = vrot.lane.b32.xlu0 %v9419_v10, %s8687_s1 }
 0x446   : > { %2137 = vrot.lane.b32.xlu0 %v9457_v53, %s8687_s1 }
 0x44a   : > { %2239 = vrot.lane.b32.xlu0 %v9447_v18, %s8687_s1 }
 0x44e   : > { %2237 = vrot.lane.b32.xlu0 %v9487_v62, %s8687_s1 }
 0x452   : > { %2339 = vrot.lane.b32.xlu0 %v9477_v12, %s8687_s1 }
 0x456   : > { %2337 = vrot.lane.b32.xlu0 %v9509_v41, %s8687_s1 }
 0x459   : > { %1642 = vadd.xlane.f32.xlu1 %v1641_v54  ;;  %v9705_v54 = vpack.c.bf16 %v9376_v52, %v9376_v52 }
 0x46a   : > { %2087 = vrot.lane.b32.xlu1 %v9431_v9, %s8687_s1 }
 0x46e   : > { %2189 = vrot.lane.b32.xlu1 %v9423_v11, %s8687_s1  ;;  %v9655_v11 = vpack.c.bf16 %v9356_v58, %v9356_v58 }
 0x472   : > { %2187 = vrot.lane.b32.xlu1 %v9461_v17, %s8687_s1 }
 0x476   : > { %2289 = vrot.lane.b32.xlu1 %v9451_v56, %s8687_s1 }
 0x47a   : > { %2287 = vrot.lane.b32.xlu1 %v9491_v2, %s8687_s1 }
 0x47e   : > { %2389 = vrot.lane.b32.xlu1 %v9481_v48, %s8687_s1  ;;  %v1765_v48 = vsel %vm1671_vm3, %v9655_v11, 0 }
 0x482   : > { %2387 = vrot.lane.b32.xlu1 %v9513_v4, %s8687_s1  ;;  %v9662_v4 = vpack.c.bf16 %v9360_v55, %v9360_v55 }
 0x484   : > { %v1811_v28 = vsel %vm1671_vm3, %v9662_v4, 0 }
 0x49d   : > { %v1622_v41 = vpop.xlane.xlu0 %1621 }
 0x49e   : > { %8348 = vrcp.f32 %v1622_v41 }
 0x4a1   : > { %v1625_v12 = vpop.xlane.xlu1 %1624 }
 0x4a2   : > { %8350 = vrcp.f32 %v1625_v12  ;;  %v1949_v12 = vsel %vm1671_vm3, %v9695_v38, 0 }
 0x4a5   : > { %v1628_v10 = vpop.xlane.xlu0 %1627 }
 0x4a6   : > { %8352 = vrcp.f32 %v1628_v10 }
 0x4a8   : > { %v8349_v56 = vpop.eup %8348 }
 0x4a9   : > { %v1652_v61 = vmul.f32 %v8349_v56, %v9574_v34  ;;  %v1631_v9 = vpop.xlane.xlu1 %1630 }
 0x4aa   : > { %8354 = vrcp.f32 %v1631_v9 }
 0x4ab   : > { %v1660_v18 = vpack.c.bf16 %v1652_v61, %v1652_v61 }
 0x4ac   : > { %v8351_v53 = vpop.eup %8350 }
 0x4ad   : > { %v1653_v17 = vmul.f32 %v8351_v53, %v9578_v16  ;;  %v1637_v62 = vpop.xlane.xlu1 %1636  ;;  %7789 = vmatmul.mubr.msk.bf16.vlgmr.msra.gmra.mrb[16].mxu0 %vm1571_vm2, %v1660_v18 }
 0x4ae   : > { %8356 = vrcp.f32 %v1637_v62  ;;  %v1634_v2 = vpop.xlane.xlu0 %1633  ;;  %7799 = vmatpush3.bf16.msra.mxu0 %v1765_v48  ;;  %7800 = vmatprep.mubr.msk.bf16.mxu0 %vm8686_vm1, %v11807_v47 }
 0x4af   : > { %8358 = vrcp.f32 %v1634_v2  ;;  %v1661_v34 = vpack.c.bf16 %v1653_v17, %v1653_v17  ;;  %7810 = vmatprep.subr.bf16.mxu0 %v11807_v47 }
 0x4b0   : > { %v8353_v16 = vpop.eup %8352 }
 0x4b1   : > { %v1654_v29 = vmul.f32 %v8353_v16, %v9582_v33  ;;  %7795 = vmatmul.mubr.msk.bf16.vlgmr.msra.gmra.mrb[16].mxu1 %vm1571_vm2, %v1661_v34  ;;  %v2090_v53 = vpop.permute.xlu1 %2089 }
 0x4b2   : > { %7805 = vmatpush3.bf16.msra.mxu1 %v1811_v28  ;;  %7806 = vmatprep.mubr.msk.bf16.mxu1 %vm8686_vm1, %v11807_v47 }
 0x4b3   : > { %v1662_v15 = vpack.c.bf16 %v1654_v29, %v1654_v29  ;;  %7816 = vmatprep.subr.bf16.mxu1 %v11807_v47 }
 0x4b4   : > { %v8355_v44 = vpop.eup %8354 }
 0x4b5   : > { %v1655_v7 = vmul.f32 %v8355_v44, %v9586_v59  ;;  %7801 = vmatmul.mubr.msk.bf16.vlgmr.msra.gmra.mrb[20].mxu0 %vm1571_vm2, %v1662_v15  ;;  %v1640_v33 = vpop.xlane.xlu0 %1639  ;;  %v2038_v62 = vpop.permute.xlu1 %2037 }
 0x4b6   : > { %7811 = vmatpush3.bf16.msra.mxu0 %v1857_v37  ;;  %7812 = vmatprep.mubr.msk.bf16.mxu0 %vm8686_vm1, %v11807_v47  ;;  %8360 = vrcp.f32 %v1640_v33 }
 0x4b7   : > { %v1663_v21 = vpack.c.bf16 %v1655_v7, %v1655_v7  ;;  %7822 = vmatprep.subr.bf16.mxu0 %v11807_v47 }
 0x4b8   : > { %v8357_v35 = vpop.eup %8356 }
 0x4b9   : > { %v8359_v59 = vpop.eup %8358  ;;  %7807 = vmatmul.mubr.msk.bf16.vlgmr.msra.gmra.mrb[20].mxu1 %vm1571_vm2, %v1663_v21  ;;  %v1657_v24 = vmul.f32 %v8357_v35, %v9590_v0  ;;  %v1995_v0 = vsel %vm1671_vm3, %v9705_v54, 0  ;;  %v2040_v61 = vpop.permute.xlu0 %2039  ;;  %v2095_v35 = vsel %vm1202_vm0, %v2090_v53, 0 }
 0x4ba   : > { %v1656_v42 = vmul.f32 %v8359_v59, %v9592_v23  ;;  %7817 = vmatpush3.bf16.msra.mxu1 %v1903_v40  ;;  %7818 = vmatprep.mubr.msk.bf16.mxu1 %vm8686_vm1, %v11807_v47  ;;  %v2045_v18 = vsel %vm1202_vm0, %v2040_v61, 0 }
 0x4bb   : > { %7828 = vmatprep.subr.bf16.mxu1 %v11807_v47  ;;  %v1665_v23 = vpack.c.bf16 %v1657_v24, %v1657_v24 }
 0x4bc   : > { %v1664_v41 = vpack.c.bf16 %v1656_v42, %v1656_v42 }
 0x4bd   : > { %v2140_v48 = vpop.permute.xlu0 %2139 }
 0x4be   : > { %7813 = vmatmul.mubr.msk.bf16.vlgmr.msra.gmra.mrb[24].mxu0 %vm1571_vm2, %v1664_v41  ;;  %v2145_v17 = vsel %vm1202_vm0, %v2140_v48, 0 }
 0x4bf   : > { %7823 = vmatpush3.bf16.msra.mxu0 %v1949_v12  ;;  %7824 = vmatprep.mubr.msk.bf16.mxu0 %vm8686_vm1, %v11807_v47 }
 0x4c0   : > { %7834 = vmatprep.subr.bf16.mxu0 %v11807_v47  ;;  %v8361_v10 = vpop.eup %8360 }
 0x4c1   : > { %7819 = vmatmul.mubr.msk.bf16.vlgmr.msra.gmra.mrb[24].mxu1 %vm1571_vm2, %v1665_v23  ;;  %v1658_v56 = vmul.f32 %v8361_v10, %v9598_v45  ;;  %v2138_v45 = vpop.permute.xlu0 %2137 }
 0x4c2   : > { %7829 = vmatpush3.bf16.msra.mxu1 %v1995_v0  ;;  %7830 = vmatprep.mubr.msk.bf16.mxu1 %vm8686_vm1, %v11807_v47 }
 0x4c3   : > { %7840 = vmatprep.subr.bf16.mxu1 %v11807_v47  ;;  %v1666_v9 = vpack.c.bf16 %v1658_v56, %v1658_v56 }
 0x4c5   : > { %v2240_v2 = vpop.permute.xlu0 %2239 }
 0x4c6   : > { %7825 = vmatmul.mubr.msk.bf16.vlgmr.msra.gmra.mrb[28].mxu0 %vm1571_vm2, %v1666_v9  ;;  %v2245_v28 = vsel %vm1202_vm0, %v2240_v2, 0 }
 0x4c7   : > { %7836 = vmatprep.mubr.msk.bf16.mxu0 %vm8686_vm1, %v11807_v47 }
 0x4c8   : > { %7835 = vmatpush3.bf16.xpose.msra.mxu0 %v2045_v18 }
 0x4c9   : > { %7846 = vmatprep.subr.bf16.mxu0 %v11807_v47  ;;  %v2238_v34 = vpop.permute.xlu0 %2237 }
 0x4cd   : > { %v2340_v16 = vpop.permute.xlu0 %2339 }
 0x4ce   : > { %v2345_v29 = vsel %vm1202_vm0, %v2340_v16, 0 }
 0x4cf   : > { %7837 = vmatmul.mubr.msk.bf16.vlgmr.msra.gmra.mrb[32].mxu0 %vm1202_vm0, %v2038_v62 }
 0x4d0   : > { %7847 = vmatpush3.bf16.xpose.msra.mxu0 %v2145_v17  ;;  %7848 = vmatprep.mubr.msk.bf16.mxu0 %vm8686_vm1, %v11807_v47 }
 0x4d1   : > { %7858 = vmatprep.subr.bf16.mxu0 %v11807_v47  ;;  %v2338_v15 = vpop.permute.xlu0 %2337 }
 0x4d7   : > { %7849 = vmatmul.mubr.msk.bf16.vlgmr.msra.gmra.mrb[36].mxu0 %vm1202_vm0, %v2138_v45 }
 0x4d8   : > { %7859 = vmatpush3.bf16.xpose.msra.mxu0 %v2245_v28  ;;  %7860 = vmatprep.mubr.msk.bf16.mxu0 %vm8686_vm1, %v11807_v47 }
 0x4d9   : > { %7870 = vmatprep.subr.bf16.mxu0 %v11807_v47 }
 0x4df   : > { %7861 = vmatmul.mubr.msk.bf16.vlgmr.msra.gmra.mrb[40].mxu0 %vm1202_vm0, %v2238_v34 }
 0x4e0   : > { %7871 = vmatpush3.bf16.xpose.msra.mxu0 %v2345_v29  ;;  %7872 = vmatprep.mubr.msk.bf16.mxu0 %vm8686_vm1, %v11807_v47 }
 0x4e1   : > { %7882 = vmatprep.subr.bf16.mxu0 %v11807_v47 }
 0x4e6   : > { %v1643_v37 = vpop.xlane.xlu1 %1642 }
 0x4e7   : > { %8362 = vrcp.f32 %v1643_v37  ;;  %7873 = vmatmul.mubr.msk.bf16.vlgmr.msra.gmra.mrb[44].mxu0 %vm1202_vm0, %v2338_v15 }
 0x4e8   : > { %7884 = vmatprep.mubr.msk.bf16.mxu0 %vm8686_vm1, %v11807_v47 }
 0x4ea   : > { %v2088_v44 = vpop.permute.xlu1 %2087 }
 0x4ee   : > { %v2190_v40 = vpop.permute.xlu1 %2189 }
 0x4ef   : > { %v2195_v42 = vsel %vm1202_vm0, %v2190_v40, 0 }
 0x4f1   : > { %v8363_v7 = vpop.eup %8362 }
 0x4f2   : > { %v1659_v33 = vmul.f32 %v8363_v7, %v9633_v19  ;;  %v2188_v59 = vpop.permute.xlu1 %2187 }
 0x4f4   : > { %v1667_v21 = vpack.c.bf16 %v1659_v33, %v1659_v33 }
 0x4f6   : > { %7831 = vmatmul.mubr.msk.bf16.vlgmr.msra.gmra.mrb[28].mxu1 %vm1571_vm2, %v1667_v21  ;;  %v2290_v19 = vpop.permute.xlu1 %2289 }
 0x4f7   : > { %7841 = vmatpush3.bf16.xpose.msra.mxu1 %v2095_v35  ;;  %7842 = vmatprep.mubr.msk.bf16.mxu1 %vm8686_vm1, %v11807_v47  ;;  %v2295_v24 = vsel %vm1202_vm0, %v2290_v19, 0 }
 0x4f8   : > { %7852 = vmatprep.subr.bf16.mxu1 %v11807_v47 }
 0x4fa   : > { %v2288_v41 = vpop.permute.xlu1 %2287 }
 0x4fe   : > { %7843 = vmatmul.mubr.msk.bf16.vlgmr.msra.gmra.mrb[32].mxu1 %vm1202_vm0, %v2088_v44  ;;  %v2390_v12 = vpop.permute.xlu1 %2389 }
 0x4ff   : > { %7853 = vmatpush3.bf16.xpose.msra.mxu1 %v2195_v42  ;;  %7854 = vmatprep.mubr.msk.bf16.mxu1 %vm8686_vm1, %v11807_v47  ;;  %v2395_v23 = vsel %vm1202_vm0, %v2390_v12, 0 }
 0x500   : > { %7864 = vmatprep.subr.bf16.mxu1 %v11807_v47 }
 0x502   : > { %v2388_v0 = vpop.permute.xlu1 %2387 }
 0x506   : > { %7855 = vmatmul.mubr.msk.bf16.vlgmr.msra.gmra.mrb[36].mxu1 %vm1202_vm0, %v2188_v59 }
 0x507   : > { %7865 = vmatpush3.bf16.xpose.msra.mxu1 %v2295_v24  ;;  %7866 = vmatprep.mubr.msk.bf16.mxu1 %vm8686_vm1, %v11807_v47 }
 0x508   : > { %7876 = vmatprep.subr.bf16.mxu1 %v11807_v47 }
 0x50e   : > { %7867 = vmatmul.mubr.msk.bf16.vlgmr.msra.gmra.mrb[40].mxu1 %vm1202_vm0, %v2288_v41 }
 0x50f   : > { %7877 = vmatpush3.bf16.xpose.msra.mxu1 %v2395_v23  ;;  %7878 = vmatprep.mubr.msk.bf16.mxu1 %vm8686_vm1, %v11807_v47 }
 0x510   : > { %7888 = vmatprep.subr.bf16.mxu1 %v11807_v47 }
 0x516   : > { %7879 = vmatmul.mubr.msk.bf16.vlgmr.msra.gmra.mrb[44].mxu1 %vm1202_vm0, %v2388_v0 }
 0x517   : > { %7890 = vmatprep.mubr.msk.bf16.mxu1 %vm8686_vm1, %v11807_v47 }
 0x580   : > { %v9767_v10 = vpop.f32.mrb[16].mxu0 }
 0x581   : > { %v7790_v56 = vpop.f32.mrb[17].mxu0 }
 0x582   : > { %v1712_v61 = vpop.f32.mrb[18].mxu0 }
 0x583   : > { %v7791_v9 = vpop.f32.mrb[19].mxu0 }
 0x584   : > { %v9769_v18 = vpop.f32.mrb[16].mxu1 }
 0x585   : > { %v7796_v48 = vpop.f32.mrb[17].mxu1 }
 0x586   : > { %v1758_v53 = vpop.f32.mrb[18].mxu1 }
 0x587   : > { %v7797_v45 = vpop.f32.mrb[19].mxu1 }
 0x588   : > { %v9771_v17 = vpop.f32.mrb[20].mxu0 }
 0x589   : > { %v7802_v62 = vpop.f32.mrb[21].mxu0 }
 0x58a   : > { %v1804_v2 = vpop.f32.mrb[22].mxu0 }
 0x58b   : > { %v7803_v34 = vpop.f32.mrb[23].mxu0 }
 0x58c   : > { %v9773_v28 = vpop.f32.mrb[20].mxu1 }
 0x58d   : > { %v7808_v16 = vpop.f32.mrb[21].mxu1 }
 0x58e   : > { %v1850_v29 = vpop.f32.mrb[22].mxu1 }
 0x58f   : > { %v7809_v15 = vpop.f32.mrb[23].mxu1 }
 0x591   : > { %v9775_v37 = vpop.f32.mrb[24].mxu0 }
 0x592   : > { %v7814_v44 = vpop.f32.mrb[25].mxu0 }
 0x593   : > { %v1896_v7 = vpop.f32.mrb[26].mxu0 }
 0x594   : > { %v7815_v33 = vpop.f32.mrb[27].mxu0  ;;  %v9777_v21 = vpop.f32.mrb[24].mxu1 }
 0x595   : > { %v7820_v40 = vpop.f32.mrb[25].mxu1 }
 0x596   : > { %v1942_v35 = vpop.f32.mrb[26].mxu1 }
 0x597   : > { %v7821_v59 = vpop.f32.mrb[27].mxu1 }
 0x599   : > { %v9779_v42 = vpop.f32.mrb[28].mxu0 }
 0x59a   : > { %v7826_v19 = vpop.f32.mrb[29].mxu0 }
 0x59b   : > { %v1988_v24 = vpop.f32.mrb[30].mxu0 }
 0x59c   : > { %v7827_v41 = vpop.f32.mrb[31].mxu0 }
 0x5a2   : > { %v2081_v12 = vpop.f32.mrb[32].mxu0 }
 0x5a3   : > { %v9782_v23 = vadd.f32 %v2081_v12, %v9525_v57  ;;  %v7838_v0 = vpop.f32.mrb[33].mxu0 }
 0x5a4   : > { %v2084_v56 = vpop.f32.mrb[34].mxu0 }
 0x5a5   : > { %v7839_v61 = vpop.f32.mrb[35].mxu0  ;;  %v2437_v9 = vsel %vm1571_vm2, %v9782_v23, -inf }
 0x5a6   : > { %2438 = vmax.xlane.f32.xlu0 %v2437_v9 }
 0x5aa   : > { %v2181_v48 = vpop.f32.mrb[36].mxu0 }
 0x5ab   : > { %v2182_v53 = vadd.f32 %v2181_v48, %v9536_v36  ;;  %v7850_v45 = vpop.f32.mrb[37].mxu0 }
 0x5ac   : > { %v2184_v62 = vpop.f32.mrb[38].mxu0 }
 0x5ad   : > { %v2443_v2 = vsel %vm1571_vm2, %v2182_v53, -inf  ;;  %v7851_v34 = vpop.f32.mrb[39].mxu0 }
 0x5ae   : > { %2444 = vmax.xlane.f32.xlu0 %v2443_v2 }
 0x5b2   : > { %v2281_v16 = vpop.f32.mrb[40].mxu0 }
 0x5b3   : > { %v7862_v29 = vpop.f32.mrb[41].mxu0  ;;  %v2282_v62 = vadd.f32 %v2281_v16, %v9552_v6 }
 0x5b4   : > { %v2284_v57 = vpop.f32.mrb[42].mxu0 }
 0x5b5   : > { %v7863_v15 = vpop.f32.mrb[43].mxu0 }
 0x5ba   : > { %v2381_v44 = vpop.f32.mrb[44].mxu0 }
 0x5bb   : > { %v7874_v7 = vpop.f32.mrb[45].mxu0  ;;  %v2382_v57 = vadd.f32 %v2381_v44, %v9561_v8 }
 0x5bc   : > { %v2384_v33 = vpop.f32.mrb[46].mxu0 }
 0x5bd   : > { %v7875_v40 = vpop.f32.mrb[47].mxu0  ;;  %v2455_v33 = vsel %vm1571_vm2, %v2382_v57, -inf }
 0x5c9   : > { %v9788_v35 = vpop.f32.mrb[28].mxu1 }
 0x5ca   : > { %v7832_v59 = vpop.f32.mrb[29].mxu1 }
 0x5cb   : > { %v2034_v19 = vpop.f32.mrb[30].mxu1 }
 0x5cc   : > { %v7833_v24 = vpop.f32.mrb[31].mxu1 }
 0x5d1   : > { %v2131_v36 = vpop.f32.mrb[32].mxu1 }
 0x5d2   : > { %v2132_v41 = vadd.f32 %v2131_v36, %v9529_v50  ;;  %v7844_v12 = vpop.f32.mrb[33].mxu1  ;;  %v2449_v50 = vsel %vm1571_vm2, %v2282_v62, -inf }
 0x5d3   : > { %v2134_v0 = vpop.f32.mrb[34].mxu1 }
 0x5d4   : > { %v7845_v56 = vpop.f32.mrb[35].mxu1  ;;  %v2440_v61 = vsel %vm1571_vm2, %v2132_v41, -inf }
 0x5d5   : > { %2441 = vmax.xlane.f32.xlu1 %v2440_v61 }
 0x5d9   : > { %v2231_v9 = vpop.f32.mrb[36].mxu1 }
 0x5da   : > { %v9793_v48 = vadd.f32 %v2231_v9, %v9540_v1  ;;  %v7856_v45 = vpop.f32.mrb[37].mxu1 }
 0x5db   : > { %v2234_v2 = vpop.f32.mrb[38].mxu1 }
 0x5dc   : > { %v7857_v34 = vpop.f32.mrb[39].mxu1  ;;  %v2446_v29 = vsel %vm1571_vm2, %v9793_v48, -inf }
 0x5dd   : > { %2447 = vmax.xlane.f32.xlu0 %v2446_v29 }
 0x5e1   : > { %v2331_v15 = vpop.f32.mrb[40].mxu1  ;;  %2450 = vmax.xlane.f32.xlu0 %v2449_v50 }
 0x5e2   : > { %v9801_v7 = vadd.f32 %v2331_v15, %v9548_v43  ;;  %v7868_v1 = vpop.f32.mrb[41].mxu1 }
 0x5e3   : > { %v2334_v40 = vpop.f32.mrb[42].mxu1 }
 0x5e4   : > { %v7869_v6 = vpop.f32.mrb[43].mxu1  ;;  %v2452_v16 = vsel %vm1571_vm2, %v9801_v7, -inf }
 0x5e5   : > { %2453 = vmax.xlane.f32.xlu1 %v2452_v16  ;;  %2456 = vmax.xlane.f32.xlu0 %v2455_v33 }
 0x5e9   : > { %v2431_v59 = vpop.f32.mrb[44].mxu1 }
 0x5ea   : > { %v7880_v19 = vpop.f32.mrb[45].mxu1  ;;  %v9813_v43 = vadd.f32 %v2431_v59, %v9565_v3 }
 0x5eb   : > { %v2434_v24 = vpop.f32.mrb[46].mxu1 }
 0x5ec   : > { %v7881_v36 = vpop.f32.mrb[47].mxu1  ;;  %v2458_v8 = vsel %vm1571_vm2, %v9813_v43, -inf }
 0x5f6   : > { %2581 = vrot.lane.b32.xlu1 %v9610_v46, %s8687_s1 }
 0x5fa   : > { %2629 = vrot.lane.b32.xlu1 %v9655_v11, %s8687_s1 }
 0x5fb   : > { %2533 = vrot.lane.b32.xlu0 %v9604_v39, %s8687_s1 }
 0x61e   : > { %2459 = vmax.xlane.f32.xlu1 %v2458_v8 }
 0x62f   : > { %2677 = vrot.lane.b32.xlu1 %v9662_v4, %s8687_s1 }
 0x633   : > { %v2439_v44 = vpop.xlane.xlu0 %2438 }
 0x634   : > { %v2461_v12 = vsub.f32 %v9782_v23, %v2439_v44 }
 0x636   : > { %v2469_v46 = vmul.f32 1.442695, %v2461_v12 }
 0x638   : > { %8364 = vpow2.f32 %v2469_v46 }
 0x63b   : > { %v2445_v0 = vpop.xlane.xlu0 %2444 }
 0x63c   : > { %v2463_v11 = vsub.f32 %v2182_v53, %v2445_v0 }
 0x63e   : > { %v2473_v56 = vmul.f32 1.442695, %v2463_v11 }
 0x640   : > { %8366 = vpow2.f32 %v2473_v56 }
 0x642   : > { %v9820_v39 = vpop.eup %8364 }
 0x643   : > { %v2485_v3 = vsel %vm1571_vm2, %v9820_v39, 0.0 }
 0x644   : > { %2486 = vadd.xlane.f32.xlu0 %v2485_v3 }
 0x64a   : > { %v9824_v61 = vpop.eup %8366 }
 0x64b   : > { %v2491_v4 = vsel %vm1571_vm2, %v9824_v61, 0.0 }
 0x64c   : > { %2492 = vadd.xlane.f32.xlu0 %v2491_v4 }
 0x662   : > { %2725 = vrot.lane.b32.xlu0 %v9673_v13, %s8687_s1  ;;  %v2442_v23 = vpop.xlane.xlu1 %2441 }
 0x663   : > { %v2462_v9 = vsub.f32 %v2132_v41, %v2442_v23 }
 0x665   : > { %v2471_v53 = vmul.f32 1.442695, %v2462_v9 }
 0x667   : > { %8368 = vpow2.f32 %v2471_v53 }
 0x66a   : > { %v2448_v45 = vpop.xlane.xlu0 %2447 }
 0x66b   : > { %v2464_v36 = vsub.f32 %v9793_v48, %v2448_v45 }
 0x66d   : > { %v2475_v8 = vmul.f32 1.442695, %v2464_v36 }
 0x66e   : > { %v2451_v2 = vpop.xlane.xlu0 %2450 }
 0x66f   : > { %v2465_v34 = vsub.f32 %v2282_v62, %v2451_v2 }
 0x671   : > { %v9830_v29 = vpop.eup %8368  ;;  %v2477_v50 = vmul.f32 1.442695, %v2465_v34 }
 0x672   : > { %v2454_v15 = vpop.xlane.xlu1 %2453  ;;  %v2457_v1 = vpop.xlane.xlu0 %2456  ;;  %v2488_v33 = vsel %vm1571_vm2, %v9830_v29, 0.0 }
 0x673   : > { %8370 = vpow2.f32 %v2477_v50  ;;  %v2467_v40 = vsub.f32 %v2382_v57, %v2457_v1  ;;  %2489 = vadd.xlane.f32.xlu1 %v2488_v33  ;;  %v2466_v44 = vsub.f32 %v9801_v7, %v2454_v15 }
 0x675   : > { %v2481_v6 = vmul.f32 1.442695, %v2467_v40  ;;  %v2479_v12 = vmul.f32 1.442695, %v2466_v44 }
 0x676   : > { %v2582_v13 = vpop.permute.xlu1 %2581  ;;  %v2534_v16 = vpop.permute.xlu0 %2533 }
 0x677   : > { %v2587_v41 = vsel %vm1671_vm3, %v2582_v13, 0  ;;  %v2539_v59 = vsel %vm1671_vm3, %v2534_v16, 0  ;;  %8372 = vpow2.f32 %v2481_v6 }
 0x678   : > { %7889 = vmatpush3.bf16.msra.mxu1 %v2587_v41  ;;  %7883 = vmatpush3.bf16.msra.mxu0 %v2539_v59  ;;  %8374 = vpow2.f32 %v2475_v8 }
 0x679   : > { %7894 = vmatprep.subr.bf16.mxu0 %v11807_v47  ;;  %7900 = vmatprep.subr.bf16.mxu1 %v11807_v47  ;;  %8376 = vpow2.f32 %v2479_v12 }
 0x67a   : > { %v2630_v0 = vpop.permute.xlu1 %2629 }
 0x67b   : > { %v2635_v2 = vsel %vm1671_vm3, %v2630_v0, 0 }
 0x67d   : > { %v9838_v62 = vpop.eup %8370 }
 0x67e   : > { %v2497_v57 = vsel %vm1571_vm2, %v9838_v62, 0.0 }
 0x681   : > { %2498 = vadd.xlane.f32.xlu0 %v2497_v57  ;;  %v9842_v19 = vpop.eup %8372 }
 0x682   : > { %v2503_v24 = vsel %vm1571_vm2, %v9842_v19, 0.0  ;;  %v9852_v46 = vpop.eup %8374 }
 0x683   : > { %v2494_v11 = vsel %vm1571_vm2, %v9852_v46, 0.0  ;;  %v9856_v56 = vpop.eup %8376 }
 0x684   : > { %2773 = vrot.lane.b32.xlu1 %v9684_v63, %s8687_s1  ;;  %v2500_v48 = vsel %vm1571_vm2, %v9856_v56, 0.0 }
 0x685   : > { %2504 = vadd.xlane.f32.xlu0 %v2503_v24 }
 0x69b   : > { %2821 = vrot.lane.b32.xlu0 %v9695_v38, %s8687_s1 }
 0x6a8   : > { %2495 = vadd.xlane.f32.xlu1 %v2494_v11 }
 0x6ab   : > { %v2460_v63 = vpop.xlane.xlu1 %2459 }
 0x6ac   : > { %v2468_v7 = vsub.f32 %v9813_v43, %v2460_v63  ;;  %2501 = vadd.xlane.f32.xlu1 %v2500_v48 }
 0x6ae   : > { %v2483_v3 = vmul.f32 1.442695, %v2468_v7 }
 0x6b0   : > { %8378 = vpow2.f32 %v2483_v3 }
 0x6ba   : > { %v9861_v38 = vpop.eup %8378 }
 0x6bb   : > { %v2506_v4 = vsel %vm1571_vm2, %v9861_v38, 0.0 }
 0x6bc   : > { %2507 = vadd.xlane.f32.xlu1 %v2506_v4 }
 0x6cd   : > { %2869 = vrot.lane.b32.xlu1 %v9705_v54, %s8687_s1 }
 0x6d1   : > { %v2487_v23 = vpop.xlane.xlu0 %2486 }
 0x6d2   : > { %8380 = vrcp.f32 %v2487_v23 }
 0x6d9   : > { %v2493_v9 = vpop.xlane.xlu0 %2492 }
 0x6da   : > { %8382 = vrcp.f32 %v2493_v9 }
 0x6dc   : > { %v8381_v53 = vpop.eup %8380 }
 0x6dd   : > { %v2517_v45 = vmul.f32 %v8381_v53, %v9820_v39  ;;  %v2726_v54 = vpop.permute.xlu0 %2725  ;;  %v2678_v39 = vpop.permute.xlu1 %2677 }
 0x6de   : > { %v2731_v1 = vsel %vm1671_vm3, %v2726_v54, 0 }
 0x6df   : > { %v2525_v43 = vpack.c.bf16 %v2517_v45, %v2517_v45 }
 0x6e1   : > { %7885 = vmatmul.mubr.msk.bf16.vlgmr.msra.gmra.mrb[48].mxu0 %vm1571_vm2, %v2525_v43 }
 0x6e2   : > { %7895 = vmatpush3.bf16.msra.mxu0 %v2635_v2  ;;  %7896 = vmatprep.mubr.msk.bf16.mxu0 %vm8686_vm1, %v11807_v47 }
 0x6e3   : > { %7906 = vmatprep.subr.bf16.mxu0 %v11807_v47 }
 0x6e4   : > { %v8383_v34 = vpop.eup %8382 }
 0x6e5   : > { %v2519_v50 = vmul.f32 %v8383_v34, %v9824_v61  ;;  %v2683_v61 = vsel %vm1671_vm3, %v2678_v39, 0 }
 0x6e7   : > { %v2527_v15 = vpack.c.bf16 %v2519_v50, %v2519_v50 }
 0x6e9   : > { %7897 = vmatmul.mubr.msk.bf16.vlgmr.msra.gmra.mrb[52].mxu0 %vm1571_vm2, %v2527_v15 }
 0x6ea   : > { %7907 = vmatpush3.bf16.msra.mxu0 %v2731_v1  ;;  %7908 = vmatprep.mubr.msk.bf16.mxu0 %vm8686_vm1, %v11807_v47 }
 0x6eb   : > { %7918 = vmatprep.subr.bf16.mxu0 %v11807_v47 }
 0x700   : > { %v2490_v33 = vpop.xlane.xlu1 %2489 }
 0x701   : > { %8384 = vrcp.f32 %v2490_v33 }
 0x704   : > { %v2774_v0 = vpop.permute.xlu1 %2773 }
 0x705   : > { %v2779_v4 = vsel %vm1671_vm3, %v2774_v0, 0 }
 0x70b   : > { %v8385_v40 = vpop.eup %8384 }
 0x70c   : > { %v2518_v6 = vmul.f32 %v8385_v40, %v9830_v29  ;;  %v7173_v40 = vcombine.low %v8995_v25, %v8998_v26 }
 0x70e   : > { %v2499_v13 = vpop.xlane.xlu0 %2498  ;;  %v2526_v16 = vpack.c.bf16 %v2518_v6, %v2518_v6 }
 0x70f   : > { %8386 = vrcp.f32 %v2499_v13 }
 0x710   : > { %7891 = vmatmul.mubr.msk.bf16.vlgmr.msra.gmra.mrb[48].mxu1 %vm1571_vm2, %v2526_v16 }
 0x711   : > { %7901 = vmatpush3.bf16.msra.mxu1 %v2683_v61  ;;  %7902 = vmatprep.mubr.msk.bf16.mxu1 %vm8686_vm1, %v11807_v47 }
 0x712   : > { %v2505_v41 = vpop.xlane.xlu0 %2504  ;;  %7912 = vmatprep.subr.bf16.mxu1 %v11807_v47 }
 0x713   : > { %8388 = vrcp.f32 %v2505_v41 }
 0x716   : > { %v2822_v57 = vpop.permute.xlu0 %2821 }
 0x717   : > { %v2827_v36 = vsel %vm1671_vm3, %v2822_v57, 0  ;;  %v11808_v57 = vld [vmem:[#allocation42_spill] sm:$0xff] }
 0x719   : > { %v8387_v59 = vpop.eup %8386 }
 0x71a   : > { %v2521_v24 = vmul.f32 %v8387_v59, %v9838_v62  ;;  %v7176_v59 = vcombine.low %v9013_v32, %v9016_v14 }
 0x71c   : > { %v2529_v29 = vpack.c.bf16 %v2521_v24, %v2521_v24  ;;  %v11809_v24 = vld [vmem:[#allocation41_spill] sm:$0xff] }
 0x71d   : > { %v8389_v8 = vpop.eup %8388 }
 0x71e   : > { %7909 = vmatmul.mubr.msk.bf16.vlgmr.msra.gmra.mrb[56].mxu0 %vm1571_vm2, %v2529_v29  ;;  %v2523_v44 = vmul.f32 %v8389_v8, %v9842_v19  ;;  %v7177_v29 = vcombine.low %v11809_v24, %v11808_v57  ;;  %v11811_v8 = vld [vmem:[#allocation43_spill] sm:$0xff] }
 0x71f   : > { %7919 = vmatpush3.bf16.msra.mxu0 %v2827_v36  ;;  %7920 = vmatprep.mubr.msk.bf16.mxu0 %vm8686_vm1, %v11807_v47  ;;  %v11810_v36 = vld [vmem:[#allocation44_spill] sm:$0xff] }
 0x720   : > { %v2531_v12 = vpack.c.bf16 %v2523_v44, %v2523_v44  ;;  %7930 = vmatprep.subr.bf16.mxu0 %v7173_v40  ;;  %v7178_v44 = vcombine.low %v11811_v8, %v11810_v36 }
 0x726   : > { %7921 = vmatmul.mubr.msk.bf16.vlgmr.msra.gmra.mrb[60].mxu0 %vm1571_vm2, %v2531_v12 }
 0x727   : > { %7931 = vmatpush3.bf16.msra.mxu0 %v7173_v40 }
 0x735   : > { %v2496_v11 = vpop.xlane.xlu1 %2495 }
 0x736   : > { %8390 = vrcp.f32 %v2496_v11  ;;  %v11812_v11 = vld [vmem:[#allocation46_spill] sm:$0xff] }
 0x739   : > { %v2502_v63 = vpop.xlane.xlu1 %2501 }
 0x73a   : > { %8392 = vrcp.f32 %v2502_v63  ;;  %v11813_v63 = vld [vmem:[#allocation45_spill] sm:$0xff] }
 0x740   : > { %v8391_v62 = vpop.eup %8390 }
 0x741   : > { %v2520_v48 = vmul.f32 %v8391_v62, %v9852_v46  ;;  %v7179_v62 = vcombine.low %v11813_v63, %v11812_v11 }
 0x743   : > { %v2528_v7 = vpack.c.bf16 %v2520_v48, %v2520_v48 }
 0x744   : > { %v8393_v3 = vpop.eup %8392 }
 0x745   : > { %7903 = vmatmul.mubr.msk.bf16.vlgmr.msra.gmra.mrb[52].mxu1 %vm1571_vm2, %v2528_v7  ;;  %v2522_v19 = vmul.f32 %v8393_v3, %v9856_v56 }
 0x746   : > { %7913 = vmatpush3.bf16.msra.mxu1 %v2779_v4  ;;  %7914 = vmatprep.mubr.msk.bf16.mxu1 %vm8686_vm1, %v11807_v47 }
 0x747   : > { %7924 = vmatprep.subr.bf16.mxu1 %v11807_v47  ;;  %v2530_v9 = vpack.c.bf16 %v2522_v19, %v2522_v19 }
 0x749   : > { %v2508_v23 = vpop.xlane.xlu1 %2507 }
 0x74a   : > { %8394 = vrcp.f32 %v2508_v23 }
 0x74d   : > { %7915 = vmatmul.mubr.msk.bf16.vlgmr.msra.gmra.mrb[56].mxu1 %vm1571_vm2, %v2530_v9  ;;  %v2870_v46 = vpop.permute.xlu1 %2869  ;;  %v11814_v9 = vld [vmem:[#allocation48_spill] sm:$0xff] }
 0x74e   : > { %v2875_v53 = vsel %vm1671_vm3, %v2870_v46, 0  ;;  %7926 = vmatprep.mubr.msk.bf16.mxu1 %vm8686_vm1, %v11807_v47  ;;  %v7174_v47 = vcombine.low %v9001_v27, %v9004_v30  ;;  %v11815_v46 = vld [vmem:[#allocation47_spill] sm:$0xff] }
 0x74f   : > { %7925 = vmatpush3.bf16.msra.mxu1 %v2875_v53  ;;  %v7180_v53 = vcombine.low %v11815_v46, %v11814_v9 }
 0x750   : > { %7932 = vmatprep.subr.bf16.mxu0 %v7174_v47 }
 0x751   : > { %7933 = vmatpush3.bf16.msra.mxu0 %v7174_v47 }
 0x754   : > { %v8395_v45 = vpop.eup %8394 }
 0x755   : > { %v2524_v43 = vmul.f32 %v8395_v45, %v9861_v38  ;;  %v7175_v38 = vcombine.low %v9007_v31, %v9010_v20 }
 0x757   : > { %v2532_v2 = vpack.c.bf16 %v2524_v43, %v2524_v43  ;;  %7934 = vmatprep.subr.bf16.mxu0 %v7175_v38 }
 0x758   : > { %7935 = vmatpush3.bf16.msra.mxu0 %v7175_v38 }
 0x759   : > { %7927 = vmatmul.mubr.msk.bf16.vlgmr.msra.gmra.mrb[60].mxu1 %vm1571_vm2, %v2532_v2  ;;  %7936 = vmatprep.subr.bf16.mxu0 %v7176_v59 }
 0x75c   : > { %7937 = vmatpush3.bf16.msra.mxu0 %v7176_v59 }
 0x75d   : > { %7938 = vmatprep.subr.bf16.mxu0 %v7177_v29 }
 0x760   : > { %7939 = vmatpush3.bf16.msra.mxu0 %v7177_v29 }
 0x761   : > { %7940 = vmatprep.subr.bf16.mxu0 %v7178_v44 }
 0x764   : > { %7941 = vmatpush3.bf16.msra.mxu0 %v7178_v44 }
 0x765   : > { %7942 = vmatprep.subr.bf16.mxu0 %v7179_v62 }
 0x768   : > { %7943 = vmatpush3.bf16.msra.mxu0 %v7179_v62 }
 0x769   : > { %7944 = vmatprep.subr.bf16.mxu0 %v7180_v53 }
 0x76c   : > { %7945 = vmatpush3.bf16.msra.mxu0 %v7180_v53 }
 0x7b4   : > { %v2575_v56 = vpop.f32.mrb[48].mxu0 }
 0x7b5   : > { %v7886_v34 = vpop.f32.mrb[49].mxu0 }
 0x7b6   : > { %v2578_v54 = vpop.f32.mrb[50].mxu0 }
 0x7b7   : > { %v7887_v50 = vpop.f32.mrb[51].mxu0 }
 0x7bc   : > { %v2671_v15 = vpop.f32.mrb[52].mxu0 }
 0x7bd   : > { %v7898_v1 = vpop.f32.mrb[53].mxu0 }
 0x7be   : > { %v2674_v39 = vpop.f32.mrb[54].mxu0 }
 0x7bf   : > { %v7899_v33 = vpop.f32.mrb[55].mxu0 }
 0x7e3   : > { %v2623_v6 = vpop.f32.mrb[48].mxu1 }
 0x7e4   : > { %v8312_v13 = vpack.i.bf16 %v2623_v6, %v2575_v56  ;;  %v7892_v16 = vpop.f32.mrb[49].mxu1 }
 0x7e5   : > { %v2626_v61 = vpop.f32.mrb[50].mxu1 }
 0x7e6   : > { %v7893_v41 = vpop.f32.mrb[51].mxu1  ;;  %8313 = vrot.lane.b32.xlu0 %v8312_v13, %s8687_s1 }
 0x7f1   : > { %v2767_v12 = vpop.f32.mrb[56].mxu0 }
 0x7f2   : > { %v7910_v0 = vpop.f32.mrb[57].mxu0 }
 0x7f3   : > { %v2770_v48 = vpop.f32.mrb[58].mxu0 }
 0x7f4   : > { %v7911_v7 = vpop.f32.mrb[59].mxu0 }
 0x7f9   : > { %v2863_v3 = vpop.f32.mrb[60].mxu0 }
 0x7fa   : > { %v7922_v4 = vpop.f32.mrb[61].mxu0 }
 0x7fb   : > { %v2866_v19 = vpop.f32.mrb[62].mxu0 }
 0x7fc   : > { %v7923_v23 = vpop.f32.mrb[63].mxu0  ;;  %v11816_v19 = vld [vmem:[#allocation147_spill] sm:$0xff] }
 0x7fd   : > { %v11817_v23 = vld [vmem:[#allocation16_spill] sm:$0xff] }
 0x7fe   : > { %v2964_v9 = vrot.slane %v11817_v23, %v11816_v19 }
 0x818   : > { %v2719_v45 = vpop.f32.mrb[52].mxu1 }
 0x819   : > { %v8317_v43 = vpack.i.bf16 %v2719_v45, %v2671_v15  ;;  %v7904_v2 = vpop.f32.mrb[53].mxu1 }
 0x81a   : > { %v2722_v56 = vpop.f32.mrb[54].mxu1  ;;  %v11818_v2 = vld [vmem:[#allocation25_spill] sm:$0xff] }
 0x81b   : > { %v7905_v34 = vpop.f32.mrb[55].mxu1  ;;  %8318 = vrot.lane.b32.xlu1 %v8317_v43, %s8687_s1 }
 0x820   : > { %v2815_v54 = vpop.f32.mrb[56].mxu1 }
 0x821   : > { %v8322_v50 = vpack.i.bf16 %v2815_v54, %v2767_v12  ;;  %v7916_v1 = vpop.f32.mrb[57].mxu1  ;;  %v11819_v54 = vld [vmem:[#allocation26_spill] sm:$0xff] }
 0x822   : > { %v2818_v39 = vpop.f32.mrb[58].mxu1 }
 0x823   : > { %v7917_v33 = vpop.f32.mrb[59].mxu1  ;;  %8323 = vrot.lane.b32.xlu0 %v8322_v50, %s8687_s1  ;;  %v11821_v39 = vld [vmem:[#allocation28_spill] sm:$0xff] }
 0x82c   : > { %v2911_v40 = vpop.f32.mrb[60].mxu1 }
 0x82d   : > { %v8327_v47 = vpack.i.bf16 %v2911_v40, %v2863_v3  ;;  %v7928_v38 = vpop.f32.mrb[61].mxu1 }
 0x82e   : > { %v2914_v6 = vpop.f32.mrb[62].mxu1 }
 0x82f   : > { %v7929_v13 = vpop.f32.mrb[63].mxu1  ;;  %8328 = vrot.lane.b32.xlu1 %v8327_v47, %s8687_s1 }
 0x858   : > { %v8314_v15 = vpop.permute.xlu0 %8313 }
 0x859   : > { %v8316_v16 = vunpack.i.h.bf16 %v8314_v15  ;;  %v8315_v61 = vunpack.i.l.bf16 %v8314_v15 }
 0x85b   : > { %v2949_v41 = vsel %vm1202_vm0, %v9767_v10, %v8315_v61  ;;  %v2950_v59 = vsel %vm1202_vm0, %v9769_v18, %v8316_v16  ;;  %v11822_v16 = vld [vmem:[#allocation29_spill] sm:$0xff] }
 0x85c   : > { %v2957_v57 = vpack.c.bf16 %v2950_v59, %v2949_v41 }
 0x85e   : > { %7946 = vmatprep.mubr.bf16.mxu0 %v2957_v57  ;;  %v11823_v57 = vld [vmem:[#allocation30_spill] sm:$0xff] }
 0x88d   : > { %v8319_v24 = vpop.permute.xlu1 %8318 }
 0x88e   : > { %v8321_v29 = vunpack.i.h.bf16 %v8319_v24  ;;  %v8320_v36 = vunpack.i.l.bf16 %v8319_v24 }
 0x890   : > { %v2952_v8 = vsel %vm1202_vm0, %v9773_v28, %v8321_v29  ;;  %v2951_v44 = vsel %vm1202_vm0, %v9771_v17, %v8320_v36  ;;  %v11824_v29 = vld [vmem:[#allocation31_spill] sm:$0xff] }
 0x891   : > { %v2958_v12 = vpack.c.bf16 %v2952_v8, %v2951_v44  ;;  %v11825_v8 = vld [vmem:[#allocation32_spill] sm:$0xff] }
 0x893   : > { %7947 = vmatmul.mubr.bf16.vlgmr.msra.gmra.mrb[64].mxu0 %v2958_v12  ;;  %v11826_v12 = vld [vmem:[#allocation51_spill] sm:$0xff] }
 0x895   : > { %v8324_v0 = vpop.permute.xlu0 %8323 }
 0x896   : > { %v8326_v11 = vunpack.i.h.bf16 %v8324_v0  ;;  %v8325_v63 = vunpack.i.l.bf16 %v8324_v0  ;;  %v11827_v0 = vld [vmem:[#allocation49_spill] sm:$0xff] }
 0x898   : > { %v2953_v10 = vsel %vm1202_vm0, %v9775_v37, %v8325_v63  ;;  %v2954_v18 = vsel %vm1202_vm0, %v9777_v21, %v8326_v11  ;;  %v7182_v11 = vcombine.high %v11827_v0, %v11826_v12  ;;  %v11828_v63 = vld [vmem:[#allocation52_spill] sm:$0xff] }
 0x899   : > { %v2959_v62 = vpack.c.bf16 %v2954_v18, %v2953_v10  ;;  %v11829_v10 = vld [vmem:[#allocation50_spill] sm:$0xff] }
 0x89a   : > { %v7184_v18 = vcombine.high %v11829_v10, %v11828_v63  ;;  %3384 = vmatprep.subr.bf16.mxu1 %v7182_v11 }
 0x89b   : > { %7950 = vmatprep.mubr.bf16.mxu0 %v2959_v62  ;;  %v7181_v62 = vcombine.low %v11827_v0, %v11826_v12  ;;  %v11837_v12 = vld [vmem:[#allocation58_spill] sm:$0xff] }
 0x89c   : > { %3457 = vmatprep.subr.bf16.mxu0 %v7184_v18 }
 0x89d   : > { %3385 = vmatpush1.bf16.msra.mxu1 %v7181_v62 }
 0x8a1   : > { %v8329_v48 = vpop.permute.xlu1 %8328 }
 0x8a2   : > { %v8331_v7 = vunpack.i.h.bf16 %v8329_v48  ;;  %v8330_v3 = vunpack.i.l.bf16 %v8329_v48  ;;  %v7183_v48 = vcombine.low %v11829_v10, %v11828_v63 }
 0x8a4   : > { %v2955_v28 = vsel %vm1202_vm0, %v9779_v42, %v8330_v3  ;;  %v2956_v17 = vsel %vm1202_vm0, %v9788_v35, %v8331_v7  ;;  %v11820_v42 = vld [vmem:[#allocation27_spill] sm:$0xff]  ;;  %v11831_v3 = vld [vmem:[#allocation53_spill] sm:$0xff]  ;;  %3458 = vmatpush1.bf16.msra.mxu0 %v7183_v48 }
 0x8a5   : > { %v2960_v4 = vpack.c.bf16 %v2956_v17, %v2955_v28  ;;  %v11830_v7 = vld [vmem:[#allocation55_spill] sm:$0xff]  ;;  %v11832_v17 = vld [vmem:[#allocation56_spill] sm:$0xff] }
 0x8a6   : > { %v7186_v28 = vcombine.high %v11831_v3, %v11830_v7 }
 0x8a7   : > { %7951 = vmatmul.mubr.bf16.gmra.mrb[68].mxu0 %v2960_v4  ;;  %v11833_v4 = vld [vmem:[#allocation54_spill] sm:$0xff] }
 0x8a8   : > { %3386 = vmatprep.subr.bf16.mxu1 %v7186_v28  ;;  %v11838_v28 = vld [vmem:[#allocation63_spill] sm:$0xff] }
 0x966   : > { %v7948_v37 = vpop.f32.mrb[64].mxu0 }
 0x967   : > { %v3047_v46 = vpop.f32.mrb[65].mxu0  ;;  %v3056_v43 = vadd.f32 %v7948_v37, %v2964_v9  ;;  %v7185_v37 = vcombine.low %v11831_v3, %v11830_v7 }
 0x968   : > { %v3048_v53 = vadd.f32 %v3047_v46, %v2964_v9  ;;  %v7949_v21 = vpop.f32.mrb[66].mxu0  ;;  %v7187_v46 = vcombine.low %v11833_v4, %v11832_v17 }
 0x969   : > { %v3050_v45 = vpop.f32.mrb[67].mxu0  ;;  %v3080_v1 = vadd.f32 %v3056_v43, %v11820_v42  ;;  %v3059_v35 = vadd.f32 %v7949_v21, %v2964_v9  ;;  %3387 = vmatpush1.bf16.msra.mxu1 %v7185_v37 }
 0x96a   : > { %v3078_v56 = vadd.f32 %v3048_v53, %v11818_v2  ;;  %v3051_v34 = vadd.f32 %v3050_v45, %v2964_v9 }
 0x96b   : > { %v3081_v33 = vadd.f32 %v3059_v35, %v11821_v39 }
 0x96c   : > { %v3079_v50 = vadd.f32 %v3051_v34, %v11819_v54  ;;  %3086 = vadd.xlane.f32.xlu0 %v3078_v56 }
 0x96e   : > { %3088 = vadd.xlane.f32.xlu1 %v3079_v50 }
 0x970   : > { %3090 = vadd.xlane.f32.xlu0 %v3080_v1 }
 0x974   : > { %3092 = vadd.xlane.f32.xlu0 %v3081_v33 }
 0x97a   : > { %v7952_v40 = vpop.f32.mrb[68].mxu0 }
 0x97b   : > { %v3063_v47 = vpop.f32.mrb[69].mxu0  ;;  %v3072_v15 = vadd.f32 %v7952_v40, %v2964_v9 }
 0x97c   : > { %v3064_v38 = vadd.f32 %v3063_v47, %v2964_v9  ;;  %v7953_v6 = vpop.f32.mrb[70].mxu0 }
 0x97d   : > { %v3066_v13 = vpop.f32.mrb[71].mxu0  ;;  %v3075_v59 = vadd.f32 %v7953_v6, %v2964_v9  ;;  %v3084_v36 = vadd.f32 %v3072_v15, %v11824_v29 }
 0x97e   : > { %v3082_v61 = vadd.f32 %v3064_v38, %v11822_v16  ;;  %v3067_v41 = vadd.f32 %v3066_v13, %v2964_v9  ;;  %v7188_v9 = vcombine.high %v11833_v4, %v11832_v17  ;;  %v11839_v17 = vld [vmem:[#allocation61_spill] sm:$0xff]  ;;  %v11840_v4 = vld [vmem:[#allocation64_spill] sm:$0xff] }
 0x97f   : > { %v9951_v44 = vadd.f32 %v3075_v59, %v11825_v8  ;;  %v11834_v59 = vld [vmem:[#allocation59_spill] sm:$0xff]  ;;  %v11836_v8 = vld [vmem:[#allocation60_spill] sm:$0xff] }
 0x980   : > { %v3083_v24 = vadd.f32 %v3067_v41, %v11823_v57  ;;  %3094 = vadd.xlane.f32.xlu0 %v3082_v61  ;;  %3459 = vmatprep.subr.bf16.mxu0 %v7188_v9  ;;  %v11835_v57 = vld [vmem:[#allocation57_spill] sm:$0xff]  ;;  %v7192_v0 = vcombine.high %v11837_v12, %v11836_v8  ;;  %v7191_v63 = vcombine.low %v11837_v12, %v11836_v8  ;;  %v11841_v9 = vld [vmem:[#allocation62_spill] sm:$0xff] }
 0x981   : > { %3460 = vmatpush1.bf16.msra.mxu0 %v7187_v46  ;;  %v7190_v29 = vcombine.high %v11835_v57, %v11834_v59  ;;  %v7196_v37 = vcombine.high %v11841_v9, %v11840_v4  ;;  %v7193_v46 = vcombine.low %v11839_v17, %v11838_v28  ;;  %v11851_v8 = vld [vmem:[#allocation73_spill] sm:$0xff] }
 0x982   : > { %3096 = vadd.xlane.f32.xlu1 %v3083_v24  ;;  %3461 = vmatprep.subr.bf16.mxu0 %v7192_v0  ;;  %v11852_v0 = vld [vmem:[#allocation76_spill] sm:$0xff] }
 0x983   : > { %3388 = vmatprep.subr.bf16.mxu1 %v7190_v29  ;;  %v11850_v29 = vld [vmem:[#allocation75_spill] sm:$0xff] }
 0x984   : > { %3098 = vadd.xlane.f32.xlu0 %v3084_v36  ;;  %v7206_v12 = vcombine.high %v11851_v8, %v11850_v29 }
 0x985   : > { %3462 = vmatpush1.bf16.msra.mxu0 %v7191_v63  ;;  %v7205_v63 = vcombine.low %v11851_v8, %v11850_v29 }
 0x986   : > { %3100 = vadd.xlane.f32.xlu1 %v9951_v44  ;;  %3463 = vmatprep.subr.bf16.mxu0 %v7196_v37 }
 0x9f9   : > { %v3087_v53 = vpop.xlane.xlu0 %3086 }
 0x9fa   : > { %v3103_v21 = vmul.f32 0.0078125, %v3087_v53  ;;  %v7195_v53 = vcombine.low %v11841_v9, %v11840_v4  ;;  %v8688_v9 = vmov 0  }
 0x9fb   : > { %v3089_v45 = vpop.xlane.xlu1 %3088  ;;  %3416 = vmatprep.mubr.bf16.mxu1 %v8688_v9  ;;  %3489 = vmatprep.mubr.bf16.mxu0 %v8688_v9 }
 0x9fc   : > { %v9970_v43 = vsub.f32 %v3078_v56, %v3103_v21  ;;  %v3104_v2 = vmul.f32 0.0078125, %v3089_v45  ;;  %3464 = vmatpush1.bf16.msra.mxu0 %v7195_v53 }
 0x9fd   : > { %v3091_v34 = vpop.xlane.xlu0 %3090 }
 0x9fe   : > { %v9972_v54 = vsub.f32 %v3079_v50, %v3104_v2  ;;  %v3105_v42 = vmul.f32 0.0078125, %v3091_v34  ;;  %v3119_v35 = vmul.f32 %v9970_v43, %v9970_v43  ;;  %v11842_v2 = vld [vmem:[#allocation67_spill] sm:$0xff]  ;;  %v11843_v34 = vld [vmem:[#allocation65_spill] sm:$0xff] }
 0xa00   : > { %v9976_v39 = vsub.f32 %v3080_v1, %v3105_v42  ;;  %3127 = vadd.xlane.f32.xlu0 %v3119_v35  ;;  %v3120_v40 = vmul.f32 %v9972_v54, %v9972_v54  ;;  %v7198_v42 = vcombine.high %v11843_v34, %v11842_v2  ;;  %v11844_v35 = vld [vmem:[#allocation68_spill] sm:$0xff] }
 0xa01   : > { %v3093_v47 = vpop.xlane.xlu0 %3092 }
 0xa02   : > { %v3106_v38 = vmul.f32 0.0078125, %v3093_v47  ;;  %3129 = vadd.xlane.f32.xlu1 %v3120_v40  ;;  %v3121_v56 = vmul.f32 %v9976_v39, %v9976_v39  ;;  %v11845_v40 = vld [vmem:[#allocation66_spill] sm:$0xff] }
 0xa03   : > { %v7200_v47 = vcombine.high %v11845_v40, %v11844_v35 }
 0xa04   : > { %v9982_v6 = vsub.f32 %v3081_v33, %v3106_v38  ;;  %3131 = vadd.xlane.f32.xlu0 %v3121_v56  ;;  %v7189_v33 = vcombine.low %v11835_v57, %v11834_v59  ;;  %v7199_v38 = vcombine.low %v11845_v40, %v11844_v35  ;;  %v11846_v56 = vld [vmem:[#allocation71_spill] sm:$0xff] }
 0xa05   : > { %3465 = vmatprep.subr.bf16.mxu0 %v7200_v47 }
 0xa06   : > { %v3122_v50 = vmul.f32 %v9982_v6, %v9982_v6  ;;  %3389 = vmatpush1.bf16.msra.mxu1 %v7189_v33  ;;  %3466 = vmatpush1.bf16.msra.mxu0 %v7199_v38  ;;  %v11858_v38 = vld [vmem:[#allocation148_spill] sm:$0xff] }
 0xa08   : > { %3133 = vadd.xlane.f32.xlu1 %v3122_v50  ;;  %v11847_v50 = vld [vmem:[#allocation69_spill] sm:$0xff] }
 0xa09   : > { %v7201_v59 = vcombine.low %v11847_v50, %v11846_v56 }
 0xa0d   : > { %v3095_v13 = vpop.xlane.xlu0 %3094 }
 0xa0e   : > { %v3107_v1 = vmul.f32 0.0078125, %v3095_v13  ;;  %v7202_v13 = vcombine.high %v11847_v50, %v11846_v56  ;;  %v3178_v56 = vrot.slane %v11817_v23, %v11858_v38 }
 0xa0f   : > { %v3097_v15 = vpop.xlane.xlu1 %3096 }
 0xa10   : > { %v9986_v16 = vsub.f32 %v3082_v61, %v3107_v1  ;;  %v3108_v41 = vmul.f32 0.0078125, %v3097_v15  ;;  %v11848_v1 = vld [vmem:[#allocation72_spill] sm:$0xff]  ;;  %v11849_v15 = vld [vmem:[#allocation70_spill] sm:$0xff] }
 0xa11   : > { %v3099_v11 = vpop.xlane.xlu0 %3098  ;;  %v7203_v57 = vcombine.low %v11849_v15, %v11848_v1 }
 0xa12   : > { %v9996_v10 = vsub.f32 %v3083_v24, %v3108_v41  ;;  %v3109_v18 = vmul.f32 0.0078125, %v3099_v11  ;;  %v3123_v61 = vmul.f32 %v9986_v16, %v9986_v16  ;;  %v7194_v24 = vcombine.high %v11839_v17, %v11838_v28  ;;  %v11853_v11 = vld [vmem:[#allocation74_spill] sm:$0xff] }
 0xa13   : > { %v3101_v62 = vpop.xlane.xlu1 %3100  ;;  %v7204_v41 = vcombine.high %v11849_v15, %v11848_v1  ;;  %v7208_v33 = vcombine.high %v11853_v11, %v11852_v0  ;;  %v11857_v28 = vld [vmem:[#allocation78_spill] sm:$0xff] }
 0xa14   : > { %v10000_v48 = vsub.f32 %v3084_v36, %v3109_v18  ;;  %v3110_v7 = vmul.f32 0.0078125, %v3101_v62  ;;  %3135 = vadd.xlane.f32.xlu0 %v3123_v61  ;;  %v3124_v3 = vmul.f32 %v9996_v10, %v9996_v10  ;;  %3390 = vmatprep.subr.bf16.mxu1 %v7194_v24  ;;  %v7207_v18 = vcombine.low %v11853_v11, %v11852_v0  ;;  %v11854_v61 = vld [vmem:[#allocation79_spill] sm:$0xff]  ;;  %v11855_v62 = vld [vmem:[#allocation77_spill] sm:$0xff] }
 0xa15   : > { %3391 = vmatpush1.bf16.msra.mxu1 %v7193_v46  ;;  %3467 = vmatprep.subr.bf16.mxu0 %v7204_v41  ;;  %v7209_v24 = vcombine.low %v11855_v62, %v11854_v61 }
 0xa16   : > { %v10013_v36 = vsub.f32 %v9951_v44, %v3110_v7  ;;  %3137 = vadd.xlane.f32.xlu1 %v3124_v3  ;;  %v3125_v21 = vmul.f32 %v10000_v48, %v10000_v48  ;;  %v7197_v44 = vcombine.low %v11843_v34, %v11842_v2  ;;  %3392 = vmatprep.subr.bf16.mxu1 %v7198_v42  ;;  %v11856_v3 = vld [vmem:[#allocation80_spill] sm:$0xff] }
 0xa17   : > { %3468 = vmatpush1.bf16.msra.mxu0 %v7203_v57  ;;  %v7210_v7 = vcombine.high %v11855_v62, %v11854_v61  ;;  %v7212_v17 = vcombine.high %v11857_v28, %v11856_v3  ;;  %v7211_v4 = vcombine.low %v11857_v28, %v11856_v3 }
 0xa18   : > { %3139 = vadd.xlane.f32.xlu0 %v3125_v21  ;;  %v3126_v45 = vmul.f32 %v10013_v36, %v10013_v36  ;;  %3469 = vmatprep.subr.bf16.mxu0 %v7208_v33 }
 0xa19   : > { %3393 = vmatpush1.bf16.msra.mxu1 %v7197_v44 }
 0xa1a   : > { %3141 = vadd.xlane.f32.xlu1 %v3126_v45  ;;  %3394 = vmatprep.subr.bf16.mxu1 %v7202_v13 }
 0xa1b   : > { %3470 = vmatpush1.bf16.msra.mxu0 %v7207_v18 }
 0xa1c   : > { %3471 = vmatprep.subr.bf16.mxu0 %v7212_v17 }
 0xa1d   : > { %3395 = vmatpush1.bf16.msra.mxu1 %v7201_v59  ;;  %v11859_v59 = vld [vmem:[#allocation149_spill] sm:$0xff] }
 0xa1e   : > { %3396 = vmatprep.subr.bf16.mxu1 %v7206_v12  ;;  %v3190_v57 = vrot.slane %v11817_v23, %v11859_v59 }
 0xa1f   : > { %3472 = vmatpush1.bf16.msra.mxu0 %v7211_v4 }
 0xa21   : > { %3397 = vmatpush1.bf16.msra.mxu1 %v7205_v63 }
 0xa22   : > { %3398 = vmatprep.subr.bf16.mxu1 %v7210_v7 }
 0xa25   : > { %3399 = vmatpush1.bf16.msra.mxu1 %v7209_v24 }
 0xa8d   : > { %v3128_v37 = vpop.xlane.xlu0 %3127 }
 0xa8e   : > { %v3143_v46 = vmul.f32 0.0078125, %v3128_v37 }
 0xa8f   : > { %v3130_v53 = vpop.xlane.xlu1 %3129 }
 0xa90   : > { %v3151_v21 = vadd.f32 1e-12, %v3143_v46  ;;  %v3144_v45 = vmul.f32 0.0078125, %v3130_v53 }
 0xa91   : > { %v3132_v2 = vpop.xlane.xlu0 %3131 }
 0xa92   : > { %8396 = vrsqrt.f32 %v3151_v21  ;;  %v3152_v34 = vadd.f32 1e-12, %v3144_v45  ;;  %v3145_v42 = vmul.f32 0.0078125, %v3132_v2 }
 0xa94   : > { %8398 = vrsqrt.f32 %v3152_v34  ;;  %v3153_v35 = vadd.f32 1e-12, %v3145_v42 }
 0xa95   : > { %v3134_v40 = vpop.xlane.xlu1 %3133 }
 0xa96   : > { %8400 = vrsqrt.f32 %v3153_v35  ;;  %v3146_v47 = vmul.f32 0.0078125, %v3134_v40 }
 0xa98   : > { %v3154_v44 = vadd.f32 1e-12, %v3146_v47 }
 0xa9a   : > { %8402 = vrsqrt.f32 %v3154_v44 }
 0xa9c   : > { %v8397_v50 = vpop.eup %8396 }
 0xa9d   : > { %v3167_v13 = vmul.f32 %v8397_v50, %v9970_v43 }
 0xa9e   : > { %v8399_v1 = vpop.eup %8398 }
 0xa9f   : > { %v3168_v15 = vmul.f32 %v8399_v1, %v9972_v54  ;;  %v3179_v41 = vmul.f32 %v3178_v56, %v3167_v13 }
 0xaa0   : > { %v8401_v29 = vpop.eup %8400 }
 0xaa1   : > { %v3136_v8 = vpop.xlane.xlu0 %3135  ;;  %v3180_v12 = vmul.f32 %v3178_v56, %v3168_v15  ;;  %v10059_v33 = vadd.f32 %v3190_v57, %v3179_v41  ;;  %v3169_v18 = vmul.f32 %v8401_v29, %v9976_v39 }
 0xaa2   : > { %v3147_v0 = vmul.f32 0.0078125, %v3136_v8 }
 0xaa3   : > { %v3138_v11 = vpop.xlane.xlu1 %3137  ;;  %11860 = vst [vmem:[#allocation174_spill] sm:$0xff] %v10059_v33  ;;  %v10061_v63 = vadd.f32 %v3190_v57, %v3180_v12  ;;  %v3181_v4 = vmul.f32 %v3178_v56, %v3169_v18  ;;  %v11870_v18 = vld [vmem:[#allocation131_spill] sm:$0xff] }
 0xaa4   : > { %v8403_v61 = vpop.eup %8402  ;;  %v3155_v43 = vadd.f32 1e-12, %v3147_v0  ;;  %v3148_v62 = vmul.f32 0.0078125, %v3138_v11  ;;  %v11869_v0 = vld [vmem:[#allocation98_spill] sm:$0xff] }
 0xaa5   : > { %11861 = vst [vmem:[#allocation175_spill] sm:$0xff] %v10061_v63  ;;  %v3140_v7 = vpop.xlane.xlu0 %3139  ;;  %v3199_v54 = vpack.c.bf16 %v10061_v63, %v10059_v33  ;;  %v3170_v3 = vmul.f32 %v8403_v61, %v9982_v6  ;;  %v10071_v6 = vadd.f32 %v3190_v57, %v3181_v4  ;;  %v11871_v61 = vld [vmem:[#allocation130_spill] sm:$0xff]  ;;  %v11880_v4 = vld [vmem:[#allocation132_spill] sm:$0xff] }
 0xaa6   : > { %8404 = vrsqrt.f32 %v3155_v43  ;;  %v3156_v28 = vadd.f32 1e-12, %v3148_v62  ;;  %v3149_v17 = vmul.f32 0.0078125, %v3140_v7  ;;  %v7237_v43 = vcombine.low %v11871_v61, %v11870_v18  ;;  %v11873_v62 = vld [vmem:[#allocation82_spill] sm:$0xff]  ;;  %v11899_v18 = vld [vmem:[#allocation137_spill] sm:$0xff]  ;;  %v11900_v61 = vld [vmem:[#allocation136_spill] sm:$0xff] }
 0xaa7   : > { %v3142_v24 = vpop.xlane.xlu1 %3141  ;;  %3417 = vmatmul.mubr.bf16.vlgmr.msra.gmra.mrb[64].mxu1 %v3199_v54  ;;  %3490 = vmatmul.mubr.bf16.vlgmr.msra.gmra.mrb[72].mxu0 %v3199_v54  ;;  %v3182_v37 = vmul.f32 %v3178_v56, %v3170_v3  ;;  %11863 = vst [vmem:[#allocation177_spill] sm:$0xff] %v10071_v6  ;;  %v11874_v54 = vld [vmem:[#allocation115_spill] sm:$0xff] }
 0xaa8   : > { %8406 = vrsqrt.f32 %v3156_v28  ;;  %v3157_v46 = vadd.f32 1e-12, %v3149_v17  ;;  %v3150_v39 = vmul.f32 0.0078125, %v3142_v24  ;;  %3426 = vmatprep.mubr.bf16.mxu1 %v8688_v9  ;;  %3499 = vmatprep.mubr.bf16.mxu0 %v8688_v9  ;;  %v11878_v28 = vld [vmem:[#allocation100_spill] sm:$0xff]  ;;  %v11879_v24 = vld [vmem:[#allocation133_spill] sm:$0xff] }
 0xaa9   : > { %v10069_v53 = vadd.f32 %v3190_v57, %v3182_v37  ;;  %7557 = vmatprep.subr.bf16.mxu0 %v7237_v43  ;;  %v10110_v37 = vcombine.low %v11880_v4, %v11879_v24  ;;  %v11908_v24 = vld [vmem:[#allocation106_spill] sm:$0xff] }
 0xaaa   : > { %8408 = vrsqrt.f32 %v3157_v46  ;;  %v3158_v21 = vadd.f32 1e-12, %v3150_v39  ;;  %v11882_v46 = vld [vmem:[#allocation85_spill] sm:$0xff]  ;;  %v11883_v39 = vld [vmem:[#allocation84_spill] sm:$0xff] }
 0xaab   : > { %11862 = vst [vmem:[#allocation176_spill] sm:$0xff] %v10069_v53  ;;  %v3200_v45 = vpack.c.bf16 %v10069_v53, %v10071_v6  ;;  %11881 = vst [vmem:[#allocation183_spill] sm:$0xff] %v10110_v37 }
 0xaac   : > { %8410 = vrsqrt.f32 %v3158_v21  ;;  %v7214_v21 = vcombine.low %v11883_v39, %v11882_v46  ;;  %v11909_v46 = vld [vmem:[#allocation139_spill] sm:$0xff]  ;;  %v11910_v39 = vld [vmem:[#allocation138_spill] sm:$0xff] }
 0xaaf   : > { %3427 = vmatmul.mubr.bf16.gmra.mrb[68].mxu1 %v3200_v45  ;;  %3500 = vmatmul.mubr.bf16.gmra.mrb[76].mxu0 %v3200_v45  ;;  %v11884_v45 = vld [vmem:[#allocation117_spill] sm:$0xff] }
 0xab0   : > { %v8405_v2 = vpop.eup %8404  ;;  %3436 = vmatprep.mubr.bf16.mxu1 %v8688_v9  ;;  %3509 = vmatprep.mubr.bf16.mxu0 %v8688_v9 }
 0xab1   : > { %v3171_v34 = vmul.f32 %v8405_v2, %v9986_v16  ;;  %v11885_v2 = vld [vmem:[#allocation116_spill] sm:$0xff] }
 0xab2   : > { %v8407_v42 = vpop.eup %8406 }
 0xab3   : > { %v3172_v35 = vmul.f32 %v8407_v42, %v9996_v10  ;;  %v3183_v40 = vmul.f32 %v3178_v56, %v3171_v34  ;;  %v10116_v34 = vcombine.low %v11885_v2, %v11884_v45  ;;  %v11887_v42 = vld [vmem:[#allocation103_spill] sm:$0xff]  ;;  %v11913_v2 = vld [vmem:[#allocation90_spill] sm:$0xff] }
 0xab4   : > { %v8409_v47 = vpop.eup %8408  ;;  %v11912_v45 = vld [vmem:[#allocation91_spill] sm:$0xff] }
 0xab5   : > { %v3184_v44 = vmul.f32 %v3178_v56, %v3172_v35  ;;  %v10079_v13 = vadd.f32 %v3190_v57, %v3183_v40  ;;  %v3173_v15 = vmul.f32 %v8409_v47, %v10000_v48  ;;  %11886 = vst [vmem:[#allocation184_spill] sm:$0xff] %v10116_v34  ;;  %v11888_v35 = vld [vmem:[#allocation102_spill] sm:$0xff]  ;;  %v11889_v47 = vld [vmem:[#allocation135_spill] sm:$0xff] }
 0xab6   : > { %v8411_v50 = vpop.eup %8410  ;;  %v7223_v40 = vcombine.low %v11888_v35, %v11887_v42  ;;  %v7217_v42 = vcombine.low %v11913_v2, %v11912_v45  ;;  %v11914_v35 = vld [vmem:[#allocation123_spill] sm:$0xff]  ;;  %v11935_v2 = vld [vmem:[#allocation126_spill] sm:$0xff] }
 0xab7   : > { %11864 = vst [vmem:[#allocation178_spill] sm:$0xff] %v10079_v13  ;;  %v10081_v1 = vadd.f32 %v3190_v57, %v3184_v44  ;;  %v3174_v41 = vmul.f32 %v8411_v50, %v10013_v36  ;;  %v3185_v16 = vmul.f32 %v3178_v56, %v3173_v15  ;;  %v11868_v36 = vld [vmem:[#allocation99_spill] sm:$0xff]  ;;  %v11890_v44 = vld [vmem:[#allocation134_spill] sm:$0xff] }
 0xab8   : > { %v7221_v11 = vcombine.low %v11869_v0, %v11868_v36  ;;  %v10124_v50 = vcombine.low %v11890_v44, %v11889_v47  ;;  %v11892_v15 = vld [vmem:[#allocation87_spill] sm:$0xff]  ;;  %v11897_v36 = vld [vmem:[#allocation105_spill] sm:$0xff]  ;;  %v11898_v0 = vld [vmem:[#allocation104_spill] sm:$0xff] }
 0xab9   : > { %11865 = vst [vmem:[#allocation179_spill] sm:$0xff] %v10081_v1  ;;  %v3201_v29 = vpack.c.bf16 %v10081_v1, %v10079_v13  ;;  %v3186_v8 = vmul.f32 %v3178_v56, %v3174_v41  ;;  %v10091_v12 = vadd.f32 %v3190_v57, %v3185_v16  ;;  %v11872_v56 = vld [vmem:[#allocation83_spill] sm:$0xff]  ;;  %v11893_v41 = vld [vmem:[#allocation86_spill] sm:$0xff]  ;;  %v11917_v44 = vld [vmem:[#allocation109_spill] sm:$0xff] }
 0xaba   : > { %v7213_v7 = vcombine.low %v11873_v62, %v11872_v56  ;;  %7517 = vmatprep.subr.bf16.mxu1 %v7221_v11  ;;  %11891 = vst [vmem:[#allocation185_spill] sm:$0xff] %v10124_v50  ;;  %v11895_v16 = vld [vmem:[#allocation118_spill] sm:$0xff]  ;;  %v7224_v11 = vcombine.low %v11898_v0, %v11897_v36  ;;  %v10138_v56 = vcombine.low %v11900_v61, %v11899_v18  ;;  %v11902_v62 = vld [vmem:[#allocation89_spill] sm:$0xff]  ;;  %v11923_v0 = vld [vmem:[#allocation92_spill] sm:$0xff] }
 0xabb   : > { %3437 = vmatmul.mubr.bf16.gmra.mrb[72].mxu1 %v3201_v29  ;;  %3510 = vmatmul.mubr.bf16.gmra.mrb[80].mxu0 %v3201_v29  ;;  %v10089_v10 = vadd.f32 %v3190_v57, %v3186_v8  ;;  %11867 = vst [vmem:[#allocation181_spill] sm:$0xff] %v10091_v12  ;;  %v11877_v57 = vld [vmem:[#allocation101_spill] sm:$0xff]  ;;  %v7215_v29 = vcombine.low %v11893_v41, %v11892_v15  ;;  %v11894_v8 = vld [vmem:[#allocation119_spill] sm:$0xff]  ;;  %v11918_v15 = vld [vmem:[#allocation108_spill] sm:$0xff] }
 0xabc   : > { %3446 = vmatprep.mubr.bf16.mxu1 %v8688_v9  ;;  %3519 = vmatprep.mubr.bf16.mxu0 %v8688_v9  ;;  %v11875_v9 = vld [vmem:[#allocation114_spill] sm:$0xff]  ;;  %v7222_v17 = vcombine.low %v11878_v28, %v11877_v57  ;;  %11901 = vst [vmem:[#allocation187_spill] sm:$0xff] %v10138_v56  ;;  %v11905_v57 = vld [vmem:[#allocation120_spill] sm:$0xff]  ;;  %v7226_v41 = vcombine.low %v11918_v15, %v11917_v44  ;;  %v11922_v36 = vld [vmem:[#allocation93_spill] sm:$0xff] }
 0xabd   : > { %11866 = vst [vmem:[#allocation180_spill] sm:$0xff] %v10089_v10  ;;  %v3202_v48 = vpack.c.bf16 %v10089_v10, %v10091_v12  ;;  %v10103_v3 = vcombine.low %v11875_v9, %v11874_v54  ;;  %7518 = vmatpush3.bf16.msra.mxu1 %v7213_v7  ;;  %v11903_v7 = vld [vmem:[#allocation88_spill] sm:$0xff]  ;;  %v11904_v9 = vld [vmem:[#allocation121_spill] sm:$0xff]  ;;  %v11934_v45 = vld [vmem:[#allocation127_spill] sm:$0xff] }
 0xabe   : > { %7519 = vmatprep.subr.bf16.mxu1 %v7222_v17  ;;  %v7216_v54 = vcombine.low %v11903_v7, %v11902_v62  ;;  %v10144_v28 = vcombine.low %v11905_v57, %v11904_v9  ;;  %v11907_v17 = vld [vmem:[#allocation107_spill] sm:$0xff]  ;;  %v11924_v18 = vld [vmem:[#allocation125_spill] sm:$0xff]  ;;  %v11925_v61 = vld [vmem:[#allocation124_spill] sm:$0xff] }
 0xabf   : > { %11876 = vst [vmem:[#allocation182_spill] sm:$0xff] %v10103_v3  ;;  %7558 = vmatpush3.bf16.msra.mxu0 %v10103_v3  ;;  %v7225_v4 = vcombine.low %v11908_v24, %v11907_v17  ;;  %v10172_v62 = vcombine.low %v11925_v61, %v11924_v18  ;;  %v11927_v7 = vld [vmem:[#allocation111_spill] sm:$0xff]  ;;  %v11930_v17 = vld [vmem:[#allocation142_spill] sm:$0xff]  ;;  %v11939_v15 = vld [vmem:[#allocation145_spill] sm:$0xff] }
 0xac0   : > { %7559 = vmatprep.subr.bf16.mxu0 %v10110_v37  ;;  %11906 = vst [vmem:[#allocation188_spill] sm:$0xff] %v10144_v28  ;;  %v11929_v57 = vld [vmem:[#allocation143_spill] sm:$0xff]  ;;  %v11945_v18 = vld [vmem:[#allocation128_spill] sm:$0xff] }
 0xac1   : > { %7520 = vmatpush3.bf16.msra.mxu1 %v7214_v21  ;;  %v10152_v21 = vcombine.low %v11910_v39, %v11909_v46  ;;  %11926 = vst [vmem:[#allocation192_spill] sm:$0xff] %v10172_v62  ;;  %v10180_v24 = vcombine.low %v11930_v17, %v11929_v57  ;;  %v11933_v46 = vld [vmem:[#allocation94_spill] sm:$0xff] }
 0xac2   : > { %7521 = vmatprep.subr.bf16.mxu1 %v7223_v40  ;;  %v11915_v40 = vld [vmem:[#allocation122_spill] sm:$0xff] }
 0xac3   : > { %3447 = vmatmul.mubr.bf16.gmra.mrb[76].mxu1 %v3202_v48  ;;  %3520 = vmatmul.mubr.bf16.gmra.mrb[84].mxu0 %v3202_v48  ;;  %v10131_v48 = vcombine.low %v11895_v16, %v11894_v8  ;;  %11911 = vst [vmem:[#allocation189_spill] sm:$0xff] %v10152_v21  ;;  %v10158_v47 = vcombine.low %v11915_v40, %v11914_v35  ;;  %v11920_v8 = vld [vmem:[#allocation140_spill] sm:$0xff]  ;;  %11931 = vst [vmem:[#allocation193_spill] sm:$0xff] %v10180_v24  ;;  %v11937_v35 = vld [vmem:[#allocation113_spill] sm:$0xff] }
 0xac4   : > { %7560 = vmatpush3.bf16.msra.mxu0 %v10116_v34  ;;  %v11938_v40 = vld [vmem:[#allocation112_spill] sm:$0xff] }
 0xac5   : > { %7561 = vmatprep.subr.bf16.mxu0 %v10124_v50  ;;  %11896 = vst [vmem:[#allocation186_spill] sm:$0xff] %v10131_v48  ;;  %7522 = vmatpush3.bf16.msra.mxu1 %v7215_v29  ;;  %11916 = vst [vmem:[#allocation190_spill] sm:$0xff] %v10158_v47  ;;  %v11919_v29 = vld [vmem:[#allocation141_spill] sm:$0xff]  ;;  %v7228_v44 = vcombine.low %v11938_v40, %v11937_v35 }
 0xac6   : > { %7523 = vmatprep.subr.bf16.mxu1 %v7224_v11  ;;  %v10166_v16 = vcombine.low %v11920_v8, %v11919_v29  ;;  %v7218_v11 = vcombine.low %v11923_v0, %v11922_v36  ;;  %v11942_v8 = vld [vmem:[#allocation97_spill] sm:$0xff]  ;;  %v11943_v36 = vld [vmem:[#allocation96_spill] sm:$0xff] }
 0xac7   : > { %v7220_v0 = vcombine.low %v11943_v36, %v11942_v8 }
 0xac8   : > { %7562 = vmatpush3.bf16.msra.mxu0 %v10131_v48  ;;  %11921 = vst [vmem:[#allocation191_spill] sm:$0xff] %v10166_v16 }
 0xac9   : > { %7563 = vmatprep.subr.bf16.mxu0 %v10138_v56  ;;  %7524 = vmatpush3.bf16.msra.mxu1 %v7216_v54  ;;  %v11928_v54 = vld [vmem:[#allocation110_spill] sm:$0xff] }
 0xaca   : > { %7525 = vmatprep.subr.bf16.mxu1 %v7225_v4  ;;  %v7227_v9 = vcombine.low %v11928_v54, %v11927_v7  ;;  %v11932_v4 = vld [vmem:[#allocation95_spill] sm:$0xff]  ;;  %v11947_v7 = vld [vmem:[#allocation146_spill] sm:$0xff] }
 0xacb   : > { %v7219_v39 = vcombine.low %v11933_v46, %v11932_v4  ;;  %v11582_v54 = vsub.s32 3, %v11947_v7 }
 0xacc   : > { %7564 = vmatpush3.bf16.msra.mxu0 %v10144_v28 }
 0xacd   : > { %7565 = vmatprep.subr.bf16.mxu0 %v10152_v21  ;;  %7526 = vmatpush3.bf16.msra.mxu1 %v7217_v42  ;;  %v10186_v42 = vcombine.low %v11935_v2, %v11934_v45 }
 0xace   : > { %7527 = vmatprep.subr.bf16.mxu1 %v7226_v41  ;;  %v11940_v41 = vld [vmem:[#allocation144_spill] sm:$0xff] }
 0xacf   : > { %11936 = vst [vmem:[#allocation194_spill] sm:$0xff] %v10186_v42  ;;  %v10194_v29 = vcombine.low %v11940_v41, %v11939_v15 }
 0xad0   : > { %7566 = vmatpush3.bf16.msra.mxu0 %v10158_v47 }
 0xad1   : > { %7567 = vmatprep.subr.bf16.mxu0 %v10166_v16  ;;  %7528 = vmatpush3.bf16.msra.mxu1 %v7218_v11  ;;  %11941 = vst [vmem:[#allocation195_spill] sm:$0xff] %v10194_v29  ;;  %v11944_v11 = vld [vmem:[#allocation129_spill] sm:$0xff] }
 0xad2   : > { %7529 = vmatprep.subr.bf16.mxu1 %v7227_v9  ;;  %v10200_v61 = vcombine.low %v11945_v18, %v11944_v11  ;;  %v11948_v9 = vld [vmem:[#allocation81_spill] sm:$0xff] }
 0xad3   : > { %v10207_v57 = vrot.slane %v11948_v9, %v11816_v19  ;;  %v10211_v17 = vrot.slane %v11948_v9, %v11859_v59  ;;  %v10215_v4 = vrot.slane %v11948_v9, %v11858_v38  ;;  %v10220_v46 = vrot.slane %v11948_v9, %v11582_v54 }
 0xad4   : > { %7568 = vmatpush3.bf16.msra.mxu0 %v10172_v62  ;;  %11946 = vst [vmem:[#allocation196_spill] sm:$0xff] %v10200_v61 }
 0xad5   : > { %7569 = vmatprep.subr.bf16.mxu0 %v10180_v24  ;;  %7530 = vmatpush3.bf16.msra.mxu1 %v7219_v39 }
 0xad6   : > { %7531 = vmatprep.subr.bf16.mxu1 %v7228_v44 }
 0xad8   : > { %7570 = vmatpush3.bf16.msra.mxu0 %v10186_v42 }
 0xad9   : > { %7571 = vmatprep.subr.bf16.mxu0 %v10194_v29  ;;  %7532 = vmatpush3.bf16.msra.mxu1 %v7220_v0 }
 0xada   : > { %8166 = vmatprep.subr.bf16.mxu1 %v7237_v43 }
 0xadc   : > { %7572 = vmatpush3.bf16.msra.mxu0 %v10200_v61 }
 0xb7a   : > { %v3418_v43 = vpop.f32.mrb[64].mxu1  ;;  %v3491_v39 = vpop.f32.mrb[72].mxu0 }
 0xb7b   : > { %v3419_v45 = vadd.f32 %v3418_v43, %v10207_v57  ;;  %v3492_v19 = vadd.f32 %v3491_v39, %v10211_v17  ;;  %v3420_v2 = vpop.f32.mrb[65].mxu1  ;;  %v3493_v35 = vpop.f32.mrb[73].mxu0 }
 0xb7c   : > { %v10225_v59 = vadd.f32 %v3420_v2, %v10215_v4  ;;  %v10228_v40 = vadd.f32 %v3493_v35, %v10220_v46  ;;  %v3422_v38 = vpop.f32.mrb[66].mxu1  ;;  %v3495_v44 = vpop.f32.mrb[74].mxu0 }
 0xb7d   : > { %v3562_v15 = vmul.f32 0.044715, %v3419_v45  ;;  %v3564_v41 = vmul.f32 0.044715, %v3492_v19  ;;  %v3423_v0 = vadd.f32 %v3422_v38, %v10207_v57  ;;  %v3496_v11 = vadd.f32 %v3495_v44, %v10211_v17  ;;  %v3424_v18 = vpop.f32.mrb[67].mxu1  ;;  %v3497_v9 = vpop.f32.mrb[75].mxu0 }
 0xb7e   : > { %v3563_v8 = vmul.f32 0.044715, %v10225_v59  ;;  %v3565_v36 = vmul.f32 0.044715, %v10228_v40  ;;  %v10235_v2 = vadd.f32 %v3424_v18, %v10215_v4  ;;  %v10238_v54 = vadd.f32 %v3497_v9, %v10220_v46 }
 0xb7f   : > { %v3594_v43 = vmul.f32 %v3562_v15, %v3419_v45  ;;  %v3596_v39 = vmul.f32 %v3564_v41, %v3492_v19  ;;  %v3566_v35 = vmul.f32 0.044715, %v3423_v0  ;;  %v3568_v31 = vmul.f32 0.044715, %v3496_v11 }
 0xb80   : > { %v10240_v20 = vmul.f32 0.5, %v3419_v45  ;;  %v3595_v38 = vmul.f32 %v3563_v8, %v10225_v59  ;;  %v3597_v44 = vmul.f32 %v3565_v36, %v10228_v40  ;;  %v3567_v26 = vmul.f32 0.044715, %v10235_v2 }
 0xb81   : > { %v3626_v32 = vmul.f32 %v3594_v43, %v3419_v45  ;;  %v3628_v14 = vmul.f32 %v3596_v39, %v3492_v19  ;;  %v3598_v27 = vmul.f32 %v3566_v35, %v3423_v0  ;;  %v3600_v18 = vmul.f32 %v3568_v31, %v3496_v11 }
 0xb82   : > { %v3428_v30 = vpop.f32.mrb[68].mxu1  ;;  %v3501_v15 = vpop.f32.mrb[76].mxu0  ;;  %v3569_v43 = vmul.f32 0.044715, %v10238_v54  ;;  %v10252_v51 = vmul.f32 0.5, %v3492_v19  ;;  %v10256_v31 = vmul.f32 0.5, %v3496_v11  ;;  %v3599_v22 = vmul.f32 %v3567_v26, %v10235_v2 }
 0xb83   : > { %v3658_v41 = vadd.f32 %v3626_v32, %v3419_v45  ;;  %v3660_v25 = vadd.f32 %v3628_v14, %v3492_v19  ;;  %v3430_v52 = vpop.f32.mrb[69].mxu1  ;;  %v3503_v9 = vpop.f32.mrb[77].mxu0  ;;  %v3630_v49 = vmul.f32 %v3598_v27, %v3423_v0  ;;  %v10247_v39 = vadd.f32 %v3428_v30, %v10207_v57 }
 0xb84   : > { %v10250_v8 = vadd.f32 %v3501_v15, %v10211_v17  ;;  %v3432_v36 = vpop.f32.mrb[70].mxu1  ;;  %v3505_v35 = vpop.f32.mrb[78].mxu0  ;;  %v10254_v32 = vmul.f32 0.5, %v3423_v0  ;;  %v3632_v14 = vmul.f32 %v3600_v18, %v3496_v11  ;;  %v10262_v19 = vadd.f32 %v3430_v52, %v10215_v4 }
 0xb85   : > { %v3434_v45 = vpop.f32.mrb[71].mxu1  ;;  %v3507_v60 = vpop.f32.mrb[79].mxu0  ;;  %v3690_v27 = vmul.f32 0.7978846, %v3658_v41  ;;  %v3662_v55 = vadd.f32 %v3630_v49, %v3423_v0  ;;  %v3570_v58 = vmul.f32 0.044715, %v10247_v39  ;;  %v3627_v10 = vmul.f32 %v3595_v38, %v10225_v59 }
 0xb86   : > { %v3572_v30 = vmul.f32 0.044715, %v10250_v8  ;;  %v3692_v5 = vmul.f32 0.7978846, %v3660_v25  ;;  %v3664_v15 = vadd.f32 %v3632_v14, %v3496_v11  ;;  %v10266_v12 = vmul.f32 %v3597_v44, %v10228_v40 }
 0xb87   : > { %v3694_v18 = vmul.f32 0.7978846, %v3662_v55  ;;  %v3601_v41 = vmul.f32 %v3569_v43, %v10238_v54  ;;  %v3602_v49 = vmul.f32 %v3570_v58, %v10247_v39  ;;  %v3571_v0 = vmul.f32 0.044715, %v10262_v19 }
 0xb88   : > { %v10272_v25 = vadd.f32 %v3503_v9, %v10220_v46  ;;  %v10275_v26 = vadd.f32 %v3432_v36, %v10207_v57  ;;  %8412 = vtanh.f32 %v3690_v27  ;;  %v3696_v52 = vmul.f32 0.7978846, %v3664_v15 }
 0xb89   : > { %v3604_v11 = vmul.f32 %v3572_v30, %v10250_v8  ;;  %v10279_v38 = vadd.f32 %v3505_v35, %v10211_v17  ;;  %8414 = vtanh.f32 %v3692_v5  ;;  %v10282_v55 = vmul.f32 %v3599_v22, %v10235_v2 }
 0xb8a   : > { %v3603_v58 = vmul.f32 %v3571_v0, %v10262_v19  ;;  %v3573_v44 = vmul.f32 0.044715, %v10272_v25  ;;  %v3574_v9 = vmul.f32 0.044715, %v10275_v26  ;;  %v10289_v36 = vadd.f32 %v3434_v45, %v10215_v4 }
 0xb8b   : > { %11949 = vst [vmem:[#allocation197_spill] sm:$0xff] %v10279_v38  ;;  %v3576_v43 = vmul.f32 0.044715, %v10279_v38  ;;  %v10292_v14 = vadd.f32 %v3507_v60, %v10220_v46  ;;  %8416 = vtanh.f32 %v3694_v18  ;;  %v10295_v5 = vmul.f32 %v3601_v41, %v10238_v54 }
 0xb8c   : > { %v10298_v22 = vmul.f32 %v3602_v49, %v10247_v39  ;;  %v10301_v35 = vmul.f32 0.5, %v10225_v59  ;;  %8418 = vtanh.f32 %v3696_v52  ;;  %v10304_v27 = vmul.f32 %v3604_v11, %v10250_v8 }
 0xb8d   : > { %v3575_v45 = vmul.f32 0.044715, %v10289_v36  ;;  %v3577_v30 = vmul.f32 0.044715, %v10292_v14  ;;  %v10309_v18 = vmul.f32 %v3603_v58, %v10262_v19  ;;  %v3605_v41 = vmul.f32 %v3573_v44, %v10272_v25 }
 0xb8e   : > { %11950 = vst [vmem:[#allocation198_spill] sm:$0xff] %v10301_v35  ;;  %v3438_v60 = vpop.f32.mrb[72].mxu1  ;;  %v3511_v15 = vpop.f32.mrb[80].mxu0  ;;  %v3606_v11 = vmul.f32 %v3574_v9, %v10275_v26  ;;  %v3608_v13 = vmul.f32 %v3576_v43, %v10279_v38  ;;  %v10322_v58 = vmul.f32 0.5, %v10235_v2  ;;  %v10329_v23 = vadd.f32 %v3627_v10, %v10225_v59 }
 0xb8f   : > { %v10313_v49 = vadd.f32 %v3438_v60, %v10207_v57  ;;  %v3512_v0 = vadd.f32 %v3511_v15, %v10211_v17  ;;  %v3440_v52 = vpop.f32.mrb[73].mxu1  ;;  %v3513_v1 = vpop.f32.mrb[81].mxu0  ;;  %v3607_v9 = vmul.f32 %v3575_v45, %v10289_v36  ;;  %v3609_v43 = vmul.f32 %v3577_v30, %v10292_v14 }
 0xb90   : > { %v10319_v53 = vadd.f32 %v3440_v52, %v10215_v4  ;;  %v3442_v6 = vpop.f32.mrb[74].mxu1  ;;  %v3515_v63 = vpop.f32.mrb[82].mxu0  ;;  %11953 = vst [vmem:[#allocation201_spill] sm:$0xff] %v10322_v58  ;;  %v10326_v33 = vadd.f32 %v3513_v1, %v10220_v46  ;;  %v10338_v29 = vmul.f32 %v3605_v41, %v10272_v25  ;;  %v10345_v59 = vmul.f32 %v3606_v11, %v10275_v26 }
 0xb91   : > { %11951 = vst [vmem:[#allocation199_spill] sm:$0xff] %v10313_v49  ;;  %v3578_v44 = vmul.f32 0.044715, %v10313_v49  ;;  %v3580_v60 = vmul.f32 0.044715, %v3512_v0  ;;  %v3444_v15 = vpop.f32.mrb[75].mxu1  ;;  %v10335_v7 = vadd.f32 %v3442_v6, %v10207_v57  ;;  %v3516_v24 = vadd.f32 %v3515_v63, %v10211_v17 }
 0xb92   : > { %11952 = vst [vmem:[#allocation200_spill] sm:$0xff] %v10319_v53  ;;  %v3579_v52 = vmul.f32 0.044715, %v10319_v53  ;;  %v3517_v61 = vpop.f32.mrb[83].mxu0  ;;  %v3581_v1 = vmul.f32 0.044715, %v10326_v33  ;;  %v10342_v10 = vpop.eup %8412  ;;  %v10349_v30 = vadd.f32 %v3444_v15, %v10215_v4  ;;  %v10363_v11 = vmul.f32 %v3607_v9, %v10289_v36 }
 0xb93   : > { %v3612_v42 = vmul.f32 %v3580_v60, %v3512_v0  ;;  %v3610_v45 = vmul.f32 %v3578_v44, %v10313_v49  ;;  %v10352_v6 = vadd.f32 %v3517_v61, %v10220_v46  ;;  %v10354_v41 = vpop.eup %8414  ;;  %v10357_v60 = vmul.f32 %v3608_v13, %v10279_v38 }
 0xb94   : > { %v10359_v62 = vmul.f32 0.5, %v3512_v0  ;;  %v3611_v16 = vmul.f32 %v3579_v52, %v10319_v53  ;;  %v10366_v44 = vmul.f32 %v3609_v43, %v10292_v14  ;;  %v3582_v15 = vmul.f32 0.044715, %v10335_v7 }
 0xb95   : > { %11954 = vst [vmem:[#allocation202_spill] sm:$0xff] %v10357_v60  ;;  %v3644_v63 = vmul.f32 %v3612_v42, %v3512_v0  ;;  %v3584_v61 = vmul.f32 0.044715, %v3516_v24  ;;  %v10369_v28 = vpop.eup %8416  ;;  %v3613_v56 = vmul.f32 %v3581_v1, %v10326_v33  ;;  %v3583_v42 = vmul.f32 0.044715, %v10349_v30 }
 0xb96   : > { %11955 = vst [vmem:[#allocation203_spill] sm:$0xff] %v10359_v62  ;;  %v3448_v47 = vpop.f32.mrb[76].mxu1  ;;  %v3521_v21 = vpop.f32.mrb[84].mxu0  ;;  %v10377_v43 = vmul.f32 %v3610_v45, %v10313_v49  ;;  %v3585_v34 = vmul.f32 0.044715, %v10352_v6  ;;  %v10384_v1 = vmul.f32 %v3611_v16, %v10319_v53  ;;  %v10386_v3 = vmul.f32 0.5, %v3516_v24 }
 0xb97   : > { %v3676_v13 = vadd.f32 %v3644_v63, %v3512_v0  ;;  %v10374_v52 = vadd.f32 %v3448_v47, %v10207_v57  ;;  %v3450_v9 = vpop.f32.mrb[77].mxu1  ;;  %v3523_v62 = vpop.f32.mrb[85].mxu0  ;;  %v3616_v50 = vmul.f32 %v3584_v61, %v3516_v24  ;;  %v10381_v37 = vadd.f32 %v3521_v21, %v10211_v17 }
 0xb98   : > { %v8419_v48 = vpop.eup %8418  ;;  %11956 = vst [vmem:[#allocation204_spill] sm:$0xff] %v10377_v43  ;;  %v3452_v0 = vpop.f32.mrb[78].mxu1  ;;  %11957 = vst [vmem:[#allocation205_spill] sm:$0xff] %v10384_v1  ;;  %v10390_v58 = vadd.f32 %v3450_v9, %v10215_v4  ;;  %v3614_v61 = vmul.f32 %v3582_v15, %v10335_v7  ;;  %v10395_v35 = vadd.f32 %v3523_v62, %v10220_v46 }
 0xb99   : > { %v3525_v63 = vpop.f32.mrb[86].mxu0  ;;  %11958 = vst [vmem:[#allocation206_spill] sm:$0xff] %v10386_v3  ;;  %v3586_v47 = vmul.f32 0.044715, %v10374_v52  ;;  %v3454_v45 = vpop.f32.mrb[79].mxu1  ;;  %v3648_v49 = vmul.f32 %v3616_v50, %v3516_v24  ;;  %v10398_v16 = vmul.f32 %v3613_v56, %v10326_v33  ;;  %v3615_v3 = vmul.f32 %v3583_v42, %v10349_v30 }
 0xb9a   : > { %v3527_v43 = vpop.f32.mrb[87].mxu0  ;;  %v3588_v21 = vmul.f32 0.044715, %v10381_v37  ;;  %v3708_v60 = vmul.f32 0.7978846, %v3676_v13  ;;  %v3617_v53 = vmul.f32 %v3585_v34, %v10352_v6  ;;  %v10405_v50 = vadd.f32 %v3452_v0, %v10207_v57 }
 0xb9b   : > { %v3587_v1 = vmul.f32 0.044715, %v10390_v58  ;;  %v3680_v9 = vadd.f32 %v3648_v49, %v3516_v24  ;;  %v3589_v38 = vmul.f32 0.044715, %v10395_v35  ;;  %v3618_v15 = vmul.f32 %v3586_v47, %v10374_v52 }
 0xb9c   : > { %v3620_v62 = vmul.f32 %v3588_v21, %v10381_v37  ;;  %v10410_v13 = vadd.f32 %v3525_v63, %v10211_v17  ;;  %v10413_v56 = vadd.f32 %v3454_v45, %v10215_v4  ;;  %v10416_v42 = vmul.f32 %v3614_v61, %v10335_v7 }
 0xb9d   : > { %v3712_v24 = vmul.f32 0.7978846, %v3680_v9  ;;  %v3619_v34 = vmul.f32 %v3587_v1, %v10390_v58  ;;  %v3590_v49 = vmul.f32 0.044715, %v10405_v50  ;;  %v3621_v57 = vmul.f32 %v3589_v38, %v10395_v35 }
 0xb9e   : > { %v3592_v0 = vmul.f32 0.044715, %v10410_v13  ;;  %v3591_v47 = vmul.f32 0.044715, %v10413_v56  ;;  %v10424_v17 = vadd.f32 %v3527_v43, %v10220_v46  ;;  %8420 = vtanh.f32 %v3708_v60 }
 0xb9f   : > { %v10427_v4 = vmul.f32 %v3615_v3, %v10349_v30  ;;  %v10430_v63 = vmul.f32 %v3617_v53, %v10352_v6  ;;  %v3663_v1 = vadd.f32 %v10282_v55, %v10235_v2  ;;  %v10435_v45 = vmul.f32 %v3618_v15, %v10374_v52 }
 0xba0   : > { %v10438_v38 = vmul.f32 %v3620_v62, %v10381_v37  ;;  %v3622_v61 = vmul.f32 %v3590_v49, %v10405_v50  ;;  %v3691_v46 = vmul.f32 0.7978846, %v10329_v23  ;;  %8422 = vtanh.f32 %v3712_v24 }
 0xba1   : > { %v10443_v3 = vmul.f32 %v3619_v34, %v10390_v58  ;;  %v3593_v53 = vmul.f32 0.044715, %v10424_v17  ;;  %v3695_v60 = vmul.f32 0.7978846, %v3663_v1  ;;  %v10447_v43 = vmul.f32 %v3621_v57, %v10395_v35 }
 0xba2   : > { %v3624_v2 = vmul.f32 %v3592_v0, %v10410_v13  ;;  %v3623_v55 = vmul.f32 %v3591_v47, %v10413_v56  ;;  %8424 = vtanh.f32 %v3691_v46  ;;  %v3661_v21 = vadd.f32 %v10266_v12, %v10228_v40 }
 0xba3   : > { %8426 = vtanh.f32 %v3695_v60  ;;  %v3665_v23 = vadd.f32 %v10295_v5, %v10238_v54  ;;  %v3754_v9 = vadd.f32 1.0, %v10342_v10  ;;  %v10457_v15 = vmul.f32 %v3622_v61, %v10405_v50 }
 0xba4   : > { %v3758_v62 = vadd.f32 1.0, %v10369_v28  ;;  %v3756_v24 = vadd.f32 1.0, %v10354_v41  ;;  %v3760_v34 = vadd.f32 1.0, %v8419_v48  ;;  %v3625_v49 = vmul.f32 %v3593_v53, %v10424_v17 }
 0xba5   : > { %v10463_v57 = vmul.f32 0.5, %v10228_v40  ;;  %v3693_v0 = vmul.f32 0.7978846, %v3661_v21  ;;  %v3697_v12 = vmul.f32 0.7978846, %v3665_v23  ;;  %v10466_v47 = vmul.f32 %v3754_v9, %v10240_v20 }
 0xba6   : > { %v10469_v5 = vmul.f32 %v3758_v62, %v10254_v32  ;;  %v10472_v10 = vmul.f32 %v3756_v24, %v10252_v51  ;;  %v10475_v28 = vmul.f32 %v3760_v34, %v10256_v31  ;;  %v10478_v48 = vmul.f32 0.5, %v10238_v54  ;;  %v11959_v34 = vld [vmem:[#allocation197_spill] sm:$0xff] }
 0xba7   : > { %8428 = vtanh.f32 %v3693_v0  ;;  %v3667_v40 = vadd.f32 %v10309_v18, %v10262_v19  ;;  %v3671_v20 = vadd.f32 %v10363_v11, %v10289_v36  ;;  %v10485_v41 = vmul.f32 %v3624_v2, %v10410_v13 }
 0xba8   : > { %8430 = vtanh.f32 %v3697_v12  ;;  %v3818_v51 = vpack.c.bf16 %v10469_v5, %v10466_v47  ;;  %v3820_v32 = vpack.c.bf16 %v10475_v28, %v10472_v10  ;;  %v10491_v31 = vpop.eup %8420  ;;  %v3669_v18 = vadd.f32 %v10338_v29, %v10272_v25 }
 0xba9   : > { %v3699_v54 = vmul.f32 0.7978846, %v3667_v40  ;;  %v3703_v1 = vmul.f32 0.7978846, %v3671_v20  ;;  %v3673_v11 = vadd.f32 %v10366_v44, %v10292_v14  ;;  %v3655_v61 = vmul.f32 %v3623_v55, %v10413_v56 }
 0xbaa   : > { %v10499_v46 = vmul.f32 %v3625_v49, %v10424_v17  ;;  %v3666_v53 = vadd.f32 %v10298_v22, %v10247_v39  ;;  %v3670_v60 = vadd.f32 %v10345_v59, %v10275_v26  ;;  %v10505_v2 = vpop.eup %8422  ;;  %v10508_v21 = vmul.f32 0.5, %v10262_v19  ;;  %v11960_v49 = vld [vmem:[#allocation202_spill] sm:$0xff] }
 0xbab   : > { %8432 = vtanh.f32 %v3699_v54  ;;  %v3701_v29 = vmul.f32 0.7978846, %v3669_v18  ;;  %v3705_v23 = vmul.f32 0.7978846, %v3673_v11  ;;  %v10511_v55 = vmul.f32 0.5, %v10289_v36  ;;  %v11961_v36 = vld [vmem:[#allocation198_spill] sm:$0xff] }
 0xbac   : > { %v8425_v44 = vpop.eup %8424  ;;  %8434 = vtanh.f32 %v3703_v1  ;;  %v3698_v9 = vmul.f32 0.7978846, %v3666_v53  ;;  %v3702_v62 = vmul.f32 0.7978846, %v3670_v60  ;;  %v3668_v59 = vadd.f32 %v10304_v27, %v10250_v8  ;;  %v11962_v54 = vld [vmem:[#allocation201_spill] sm:$0xff]  ;;  %v11963_v18 = vld [vmem:[#allocation200_spill] sm:$0xff] }
 0xbad   : > { %v8427_v24 = vpop.eup %8426  ;;  %v3755_v22 = vadd.f32 1.0, %v8425_v44  ;;  %8436 = vtanh.f32 %v3701_v29  ;;  %v3672_v19 = vadd.f32 %v11960_v49, %v11959_v34  ;;  %v3541_v12 = vmul.f32 0.5, %v10272_v25  ;;  %v11964_v27 = vld [vmem:[#allocation205_spill] sm:$0xff]  ;;  %v11965_v29 = vld [vmem:[#allocation199_spill] sm:$0xff] }
 0xbae   : > { %v3759_v0 = vadd.f32 1.0, %v8427_v24  ;;  %v10519_v47 = vmul.f32 0.5, %v10292_v14  ;;  %8438 = vtanh.f32 %v3705_v23  ;;  %v3700_v40 = vmul.f32 0.7978846, %v3668_v59  ;;  %v11966_v23 = vld [vmem:[#allocation204_spill] sm:$0xff] }
 0xbaf   : > { %v3787_v5 = vmul.f32 %v3755_v22, %v11961_v36  ;;  %8440 = vtanh.f32 %v3698_v9  ;;  %v3704_v20 = vmul.f32 0.7978846, %v3672_v19  ;;  %v3675_v11 = vadd.f32 %v11964_v27, %v11963_v18 }
 0xbb0   : > { %v3791_v1 = vmul.f32 %v3759_v0, %v11962_v54  ;;  %8442 = vtanh.f32 %v3702_v62  ;;  %v3679_v53 = vadd.f32 %v10427_v4, %v10349_v30  ;;  %v3538_v25 = vmul.f32 0.5, %v10247_v39  ;;  %v11967_v54 = vld [vmem:[#allocation182_spill] sm:$0xff] }
 0xbb1   : > { %v8429_v60 = vpop.eup %8428  ;;  %v10529_v14 = vmul.f32 0.5, %v10275_v26  ;;  %8444 = vtanh.f32 %v3700_v40  ;;  %v3674_v44 = vadd.f32 %v11966_v23, %v11965_v29  ;;  %v3707_v62 = vmul.f32 0.7978846, %v3675_v11 }
 0xbb2   : > { %v8431_v9 = vpop.eup %8430  ;;  %v3819_v24 = vpack.c.bf16 %v3791_v1, %v3787_v5  ;;  %v3757_v22 = vadd.f32 1.0, %v8429_v60  ;;  %8446 = vtanh.f32 %v3704_v20  ;;  %v3711_v49 = vmul.f32 0.7978846, %v3679_v53 }
 0xbb3   : > { %v3761_v59 = vadd.f32 1.0, %v8431_v9  ;;  %v3678_v4 = vadd.f32 %v10416_v42, %v10335_v7  ;;  %v3706_v19 = vmul.f32 0.7978846, %v3674_v44  ;;  %v3540_v26 = vmul.f32 0.5, %v10250_v8 }
 0xbb4   : > { %4062 = vmatprep.mubr.bf16.mxu1 %v3819_v24  ;;  %v3789_v39 = vmul.f32 %v3757_v22, %v10463_v57  ;;  %v10538_v0 = vmul.f32 0.5, %v11959_v34  ;;  %8448 = vtanh.f32 %v3707_v62  ;;  %v3683_v20 = vadd.f32 %v10443_v3, %v10390_v58 }
 0xbb5   : > { %v8433_v36 = vpop.eup %8432  ;;  %v3793_v5 = vmul.f32 %v3761_v59, %v10478_v48  ;;  %4063 = vmatmul.mubr.bf16.vlgmr.msra.gmra.mrb[80].mxu1 %v3818_v51  ;;  %8450 = vtanh.f32 %v3711_v49  ;;  %v3710_v40 = vmul.f32 0.7978846, %v3678_v4  ;;  %v10545_v57 = vmul.f32 0.5, %v11963_v18  ;;  %v11968_v48 = vld [vmem:[#allocation183_spill] sm:$0xff]  ;;  %v11969_v59 = vld [vmem:[#allocation184_spill] sm:$0xff] }
 0xbb6   : > { %v8435_v42 = vpop.eup %8434  ;;  %8174 = vmatpush3.bf16.msra.mxu1 %v11967_v54  ;;  %v3763_v1 = vadd.f32 1.0, %v8433_v36  ;;  %8452 = vtanh.f32 %v3706_v19  ;;  %v3687_v8 = vadd.f32 %v3655_v61, %v10413_v56  ;;  %v3715_v51 = vmul.f32 0.7978846, %v3683_v20  ;;  %v11971_v54 = vld [vmem:[#allocation186_spill] sm:$0xff] }
 0xbb7   : > { %v8437_v34 = vpop.eup %8436  ;;  %v3821_v27 = vpack.c.bf16 %v3793_v5, %v3789_v39  ;;  %v3767_v11 = vadd.f32 1.0, %v8435_v42  ;;  %8167 = vmatprep.subr.bf16.mxu1 %v11968_v48  ;;  %8454 = vtanh.f32 %v3710_v40  ;;  %v3551_v23 = vmul.f32 0.5, %v10349_v30  ;;  %v11970_v39 = vld [vmem:[#allocation185_spill] sm:$0xff] }
 0xbb8   : > { %v8439_v53 = vpop.eup %8438  ;;  %v3795_v3 = vmul.f32 %v3763_v1, %v10508_v21  ;;  %v3765_v60 = vadd.f32 1.0, %v8437_v34  ;;  %v3719_v44 = vmul.f32 0.7978846, %v3687_v8  ;;  %8456 = vtanh.f32 %v3715_v51  ;;  %v11972_v34 = vld [vmem:[#allocation187_spill] sm:$0xff] }
 0xbb9   : > { %v8441_v9 = vpop.eup %8440  ;;  %4127 = vmatprep.mubr.bf16.mxu0 %v3821_v27  ;;  %v3799_v18 = vmul.f32 %v3767_v11, %v10511_v55  ;;  %v3769_v24 = vadd.f32 1.0, %v8439_v53  ;;  %v3682_v61 = vadd.f32 %v10435_v45, %v10374_v52  ;;  %v3686_v30 = vadd.f32 %v10457_v15, %v10405_v50 }
 0xbba   : > { %v8443_v22 = vpop.eup %8442  ;;  %4128 = vmatmul.mubr.bf16.vlgmr.msra.gmra.mrb[88].mxu0 %v3820_v32  ;;  %v3797_v62 = vmul.f32 %v3765_v60, %v3541_v12  ;;  %v3762_v21 = vadd.f32 1.0, %v8441_v9  ;;  %8175 = vmatpush3.bf16.msra.mxu1 %v11969_v59  ;;  %8458 = vtanh.f32 %v3719_v44  ;;  %v3546_v28 = vmul.f32 0.5, %v11965_v29  ;;  %v11973_v44 = vld [vmem:[#allocation188_spill] sm:$0xff] }
 0xbbb   : > { %v8445_v49 = vpop.eup %8444  ;;  %v3823_v55 = vpack.c.bf16 %v3799_v18, %v3795_v3  ;;  %v3801_v4 = vmul.f32 %v3769_v24, %v10519_v47  ;;  %v3766_v19 = vadd.f32 1.0, %v8443_v22  ;;  %8168 = vmatprep.subr.bf16.mxu1 %v11970_v39  ;;  %v3714_v45 = vmul.f32 0.7978846, %v3682_v61  ;;  %v11974_v61 = vld [vmem:[#allocation189_spill] sm:$0xff]  ;;  %v11977_v39 = vld [vmem:[#allocation190_spill] sm:$0xff] }
 0xbbc   : > { %v8447_v36 = vpop.eup %8446  ;;  %v3794_v5 = vmul.f32 %v3762_v21, %v3538_v25  ;;  %v3764_v10 = vadd.f32 1.0, %v8445_v49  ;;  %v3718_v32 = vmul.f32 0.7978846, %v3686_v30  ;;  %v3550_v47 = vmul.f32 0.5, %v10335_v7 }
 0xbbd   : > { %4070 = vmatprep.mubr.bf16.mxu1 %v3823_v55  ;;  %v3825_v12 = vpack.c.bf16 %v3801_v4, %v3797_v62  ;;  %v3798_v40 = vmul.f32 %v3766_v19, %v10529_v14  ;;  %v3768_v20 = vadd.f32 1.0, %v8447_v36  ;;  %8460 = vtanh.f32 %v3714_v45  ;;  %v11976_v62 = vld [vmem:[#allocation206_spill] sm:$0xff] }
 0xbbe   : > { %v8449_v15 = vpop.eup %8448  ;;  %v3796_v42 = vmul.f32 %v3764_v10, %v3540_v26  ;;  %8176 = vmatpush3.bf16.msra.mxu1 %v11971_v54  ;;  %8462 = vtanh.f32 %v3718_v32  ;;  %v3677_v25 = vadd.f32 %v10398_v16, %v10326_v33  ;;  %v3681_v27 = vadd.f32 %v10430_v63, %v10352_v6 }
 0xbbf   : > { %v8451_v1 = vpop.eup %8450  ;;  %4135 = vmatprep.mubr.bf16.mxu0 %v3825_v12  ;;  %v3822_v29 = vpack.c.bf16 %v3798_v40, %v3794_v5  ;;  %v3800_v8 = vmul.f32 %v3768_v20, %v10538_v0  ;;  %8169 = vmatprep.subr.bf16.mxu1 %v11972_v34  ;;  %v3771_v14 = vadd.f32 1.0, %v8449_v15  ;;  %v3772_v7 = vadd.f32 1.0, %v10491_v31  ;;  %v11978_v5 = vld [vmem:[#allocation191_spill] sm:$0xff] }
 0xbc0   : > { %v8453_v26 = vpop.eup %8452  ;;  %v3775_v11 = vadd.f32 1.0, %v8451_v1  ;;  %v3709_v48 = vmul.f32 0.7978846, %v3677_v25  ;;  %v3776_v51 = vadd.f32 1.0, %v10505_v2  ;;  %v3555_v60 = vmul.f32 0.5, %v10390_v58  ;;  %v11975_v2 = vld [vmem:[#allocation203_spill] sm:$0xff] }
 0xbc1   : > { %v8455_v53 = vpop.eup %8454  ;;  %4071 = vmatmul.mubr.bf16.gmra.mrb[84].mxu1 %v3822_v29  ;;  %v3824_v16 = vpack.c.bf16 %v3800_v8, %v3796_v42  ;;  %v3770_v3 = vadd.f32 1.0, %v8453_v26  ;;  %v3713_v0 = vmul.f32 0.7978846, %v3681_v27  ;;  %v3803_v9 = vmul.f32 %v3771_v14, %v10545_v57  ;;  %v11979_v25 = vld [vmem:[#allocation192_spill] sm:$0xff]  ;;  %v11980_v8 = vld [vmem:[#allocation193_spill] sm:$0xff]  ;;  %v11981_v14 = vld [vmem:[#allocation194_spill] sm:$0xff] }
 0xbc2   : > { %8177 = vmatpush3.bf16.msra.mxu1 %v11973_v44  ;;  %v3807_v18 = vmul.f32 %v3775_v11, %v3551_v23  ;;  %v3774_v63 = vadd.f32 1.0, %v8455_v53  ;;  %8464 = vtanh.f32 %v3709_v48  ;;  %v8457_v24 = vpop.eup %8456  ;;  %v3559_v31 = vmul.f32 0.5, %v10413_v56  ;;  %v11982_v48 = vld [vmem:[#allocation195_spill] sm:$0xff] }
 0xbc3   : > { %4136 = vmatmul.mubr.bf16.gmra.mrb[92].mxu0 %v3824_v16  ;;  %8170 = vmatprep.subr.bf16.mxu1 %v11974_v61  ;;  %8466 = vtanh.f32 %v3713_v0  ;;  %v10580_v22 = vmul.f32 %v3772_v7, %v11975_v2  ;;  %v10583_v58 = vmul.f32 %v3776_v51, %v11976_v62  ;;  %v3802_v30 = vmul.f32 %v3770_v3, %v3546_v28  ;;  %v11983_v16 = vld [vmem:[#allocation196_spill] sm:$0xff] }
 0xbc4   : > { %v8459_v21 = vpop.eup %8458  ;;  %v3827_v59 = vpack.c.bf16 %v3807_v18, %v3803_v9  ;;  %v3806_v57 = vmul.f32 %v3774_v63, %v3550_v47  ;;  %v3779_v23 = vadd.f32 1.0, %v8457_v24  ;;  %v3685_v4 = vadd.f32 %v10447_v43, %v10395_v35 }
 0xbc5   : > { %v3783_v49 = vadd.f32 1.0, %v8459_v21  ;;  %v3828_v55 = vpack.c.bf16 %v10583_v58, %v10580_v22  ;;  %v3689_v56 = vadd.f32 %v10499_v46, %v10424_v17  ;;  %v3684_v12 = vadd.f32 %v10438_v38, %v10381_v37 }
 0xbc6   : > { %4078 = vmatprep.mubr.bf16.mxu1 %v3827_v59  ;;  %v3826_v19 = vpack.c.bf16 %v3806_v57, %v3802_v30  ;;  %8178 = vmatpush3.bf16.msra.mxu1 %v11977_v39  ;;  %v3811_v45 = vmul.f32 %v3779_v23, %v3555_v60  ;;  %v3717_v28 = vmul.f32 0.7978846, %v3685_v4  ;;  %v3554_v43 = vmul.f32 0.5, %v10374_v52  ;;  %v11984_v30 = vld [vmem:[#allocation146_spill] sm:$0xff]  ;;  %v11986_v57 = vld [vmem:[#allocation16_spill] sm:$0xff] }
 0xbc7   : > { %v8461_v36 = vpop.eup %8460  ;;  %8171 = vmatprep.subr.bf16.mxu1 %v11978_v5  ;;  %v3815_v10 = vmul.f32 %v3783_v49, %v3559_v31  ;;  %v3721_v32 = vmul.f32 0.7978846, %v3689_v56  ;;  %v3558_v20 = vmul.f32 0.5, %v10405_v50  ;;  %v3688_v15 = vadd.f32 %v10485_v41, %v10410_v13 }
 0xbc8   : > { %v8463_v40 = vpop.eup %8462  ;;  %v3778_v46 = vadd.f32 1.0, %v8461_v36  ;;  %8468 = vtanh.f32 %v3717_v28  ;;  %v3716_v47 = vmul.f32 0.7978846, %v3684_v12  ;;  %v3549_v27 = vmul.f32 0.5, %v10326_v33 }
 0xbc9   : > { %4079 = vmatmul.mubr.bf16.gmra.mrb[88].mxu1 %v3826_v19  ;;  %v3831_v42 = vpack.c.bf16 %v3815_v10, %v3811_v45  ;;  %v3782_v54 = vadd.f32 1.0, %v8463_v40  ;;  %8470 = vtanh.f32 %v3721_v32  ;;  %v3720_v1 = vmul.f32 0.7978846, %v3688_v15  ;;  %v11987_v40 = vld [vmem:[#allocation174_spill] sm:$0xff]  ;;  %v11988_v15 = vld [vmem:[#allocation175_spill] sm:$0xff] }
 0xbca   : > { %8179 = vmatpush3.bf16.msra.mxu1 %v11979_v25  ;;  %v3810_v38 = vmul.f32 %v3778_v46, %v3554_v43  ;;  %8472 = vtanh.f32 %v3716_v47  ;;  %v3553_v26 = vmul.f32 0.5, %v10352_v6  ;;  %v3557_v9 = vmul.f32 0.5, %v10395_v35 }
 0xbcb   : > { %4086 = vmatprep.mubr.bf16.mxu1 %v3831_v42  ;;  %v3814_v29 = vmul.f32 %v3782_v54, %v3558_v20  ;;  %8172 = vmatprep.subr.bf16.mxu1 %v11980_v8  ;;  %8474 = vtanh.f32 %v3720_v1  ;;  %v3561_v33 = vmul.f32 0.5, %v10424_v17  ;;  %v3556_v63 = vmul.f32 0.5, %v10381_v37 }
 0xbcc   : > { %v8465_v52 = vpop.eup %8464  ;;  %v3560_v2 = vmul.f32 0.5, %v10410_v13  ;;  %v11985_v17 = vsub.s32 3, %v11984_v30 }
 0xbcd   : > { %v8467_v50 = vpop.eup %8466  ;;  %v3830_v34 = vpack.c.bf16 %v3814_v29, %v3810_v38  ;;  %v3773_v41 = vadd.f32 1.0, %v8465_v52 }
 0xbce   : > { %8180 = vmatpush3.bf16.msra.mxu1 %v11981_v14  ;;  %v3777_v11 = vadd.f32 1.0, %v8467_v50  ;;  %v10613_v23 = vrot.slane %v11986_v57, %v11985_v17 }
 0xbcf   : > { %8173 = vmatprep.subr.bf16.mxu1 %v11982_v48  ;;  %v3805_v7 = vmul.f32 %v3773_v41, %v3549_v27 }
 0xbd0   : > { %v3809_v51 = vmul.f32 %v3777_v11, %v3553_v26  ;;  %v11989_v11 = vld [vmem:[#allocation177_spill] sm:$0xff] }
 0xbd1   : > { %4087 = vmatmul.mubr.bf16.gmra.mrb[92].mxu1 %v3830_v34 }
 0xbd2   : > { %v3829_v53 = vpack.c.bf16 %v3809_v51, %v3805_v7  ;;  %8181 = vmatpush3.bf16.msra.mxu1 %v11983_v16  ;;  %v8469_v3 = vpop.eup %8468 }
 0xbd3   : > { %v8471_v60 = vpop.eup %8470  ;;  %v3781_v0 = vadd.f32 1.0, %v8469_v3 }
 0xbd4   : > { %4143 = vmatprep.mubr.bf16.mxu1 %v3829_v53  ;;  %v8473_v44 = vpop.eup %8472  ;;  %v3785_v18 = vadd.f32 1.0, %v8471_v60  ;;  %v11990_v53 = vld [vmem:[#allocation176_spill] sm:$0xff] }
 0xbd5   : > { %v8475_v6 = vpop.eup %8474  ;;  %v3780_v24 = vadd.f32 1.0, %v8473_v44  ;;  %v3813_v61 = vmul.f32 %v3781_v0, %v3557_v9 }
 0xbd6   : > { %v3817_v31 = vmul.f32 %v3785_v18, %v3561_v33  ;;  %v3784_v22 = vadd.f32 1.0, %v8475_v6 }
 0xbd7   : > { %v3812_v58 = vmul.f32 %v3780_v24, %v3556_v63 }
 0xbd8   : > { %v3833_v62 = vpack.c.bf16 %v3817_v31, %v3813_v61  ;;  %v3816_v21 = vmul.f32 %v3784_v22, %v3560_v2 }
 0xbd9   : > { %4144 = vmatmul.mubr.bf16.vlgmr.msra.gmra.mrb[96].mxu1 %v3828_v55 }
 0xbda   : > { %4151 = vmatprep.mubr.bf16.mxu1 %v3833_v62  ;;  %v3832_v59 = vpack.c.bf16 %v3816_v21, %v3812_v58 }
 0xbe1   : > { %4152 = vmatmul.mubr.bf16.gmra.mrb[100].mxu1 %v3832_v59 }
 0xc88   : > { %v7533_v35 = vpop.f32.mrb[80].mxu1 }
 0xc89   : > { %v7534_v37 = vpop.f32.mrb[81].mxu1 }
 0xc8a   : > { %v7535_v49 = vadd.f32 %v7534_v37, %v7533_v35  ;;  %v7536_v4 = vpop.f32.mrb[82].mxu1  ;;  %v11991_v37 = vld [vmem:[#allocation178_spill] sm:$0xff] }
 0xc8b   : > { %v7537_v56 = vpop.f32.mrb[83].mxu1 }
 0xc8c   : > { %v7538_v19 = vadd.f32 %v7537_v56, %v7536_v4  ;;  %v4065_v55 = vadd.f32 %v7535_v49, %v10613_v23  ;;  %v11992_v56 = vld [vmem:[#allocation179_spill] sm:$0xff] }
 0xc8d   : > { %v7573_v13 = vpop.f32.mrb[88].mxu0 }
 0xc8e   : > { %v7574_v39 = vpop.f32.mrb[89].mxu0  ;;  %v4068_v5 = vadd.f32 %v7538_v19, %v10613_v23 }
 0xc8f   : > { %v7575_v45 = vadd.f32 %v7574_v39, %v7573_v13  ;;  %v7576_v36 = vpop.f32.mrb[90].mxu0 }
 0xc90   : > { %v7577_v10 = vpop.f32.mrb[91].mxu0 }
 0xc91   : > { %v4130_v28 = vadd.f32 %v7575_v45, %v4065_v55  ;;  %v7578_v32 = vadd.f32 %v7577_v10, %v7576_v36 }
 0xc93   : > { %v4133_v12 = vadd.f32 %v7578_v32, %v4068_v5  ;;  %v10618_v43 = vadd.f32 %v4130_v28, %v11987_v40 }
 0xc94   : > { %v7539_v20 = vpop.f32.mrb[84].mxu1 }
 0xc95   : > { %v7540_v46 = vpop.f32.mrb[85].mxu1  ;;  %4168 = vadd.xlane.f32.xlu0 %v10618_v43  ;;  %v10622_v42 = vadd.f32 %v4133_v12, %v11988_v15  ;;  %v11993_v12 = vld [vmem:[#allocation181_spill] sm:$0xff] }
 0xc96   : > { %v7579_v54 = vpop.f32.mrb[92].mxu0  ;;  %v7541_v47 = vadd.f32 %v7540_v46, %v7539_v20  ;;  %v7542_v25 = vpop.f32.mrb[86].mxu1  ;;  %v11994_v20 = vld [vmem:[#allocation180_spill] sm:$0xff] }
 0xc97   : > { %v7580_v1 = vpop.f32.mrb[93].mxu0  ;;  %v7543_v38 = vpop.f32.mrb[87].mxu1  ;;  %4170 = vadd.xlane.f32.xlu1 %v10622_v42 }
 0xc98   : > { %v4073_v29 = vadd.f32 %v7541_v47, %v10613_v23  ;;  %v7581_v8 = vadd.f32 %v7580_v1, %v7579_v54  ;;  %v7582_v52 = vpop.f32.mrb[94].mxu0  ;;  %v7544_v50 = vadd.f32 %v7543_v38, %v7542_v25 }
 0xc99   : > { %v7583_v34 = vpop.f32.mrb[95].mxu0 }
 0xc9a   : > { %v4138_v41 = vadd.f32 %v7581_v8, %v4073_v29  ;;  %v4076_v14 = vadd.f32 %v7544_v50, %v10613_v23  ;;  %v7584_v27 = vadd.f32 %v7583_v34, %v7582_v52 }
 0xc9c   : > { %v4141_v26 = vadd.f32 %v7584_v27, %v4076_v14  ;;  %v4162_v48 = vadd.f32 %v4138_v41, %v11989_v11  ;;  %v7545_v7 = vpop.f32.mrb[88].mxu1 }
 0xc9d   : > { %v7546_v51 = vpop.f32.mrb[89].mxu1 }
 0xc9e   : > { %4172 = vadd.xlane.f32.xlu0 %v4162_v48  ;;  %v4163_v16 = vadd.f32 %v4141_v26, %v11990_v53  ;;  %v7547_v3 = vadd.f32 %v7546_v51, %v7545_v7  ;;  %v7548_v60 = vpop.f32.mrb[90].mxu1 }
 0xc9f   : > { %v7549_v0 = vpop.f32.mrb[91].mxu1 }
 0xca0   : > { %4174 = vadd.xlane.f32.xlu1 %v4163_v16  ;;  %v7550_v44 = vadd.f32 %v7549_v0, %v7548_v60  ;;  %v4081_v2 = vadd.f32 %v7547_v3, %v10613_v23 }
 0xca2   : > { %v4084_v21 = vadd.f32 %v7550_v44, %v10613_v23 }
 0xca4   : > { %v7551_v9 = vpop.f32.mrb[92].mxu1 }
 0xca5   : > { %v7552_v33 = vpop.f32.mrb[93].mxu1 }
 0xca6   : > { %v7553_v18 = vadd.f32 %v7552_v33, %v7551_v9  ;;  %v7554_v6 = vpop.f32.mrb[94].mxu1 }
 0xca7   : > { %v7555_v63 = vpop.f32.mrb[95].mxu1 }
 0xca8   : > { %v7556_v24 = vadd.f32 %v7555_v63, %v7554_v6  ;;  %v4089_v55 = vadd.f32 %v7553_v18, %v10613_v23 }
 0xcaa   : > { %v4092_v5 = vadd.f32 %v7556_v24, %v10613_v23 }
 0xcac   : > { %v7585_v61 = vpop.f32.mrb[96].mxu1 }
 0xcad   : > { %v7586_v31 = vpop.f32.mrb[97].mxu1 }
 0xcae   : > { %v7587_v22 = vadd.f32 %v7586_v31, %v7585_v61  ;;  %v7588_v62 = vpop.f32.mrb[98].mxu1 }
 0xcaf   : > { %v7589_v58 = vpop.f32.mrb[99].mxu1 }
 0xcb0   : > { %v4146_v59 = vadd.f32 %v7587_v22, %v4081_v2  ;;  %v7590_v35 = vadd.f32 %v7589_v58, %v7588_v62  ;;  %v4258_v58 = vsub.s32 4, %v11984_v30 }
 0xcb2   : > { %v4149_v17 = vadd.f32 %v7590_v35, %v4084_v21  ;;  %v4164_v49 = vadd.f32 %v4146_v59, %v11991_v37  ;;  %v4270_v35 = vsub.s32 5, %v11984_v30 }
 0xcb4   : > { %v7591_v4 = vpop.f32.mrb[100].mxu1  ;;  %4176 = vadd.xlane.f32.xlu0 %v4164_v49  ;;  %v4165_v19 = vadd.f32 %v4149_v17, %v11992_v56 }
 0xcb5   : > { %v7592_v13 = vpop.f32.mrb[101].mxu1 }
 0xcb6   : > { %v7593_v39 = vadd.f32 %v7592_v13, %v7591_v4  ;;  %v7594_v45 = vpop.f32.mrb[102].mxu1  ;;  %4178 = vadd.xlane.f32.xlu1 %v4165_v19 }
 0xcb7   : > { %v7595_v36 = vpop.f32.mrb[103].mxu1 }
 0xcb8   : > { %v4154_v10 = vadd.f32 %v7593_v39, %v4089_v55  ;;  %v7596_v28 = vadd.f32 %v7595_v36, %v7594_v45 }
 0xcba   : > { %v4157_v32 = vadd.f32 %v7596_v28, %v4092_v5  ;;  %v4166_v40 = vadd.f32 %v4154_v10, %v11993_v12 }
 0xcbc   : > { %4180 = vadd.xlane.f32.xlu0 %v4166_v40  ;;  %v4167_v46 = vadd.f32 %v4157_v32, %v11994_v20 }
 0xcbe   : > { %4182 = vadd.xlane.f32.xlu1 %v4167_v46 }
 0xd22   : > { %v4169_v15 = vpop.xlane.xlu0 %4168 }
 0xd23   : > { %v4184_v54 = vmul.f32 0.0078125, %v4169_v15 }
 0xd24   : > { %v4171_v47 = vpop.xlane.xlu1 %4170 }
 0xd25   : > { %v4192_v25 = vsub.f32 %v10618_v43, %v4184_v54  ;;  %v4185_v1 = vmul.f32 0.0078125, %v4171_v47 }
 0xd27   : > { %v4193_v38 = vsub.f32 %v10622_v42, %v4185_v1  ;;  %v4200_v29 = vmul.f32 %v4192_v25, %v4192_v25 }
 0xd29   : > { %4208 = vadd.xlane.f32.xlu0 %v4200_v29  ;;  %v4201_v23 = vmul.f32 %v4193_v38, %v4193_v38 }
 0xd2b   : > { %v4173_v8 = vpop.xlane.xlu0 %4172  ;;  %4210 = vadd.xlane.f32.xlu1 %v4201_v23 }
 0xd2c   : > { %v4186_v52 = vmul.f32 0.0078125, %v4173_v8 }
 0xd2d   : > { %v4175_v50 = vpop.xlane.xlu1 %4174 }
 0xd2e   : > { %v4194_v34 = vsub.f32 %v4162_v48, %v4186_v52  ;;  %v4187_v41 = vmul.f32 0.0078125, %v4175_v50 }
 0xd30   : > { %v4195_v14 = vsub.f32 %v4163_v16, %v4187_v41  ;;  %v4202_v27 = vmul.f32 %v4194_v34, %v4194_v34 }
 0xd32   : > { %4212 = vadd.xlane.f32.xlu0 %v4202_v27  ;;  %v4203_v26 = vmul.f32 %v4195_v14, %v4195_v14 }
 0xd34   : > { %4214 = vadd.xlane.f32.xlu1 %v4203_v26 }
 0xd41   : > { %v4177_v11 = vpop.xlane.xlu0 %4176 }
 0xd42   : > { %v4188_v7 = vmul.f32 0.0078125, %v4177_v11 }
 0xd43   : > { %v4179_v43 = vpop.xlane.xlu1 %4178 }
 0xd44   : > { %v10639_v51 = vsub.f32 %v4164_v49, %v4188_v7  ;;  %v4189_v42 = vmul.f32 0.0078125, %v4179_v43  ;;  %v4259_v49 = vrot.slane %v11986_v57, %v4258_v58 }
 0xd46   : > { %v10641_v53 = vsub.f32 %v4165_v19, %v4189_v42  ;;  %v4204_v3 = vmul.f32 %v10639_v51, %v10639_v51  ;;  %v4271_v19 = vrot.slane %v11986_v57, %v4270_v35 }
 0xd48   : > { %4216 = vadd.xlane.f32.xlu0 %v4204_v3  ;;  %v4205_v48 = vmul.f32 %v10641_v53, %v10641_v53 }
 0xd49   : > { %v4181_v16 = vpop.xlane.xlu0 %4180 }
 0xd4a   : > { %v4190_v60 = vmul.f32 0.0078125, %v4181_v16  ;;  %4218 = vadd.xlane.f32.xlu1 %v4205_v48 }
 0xd4b   : > { %v4183_v0 = vpop.xlane.xlu1 %4182 }
 0xd4c   : > { %v10647_v44 = vsub.f32 %v4166_v40, %v4190_v60  ;;  %v4191_v9 = vmul.f32 0.0078125, %v4183_v0 }
 0xd4e   : > { %v10649_v33 = vsub.f32 %v4167_v46, %v4191_v9  ;;  %v4206_v18 = vmul.f32 %v10647_v44, %v10647_v44 }
 0xd50   : > { %4220 = vadd.xlane.f32.xlu0 %v4206_v18  ;;  %v4207_v6 = vmul.f32 %v10649_v33, %v10649_v33 }
 0xd52   : > { %4222 = vadd.xlane.f32.xlu1 %v4207_v6 }
 0xdb6   : > { %v4209_v63 = vpop.xlane.xlu0 %4208 }
 0xdb7   : > { %v4224_v24 = vmul.f32 0.0078125, %v4209_v63 }
 0xdb8   : > { %v4211_v61 = vpop.xlane.xlu1 %4210 }
 0xdb9   : > { %v4232_v31 = vadd.f32 1e-12, %v4224_v24  ;;  %v4225_v2 = vmul.f32 0.0078125, %v4211_v61 }
 0xdbb   : > { %8476 = vrsqrt.f32 %v4232_v31  ;;  %v4233_v22 = vadd.f32 1e-12, %v4225_v2 }
 0xdbd   : > { %8478 = vrsqrt.f32 %v4233_v22 }
 0xdbf   : > { %v4213_v62 = vpop.xlane.xlu0 %4212 }
 0xdc0   : > { %v4226_v21 = vmul.f32 0.0078125, %v4213_v62 }
 0xdc1   : > { %v4215_v59 = vpop.xlane.xlu1 %4214 }
 0xdc2   : > { %v4234_v17 = vadd.f32 1e-12, %v4226_v21  ;;  %v4227_v37 = vmul.f32 0.0078125, %v4215_v59 }
 0xdc4   : > { %8480 = vrsqrt.f32 %v4234_v17  ;;  %v4235_v4 = vadd.f32 1e-12, %v4227_v37 }
 0xdc5   : > { %v8477_v56 = vpop.eup %8476 }
 0xdc6   : > { %v4248_v13 = vmul.f32 %v8477_v56, %v4192_v25  ;;  %8482 = vrsqrt.f32 %v4235_v4 }
 0xdc7   : > { %v8479_v55 = vpop.eup %8478 }
 0xdc8   : > { %v4260_v39 = vmul.f32 %v4259_v49, %v4248_v13  ;;  %v4249_v45 = vmul.f32 %v8479_v55, %v4193_v38 }
 0xdca   : > { %v4272_v36 = vadd.f32 %v4271_v19, %v4260_v39  ;;  %v4261_v5 = vmul.f32 %v4259_v49, %v4249_v45 }
 0xdcc   : > { %4280 = vst [vmem:[#allocation2] sm:$0xff] %v4272_v36  ;;  %v4273_v10 = vadd.f32 %v4271_v19, %v4261_v5 }
 0xdce   : > { %v8481_v28 = vpop.eup %8480  ;;  %4281 = vst [vmem:[#allocation2 + $0x8] sm:$0xff] %v4273_v10 }
 0xdcf   : > { %v4250_v30 = vmul.f32 %v8481_v28, %v4194_v34 }
 0xdd0   : > { %v8483_v32 = vpop.eup %8482 }
 0xdd1   : > { %v4262_v12 = vmul.f32 %v4259_v49, %v4250_v30  ;;  %v4251_v40 = vmul.f32 %v8483_v32, %v4195_v14 }
 0xdd3   : > { %v4274_v20 = vadd.f32 %v4271_v19, %v4262_v12  ;;  %v4263_v46 = vmul.f32 %v4259_v49, %v4251_v40 }
 0xdd5   : > { %4282 = vst [vmem:[#allocation2 + $0x10] sm:$0xff] %v4274_v20  ;;  %v4275_v15 = vadd.f32 %v4271_v19, %v4263_v46  ;;  %v4217_v57 = vpop.xlane.xlu0 %4216 }
 0xdd6   : > { %v4228_v54 = vmul.f32 0.0078125, %v4217_v57 }
 0xdd7   : > { %4283 = vst [vmem:[#allocation2 + $0x18] sm:$0xff] %v4275_v15  ;;  %v4219_v47 = vpop.xlane.xlu1 %4218 }
 0xdd8   : > { %v4236_v25 = vadd.f32 1e-12, %v4228_v54  ;;  %v4229_v1 = vmul.f32 0.0078125, %v4219_v47 }
 0xdda   : > { %8484 = vrsqrt.f32 %v4236_v25  ;;  %v4237_v38 = vadd.f32 1e-12, %v4229_v1 }
 0xddc   : > { %8486 = vrsqrt.f32 %v4237_v38 }
 0xddd   : > { %v4221_v29 = vpop.xlane.xlu0 %4220 }
 0xdde   : > { %v4230_v23 = vmul.f32 0.0078125, %v4221_v29 }
 0xddf   : > { %v4223_v8 = vpop.xlane.xlu1 %4222 }
 0xde0   : > { %v4238_v52 = vadd.f32 1e-12, %v4230_v23  ;;  %v4231_v50 = vmul.f32 0.0078125, %v4223_v8 }
 0xde2   : > { %8488 = vrsqrt.f32 %v4238_v52  ;;  %v4239_v34 = vadd.f32 1e-12, %v4231_v50 }
 0xde4   : > { %v8485_v41 = vpop.eup %8484  ;;  %8490 = vrsqrt.f32 %v4239_v34 }
 0xde5   : > { %v4252_v14 = vmul.f32 %v8485_v41, %v10639_v51 }
 0xde6   : > { %v8487_v27 = vpop.eup %8486 }
 0xde7   : > { %v4264_v26 = vmul.f32 %v4259_v49, %v4252_v14  ;;  %v4253_v11 = vmul.f32 %v8487_v27, %v10641_v53 }
 0xde9   : > { %v4276_v7 = vadd.f32 %v4271_v19, %v4264_v26  ;;  %v4265_v43 = vmul.f32 %v4259_v49, %v4253_v11 }
 0xdeb   : > { %4284 = vst [vmem:[#allocation2 + $0x20] sm:$0xff] %v4276_v7  ;;  %v4277_v42 = vadd.f32 %v4271_v19, %v4265_v43 }
 0xdec   : > { %v8489_v3 = vpop.eup %8488 }
 0xded   : > { %4285 = vst [vmem:[#allocation2 + $0x28] sm:$0xff] %v4277_v42  ;;  %v4254_v48 = vmul.f32 %v8489_v3, %v10647_v44 }
 0xdee   : > { %v8491_v16 = vpop.eup %8490 }
 0xdef   : > { %v4266_v60 = vmul.f32 %v4259_v49, %v4254_v48  ;;  %v4255_v0 = vmul.f32 %v8491_v16, %v10649_v33 }
 0xdf1   : > { %v4278_v9 = vadd.f32 %v4271_v19, %v4266_v60  ;;  %v4267_v18 = vmul.f32 %v4259_v49, %v4255_v0 }
 0xdf3   : > { %4286 = vst [vmem:[#allocation2 + $0x30] sm:$0xff] %v4278_v9  ;;  %v4279_v51 = vadd.f32 %v4271_v19, %v4267_v18 }
 0xdf5   : > { %4287 = vst [vmem:[#allocation2 + $0x38] sm:$0xff] %v4279_v51 }
 0xdf6 PF: > { %p7245_p2 = scmp.ne.s32.totalorder %s8666_s12, 1 }
 0xdf7   : > { %v11995_v53 = vld [vmem:[#allocation151_spill] sm:$0xff] (!%p7245_p2)  ;;  %vm4352_vm4 = vcmask (!%p7245_p2), 523264   ;;  %v8689_v63 = vmov (!%p7245_p2), 0.0   ;;  %vm8690_vm5 = vmmov (!%p7245_p2), 0   ;;  %v11997_v31 = vld [vmem:[#allocation153_spill] sm:$0xff] (!%p7245_p2)  ;;  %v11998_v22 = vld [vmem:[#allocation150_spill] sm:$0xff] (!%p7245_p2) }
 0xdf8   : > { %4291 = sbr.rel (%p7245_p2) target bundleno = 6492 (0x195c), region = 68  ;;  %v10666_v6 = vpack.c.bf16 (!%p7245_p2), %v11995_v53, %v11995_v53  ;;  %7954 = vmatprep.subr.bf16.mxu1 (!%p7245_p2), %v8689_v63  ;;  %7956 = vmatprep.mubr.msk.bf16.mxu1 (!%p7245_p2), %vm8690_vm5, %v8689_v63  ;;  %v11996_v44 = vld [vmem:[#allocation167_spill] sm:$0xff] (!%p7245_p2)  ;;  %v10685_v2 = vpack.c.bf16 (!%p7245_p2), %v11997_v31, %v11997_v31  ;;  %v10690_v62 = vpack.c.bf16 (!%p7245_p2), %v11998_v22, %v11998_v22  ;;  %v12000_v35 = vld [vmem:[#allocation165_spill] sm:$0xff] (!%p7245_p2)  ;;  %v12002_v56 = vld [vmem:[#allocation152_spill] sm:$0xff] (!%p7245_p2)  ;;  %vm4721_vm6 = vcmask (!%p7245_p2), 57344   ;;  %s8691_s2 = smov (!%p7245_p2), 64  }
 0xdf9   : > { %v10673_v33 = vpack.c.bf16 (!%p7245_p2), %v11996_v44, %v11996_v44  ;;  %7978 = vmatprep.subr.bf16.mxu0 (!%p7245_p2), %v8689_v63  ;;  %7980 = vmatprep.mubr.msk.bf16.mxu0 (!%p7245_p2), %vm8690_vm5, %v8689_v63  ;;  %v10700_v17 = vpack.c.bf16 (!%p7245_p2), %v12000_v35, %v12000_v35  ;;  %v12001_v49 = vld [vmem:[#allocation159_spill] sm:$0xff] (!%p7245_p2)  ;;  %v10719_v19 = vpack.c.bf16 (!%p7245_p2), %v12002_v56, %v12002_v56  ;;  %v12003_v55 = vld [vmem:[#allocation170_spill] sm:$0xff] (!%p7245_p2)  ;;  %v12004_v45 = vld [vmem:[#allocation161_spill] sm:$0xff] (!%p7245_p2)  ;;  %vm4822_vm7 = vcmask (!%p7245_p2), 1043456  }
 0xdfa   : > { %v4357_v24 = vsel (!%p7245_p2), %vm4352_vm4, %v10666_v6, 0  ;;  %v11999_v58 = vld [vmem:[#allocation171_spill] sm:$0xff] (!%p7245_p2)  ;;  %v4403_v59 = vsel (!%p7245_p2), %vm4352_vm4, %v10685_v2, 0  ;;  %v10713_v4 = vpack.c.bf16 (!%p7245_p2), %v12001_v49, %v12001_v49  ;;  %v10726_v39 = vpack.c.bf16 (!%p7245_p2), %v12003_v55, %v12003_v55  ;;  %v12005_v5 = vld [vmem:[#allocation157_spill] sm:$0xff] (!%p7245_p2)  ;;  %v12007_v12 = vld [vmem:[#allocation160_spill] sm:$0xff] (!%p7245_p2) }
 0xdfb   : > { %7955 = vmatpush3.bf16.xpose.msra.mxu1 (!%p7245_p2), %v4357_v24  ;;  %v4541_v61 = vsel (!%p7245_p2), %vm4352_vm4, %v10673_v33, 0  ;;  %v10694_v21 = vpack.c.bf16 (!%p7245_p2), %v11999_v58, %v11999_v58  ;;  %v10737_v36 = vpack.c.bf16 (!%p7245_p2), %v12004_v45, %v12004_v45  ;;  %v10743_v10 = vpack.c.bf16 (!%p7245_p2), %v12005_v5, %v12005_v5  ;;  %v12006_v30 = vld [vmem:[#allocation169_spill] sm:$0xff] (!%p7245_p2)  ;;  %v12009_v57 = vld [vmem:[#allocation168_spill] sm:$0xff] (!%p7245_p2)  ;;  %v12012_v7 = vld [vmem:[#allocation18_spill] sm:$0xff] (!%p7245_p2) }
 0xdfc   : > { %7960 = vmatprep.subr.bf16.mxu1 (!%p7245_p2), %v8689_v63  ;;  %7979 = vmatpush3.bf16.xpose.msra.mxu0 (!%p7245_p2), %v4541_v61  ;;  %v4449_v13 = vsel (!%p7245_p2), %vm4352_vm4, %v10713_v4, 0  ;;  %v10754_v32 = vpack.c.bf16 (!%p7245_p2), %v12006_v30, %v12006_v30  ;;  %v10758_v40 = vpack.c.bf16 (!%p7245_p2), %v12007_v12, %v12007_v12  ;;  %v12008_v46 = vld [vmem:[#allocation173_spill] sm:$0xff] (!%p7245_p2)  ;;  %v10773_v54 = vpack.c.bf16 (!%p7245_p2), %v12009_v57, %v12009_v57  ;;  %v12010_v25 = vld [vmem:[#allocation172_spill] sm:$0xff] (!%p7245_p2)  ;;  %v12014_v53 = vld [vmem:[#allocation23_spill] sm:$0xff] (!%p7245_p2) }
 0xdfd   : > { %7990 = vmatprep.subr.bf16.mxu0 (!%p7245_p2), %v8689_v63  ;;  %v4633_v37 = vsel (!%p7245_p2), %vm4352_vm4, %v10694_v21, 0  ;;  %v4495_v28 = vsel (!%p7245_p2), %vm4352_vm4, %v10737_v36, 0  ;;  %v10769_v15 = vpack.c.bf16 (!%p7245_p2), %v12008_v46, %v12008_v46  ;;  %v10784_v1 = vpack.c.bf16 (!%p7245_p2), %v12010_v25, %v12010_v25  ;;  %v12011_v29 = vld [vmem:[#allocation17_spill] sm:$0xff] (!%p7245_p2)  ;;  %v12015_v22 = vld [vmem:[#allocation19_spill] sm:$0xff] (!%p7245_p2)  ;;  %v12016_v55 = vld [vmem:[#allocation20_spill] sm:$0xff] (!%p7245_p2) }
 0xdfe   : > { %v4587_v20 = vsel (!%p7245_p2), %vm4352_vm4, %v10754_v32, 0  ;;  %v12013_v3 = vld [vmem:[#allocation21_spill] sm:$0xff] (!%p7245_p2)  ;;  %v12017_v46 = vld [vmem:[#allocation22_spill] sm:$0xff] (!%p7245_p2)  ;;  %vm4818_vm8 = vcmask (!%p7245_p2), 64512   ;;  %vm6137_vm9 = vcmask (!%p7245_p2), 1041409   ;;  %vm6140_vm10 = vcmask (!%p7245_p2), 1042434  }
 0xdff   : > { %v4679_v47 = vsel %vm4352_vm4, %v10769_v15, 0  ;;  %vm6143_vm11 = vcmask 1043459   ;;  %vm6146_vm12 = vcmask 1044484   ;;  %vm6149_vm13 = vcmask 1045509  }
 0xe00   : > { %vm6152_vm14 = vcmask 1046534   ;;  %vm6155_vm15 = vcmask 1047559  }
 0xe02   : > { %7957 = vmatmul.mubr.msk.bf16.vlgmr.msra.gmra.mrb[0].mxu1 %vm4352_vm4, %v10690_v62 }
 0xe03   : > { %7961 = vmatpush3.bf16.xpose.msra.mxu1 %v4403_v59  ;;  %7962 = vmatprep.mubr.msk.bf16.mxu1 %vm8690_vm5, %v8689_v63 }
 0xe04   : > { %7966 = vmatprep.subr.bf16.mxu1 %v8689_v63  ;;  %7981 = vmatmul.mubr.msk.bf16.vlgmr.msra.gmra.mrb[0].mxu0 %vm4352_vm4, %v10700_v17 }
 0xe05   : > { %7991 = vmatpush3.bf16.xpose.msra.mxu0 %v4633_v37  ;;  %7992 = vmatprep.mubr.msk.bf16.mxu0 %vm8690_vm5, %v8689_v63 }
 0xe06   : > { %8002 = vmatprep.subr.bf16.mxu0 %v8689_v63 }
 0xe0a   : > { %7963 = vmatmul.mubr.msk.bf16.vlgmr.msra.gmra.mrb[4].mxu1 %vm4352_vm4, %v10719_v19 }
 0xe0b   : > { %7967 = vmatpush3.bf16.xpose.msra.mxu1 %v4449_v13  ;;  %7968 = vmatprep.mubr.msk.bf16.mxu1 %vm8690_vm5, %v8689_v63 }
 0xe0c   : > { %7972 = vmatprep.subr.bf16.mxu1 %v8689_v63  ;;  %7993 = vmatmul.mubr.msk.bf16.vlgmr.msra.gmra.mrb[4].mxu0 %vm4352_vm4, %v10726_v39 }
 0xe0d   : > { %8004 = vmatprep.mubr.msk.bf16.mxu0 %vm8690_vm5, %v8689_v63 }
 0xe12   : > { %7969 = vmatmul.mubr.msk.bf16.vlgmr.msra.gmra.mrb[8].mxu1 %vm4352_vm4, %v10743_v10 }
 0xe13   : > { %7973 = vmatpush3.bf16.xpose.msra.mxu1 %v4495_v28  ;;  %7974 = vmatprep.mubr.msk.bf16.mxu1 %vm8690_vm5, %v8689_v63 }
 0xe14   : > { %7984 = vmatprep.subr.bf16.mxu1 %v8689_v63 }
 0xe1a   : > { %7975 = vmatmul.mubr.msk.bf16.vlgmr.msra.gmra.mrb[12].mxu1 %vm4352_vm4, %v10758_v40 }
 0xe1b   : > { %7985 = vmatpush3.bf16.xpose.msra.mxu1 %v4587_v20  ;;  %7986 = vmatprep.mubr.msk.bf16.mxu1 %vm8690_vm5, %v8689_v63 }
 0xe1c   : > { %7996 = vmatprep.subr.bf16.mxu1 %v8689_v63 }
 0xe22   : > { %7987 = vmatmul.mubr.msk.bf16.vlgmr.msra.gmra.mrb[16].mxu1 %vm4352_vm4, %v10773_v54 }
 0xe23   : > { %7997 = vmatpush3.bf16.xpose.msra.mxu1 %v4679_v47  ;;  %7998 = vmatprep.mubr.msk.bf16.mxu1 %vm8690_vm5, %v8689_v63 }
 0xe24   : > { %8008 = vmatprep.subr.bf16.mxu1 %v8689_v63 }
 0xe2a   : > { %7999 = vmatmul.mubr.msk.bf16.vlgmr.msra.gmra.mrb[20].mxu1 %vm4352_vm4, %v10784_v1 }
 0xe2b   : > { %8010 = vmatprep.mubr.msk.bf16.mxu1 %vm8690_vm5, %v8689_v63 }
 0xed5   : > { %v4393_v38 = vpop.f32.mrb[0].mxu1 }
 0xed6   : > { %v4394_v23 = vadd.f32 %v4393_v38, %v12011_v29  ;;  %v7958_v8 = vpop.f32.mrb[1].mxu1 }
 0xed7   : > { %v4396_v52 = vpop.f32.mrb[2].mxu1  ;;  %v4577_v50 = vpop.f32.mrb[0].mxu0 }
 0xed8   : > { %v7959_v34 = vpop.f32.mrb[3].mxu1  ;;  %v4722_v41 = vsel %vm4721_vm6, %v4394_v23, -inf  ;;  %v7982_v14 = vpop.f32.mrb[1].mxu0  ;;  %v4578_v48 = vadd.f32 %v4577_v50, %v12013_v3  ;;  %v12018_v50 = vld [vmem:[#allocation24_spill] sm:$0xff] }
 0xed9   : > { %4723 = vmax.xlane.f32.xlu0 %v4722_v41  ;;  %v4580_v27 = vpop.f32.mrb[2].mxu0 }
 0xeda   : > { %v7983_v26 = vpop.f32.mrb[3].mxu0  ;;  %v4734_v24 = vsel %vm4721_vm6, %v4578_v48, -inf }
 0xedd   : > { %v4439_v11 = vpop.f32.mrb[4].mxu1 }
 0xede   : > { %v4440_v43 = vadd.f32 %v4439_v11, %v12012_v7  ;;  %v7964_v42 = vpop.f32.mrb[5].mxu1 }
 0xedf   : > { %v4442_v16 = vpop.f32.mrb[6].mxu1  ;;  %v4669_v60 = vpop.f32.mrb[4].mxu0 }
 0xee0   : > { %v7965_v0 = vpop.f32.mrb[7].mxu1  ;;  %v4725_v9 = vsel %vm4721_vm6, %v4440_v43, -inf  ;;  %v7994_v18 = vpop.f32.mrb[5].mxu0  ;;  %v4670_v44 = vadd.f32 %v4669_v60, %v12014_v53 }
 0xee1   : > { %4726 = vmax.xlane.f32.xlu0 %v4725_v9  ;;  %v4672_v51 = vpop.f32.mrb[6].mxu0 }
 0xee2   : > { %v7995_v61 = vpop.f32.mrb[7].mxu0  ;;  %v4740_v59 = vsel %vm4721_vm6, %v4670_v44, -inf }
 0xee5   : > { %4735 = vmax.xlane.f32.xlu0 %v4734_v24  ;;  %v4485_v31 = vpop.f32.mrb[8].mxu1 }
 0xee6   : > { %v4486_v58 = vadd.f32 %v4485_v31, %v12015_v22  ;;  %v7970_v35 = vpop.f32.mrb[9].mxu1 }
 0xee7   : > { %v4488_v37 = vpop.f32.mrb[10].mxu1 }
 0xee8   : > { %v4728_v49 = vsel %vm4721_vm6, %v4486_v58, -inf  ;;  %v7971_v56 = vpop.f32.mrb[11].mxu1 }
 0xee9   : > { %4741 = vmax.xlane.f32.xlu0 %v4740_v59  ;;  %4729 = vmax.xlane.f32.xlu1 %v4728_v49 }
 0xeed   : > { %v4531_v13 = vpop.f32.mrb[12].mxu1 }
 0xeee   : > { %v10801_v45 = vadd.f32 %v4531_v13, %v12016_v55  ;;  %v7976_v5 = vpop.f32.mrb[13].mxu1 }
 0xeef   : > { %v4534_v28 = vpop.f32.mrb[14].mxu1 }
 0xef0   : > { %v4731_v30 = vsel %vm4721_vm6, %v10801_v45, -inf  ;;  %v7977_v12 = vpop.f32.mrb[15].mxu1 }
 0xef1   : > { %4732 = vmax.xlane.f32.xlu1 %v4731_v30  ;;  %v12019_v12 = vld [vmem:[#allocation155_spill] sm:$0xff] }
 0xef5   : > { %v4623_v20 = vpop.f32.mrb[16].mxu1 }
 0xef6   : > { %v10806_v57 = vadd.f32 %v4623_v20, %v12017_v46  ;;  %v7988_v47 = vpop.f32.mrb[17].mxu1  ;;  %v10837_v20 = vpack.c.bf16 %v12019_v12, %v12019_v12 }
 0xef7   : > { %v4626_v25 = vpop.f32.mrb[18].mxu1 }
 0xef8   : > { %v4737_v38 = vsel %vm4721_vm6, %v10806_v57, -inf  ;;  %v7989_v8 = vpop.f32.mrb[19].mxu1  ;;  %v4824_v47 = vsel %vm4822_vm7, %v10837_v20, 0  ;;  %v12020_v25 = vld [vmem:[#allocation158_spill] sm:$0xff] }
 0xef9   : > { %4738 = vmax.xlane.f32.xlu1 %v4737_v38  ;;  %8003 = vmatpush3.bf16.msra.mxu0 %v4824_v47  ;;  %v10846_v38 = vpack.c.bf16 %v12020_v25, %v12020_v25 }
 0xefa   : > { %8014 = vmatprep.subr.bf16.mxu0 %v8689_v63 }
 0xefb   : > { %v4870_v8 = vsel %vm4822_vm7, %v10846_v38, 0 }
 0xefc   : > { %8009 = vmatpush3.bf16.msra.mxu1 %v4870_v8 }
 0xefd   : > { %v4715_v52 = vpop.f32.mrb[20].mxu1  ;;  %8020 = vmatprep.subr.bf16.mxu1 %v8689_v63 }
 0xefe   : > { %v10811_v34 = vadd.f32 %v4715_v52, %v12018_v50  ;;  %v8000_v41 = vpop.f32.mrb[21].mxu1 }
 0xeff   : > { %v4718_v14 = vpop.f32.mrb[22].mxu1 }
 0xf00   : > { %v4743_v27 = vsel %vm4721_vm6, %v10811_v34, -inf  ;;  %v8001_v26 = vpop.f32.mrb[23].mxu1 }
 0xf01   : > { %4744 = vmax.xlane.f32.xlu1 %v4743_v27 }
 0xf66   : > { %v4724_v11 = vpop.xlane.xlu0 %4723 }
 0xf67   : > { %v4746_v42 = vsub.f32 %v4394_v23, %v4724_v11 }
 0xf69   : > { %v4754_v16 = vmul.f32 1.442695, %v4746_v42 }
 0xf6b   : > { %8512 = vpow2.f32 %v4754_v16 }
 0xf6e   : > { %v4727_v60 = vpop.xlane.xlu0 %4726 }
 0xf6f   : > { %v4747_v0 = vsub.f32 %v4440_v43, %v4727_v60 }
 0xf71   : > { %v4756_v9 = vmul.f32 1.442695, %v4747_v0 }
 0xf72   : > { %v4736_v18 = vpop.xlane.xlu0 %4735 }
 0xf73   : > { %8514 = vpow2.f32 %v4756_v9  ;;  %v4750_v24 = vsub.f32 %v4578_v48, %v4736_v18 }
 0xf75   : > { %v10815_v51 = vpop.eup %8512  ;;  %v4762_v49 = vmul.f32 1.442695, %v4750_v24 }
 0xf76   : > { %v4730_v61 = vpop.xlane.xlu1 %4729  ;;  %v4770_v31 = vsel %vm4721_vm6, %v10815_v51, 0.0  ;;  %v4742_v59 = vpop.xlane.xlu0 %4741 }
 0xf77   : > { %v4748_v35 = vsub.f32 %v4486_v58, %v4730_v61  ;;  %4771 = vadd.xlane.f32.xlu0 %v4770_v31  ;;  %v4752_v23 = vsub.f32 %v4670_v44, %v4742_v59  ;;  %v12023_v61 = vld [vmem:[#allocation163_spill] sm:$0xff] }
 0xf79   : > { %v4758_v37 = vmul.f32 1.442695, %v4748_v35  ;;  %v4766_v43 = vmul.f32 1.442695, %v4752_v23 }
 0xf7b   : > { %8516 = vpow2.f32 %v4758_v37 }
 0xf7c   : > { %8518 = vpow2.f32 %v4762_v49 }
 0xf7d   : > { %v10819_v56 = vpop.eup %8514  ;;  %8520 = vpow2.f32 %v4766_v43 }
 0xf7e   : > { %v4773_v13 = vsel %vm4721_vm6, %v10819_v56, 0.0  ;;  %v4733_v52 = vpop.xlane.xlu1 %4732 }
 0xf7f   : > { %4774 = vadd.xlane.f32.xlu1 %v4773_v13 }
 0xf85   : > { %v10823_v48 = vpop.eup %8516 }
 0xf86   : > { %v4776_v5 = vsel %vm4721_vm6, %v10823_v48, 0.0  ;;  %v10827_v58 = vpop.eup %8518  ;;  %v4739_v41 = vpop.xlane.xlu1 %4738 }
 0xf87   : > { %4777 = vadd.xlane.f32.xlu0 %v4776_v5  ;;  %v4782_v44 = vsel %vm4721_vm6, %v10827_v58, 0.0  ;;  %v10831_v28 = vpop.eup %8520  ;;  %v4751_v27 = vsub.f32 %v10806_v57, %v4739_v41 }
 0xf88   : > { %v4788_v30 = vsel %vm4721_vm6, %v10831_v28, 0.0 }
 0xf89   : > { %v4764_v26 = vmul.f32 1.442695, %v4751_v27 }
 0xf8b   : > { %4783 = vadd.xlane.f32.xlu0 %v4782_v44 }
 0xf8f   : > { %4789 = vadd.xlane.f32.xlu0 %v4788_v30 }
 0xf90   : > { %5240 = vrot.lane.b32.xlu1 %v10685_v2, %s8691_s2  ;;  %v4749_v2 = vsub.f32 %v10801_v45, %v4733_v52  ;;  %v12025_v52 = vld [vmem:[#allocation166_spill] sm:$0xff] }
 0xf92   : > { %v4760_v14 = vmul.f32 1.442695, %v4749_v2  ;;  %v10949_v2 = vpack.c.bf16 %v12025_v52, %v12025_v52 }
 0xf94   : > { %8522 = vpow2.f32 %v4760_v14 }
 0xf95   : > { %8524 = vpow2.f32 %v4764_v26  ;;  %v5054_v26 = vsel %vm4822_vm7, %v10949_v2, 0 }
 0xf9e   : > { %v10859_v11 = vpop.eup %8522 }
 0xf9f   : > { %v4779_v45 = vsel %vm4721_vm6, %v10859_v11, 0.0  ;;  %v10865_v57 = vpop.eup %8524 }
 0xfa5   : > { %5190 = vrot.lane.b32.xlu0 %v10666_v6, %s8691_s2  ;;  %v4785_v6 = vsel %vm4721_vm6, %v10865_v57, 0.0 }
 0xfa9   : > { %5238 = vrot.lane.b32.xlu0 %v10719_v19, %s8691_s2  ;;  %v4745_v19 = vpop.xlane.xlu1 %4744 }
 0xfad   : > { %5288 = vrot.lane.b32.xlu0 %v10743_v10, %s8691_s2  ;;  %v4753_v10 = vsub.f32 %v10811_v34, %v4745_v19  ;;  %v12026_v19 = vld [vmem:[#allocation164_spill] sm:$0xff] }
 0xfb1   : > { %5338 = vrot.lane.b32.xlu0 %v10758_v40, %s8691_s2  ;;  %v4768_v40 = vmul.f32 1.442695, %v4753_v10  ;;  %v10963_v10 = vpack.c.bf16 %v12026_v19, %v12026_v19 }
 0xfb3   : > { %8526 = vpow2.f32 %v4768_v40  ;;  %v5146_v40 = vsel %vm4822_vm7, %v10963_v10, 0 }
 0xfb4   : > { %4780 = vadd.xlane.f32.xlu1 %v4779_v45 }
 0xfb5   : > { %5388 = vrot.lane.b32.xlu0 %v10700_v17, %s8691_s2 }
 0xfb8   : > { %4786 = vadd.xlane.f32.xlu1 %v4785_v6 }
 0xfb9   : > { %5438 = vrot.lane.b32.xlu0 %v10773_v54, %s8691_s2  ;;  %v12021_v54 = vld [vmem:[#allocation154_spill] sm:$0xff] }
 0xfba   : > { %v10892_v34 = vpack.c.bf16 %v12021_v54, %v12021_v54 }
 0xfbd   : > { %5488 = vrot.lane.b32.xlu0 %v10726_v39, %s8691_s2  ;;  %v10878_v42 = vpop.eup %8526 }
 0xfbe   : > { %v4791_v17 = vsel %vm4721_vm6, %v10878_v42, 0.0 }
 0xfc9   : > { %5188 = vrot.lane.b32.xlu1 %v10690_v62, %s8691_s2 }
 0xfed   : > { %4792 = vadd.xlane.f32.xlu1 %v4791_v17 }
 0xffe   : > { %5290 = vrot.lane.b32.xlu1 %v10713_v4, %s8691_s2 }
0x1002   : > { %5340 = vrot.lane.b32.xlu1 %v10737_v36, %s8691_s2 }
0x1004   : > { %v4772_v39 = vpop.xlane.xlu0 %4771 }
0x1005   : > { %8528 = vrcp.f32 %v4772_v39 }
0x1006   : > { %5390 = vrot.lane.b32.xlu1 %v10673_v33, %s8691_s2  ;;  %v4916_v33 = vsel %vm4822_vm7, %v10892_v34, 0 }
0x100a   : > { %5440 = vrot.lane.b32.xlu1 %v10754_v32, %s8691_s2 }
0x100c   : > { %v4775_v62 = vpop.xlane.xlu1 %4774 }
0x100d   : > { %8530 = vrcp.f32 %v4775_v62 }
0x100e   : > { %5490 = vrot.lane.b32.xlu1 %v10694_v21, %s8691_s2  ;;  %v12022_v21 = vld [vmem:[#allocation156_spill] sm:$0xff] }
0x100f   : > { %v8529_v4 = vpop.eup %8528  ;;  %v10907_v60 = vpack.c.bf16 %v12022_v21, %v12022_v21 }
0x1010   : > { %v4802_v36 = vmul.f32 %v8529_v4, %v10815_v51  ;;  %v5241_v47 = vpop.permute.xlu1 %5240 }
0x1011   : > { %v4962_v51 = vsel %vm4822_vm7, %v10907_v60, 0 }
0x1012   : > { %v4810_v16 = vpack.c.bf16 %v4802_v36, %v4802_v36  ;;  %5540 = vrot.lane.b32.xlu1 %v10769_v15, %s8691_s2 }
0x1014   : > { %8005 = vmatmul.mubr.msk.bf16.vlgmr.msra.gmra.mrb[8].mxu0 %vm4818_vm8, %v4810_v16  ;;  %v4778_v32 = vpop.xlane.xlu0 %4777 }
0x1015   : > { %8015 = vmatpush3.bf16.msra.mxu0 %v4916_v33  ;;  %8016 = vmatprep.mubr.msk.bf16.mxu0 %vm8690_vm5, %v8689_v63  ;;  %8532 = vrcp.f32 %v4778_v32 }
0x1016   : > { %8026 = vmatprep.subr.bf16.mxu0 %v8689_v63  ;;  %5538 = vrot.lane.b32.xlu1 %v10784_v1, %s8691_s2  ;;  %v10920_v1 = vpack.c.bf16 %v12023_v61, %v12023_v61 }
0x1017   : > { %v8531_v0 = vpop.eup %8530 }
0x1018   : > { %v4803_v15 = vmul.f32 %v8531_v0, %v10819_v56  ;;  %v4784_v9 = vpop.xlane.xlu0 %4783  ;;  %v5008_v37 = vsel %vm4822_vm7, %v10920_v1, 0  ;;  %v12024_v56 = vld [vmem:[#allocation162_spill] sm:$0xff] }
0x1019   : > { %8534 = vrcp.f32 %v4784_v9  ;;  %v10932_v43 = vpack.c.bf16 %v12024_v56, %v12024_v56  ;;  %v5246_v9 = vsel %vm4352_vm4, %v5241_v47, 0 }
0x101a   : > { %v4811_v18 = vpack.c.bf16 %v4803_v15, %v4803_v15 }
0x101c   : > { %8011 = vmatmul.mubr.msk.bf16.vlgmr.msra.gmra.mrb[24].mxu1 %vm4818_vm8, %v4811_v18  ;;  %v4790_v24 = vpop.xlane.xlu0 %4789 }
0x101d   : > { %8021 = vmatpush3.bf16.msra.mxu1 %v4962_v51  ;;  %8022 = vmatprep.mubr.msk.bf16.mxu1 %vm8690_vm5, %v8689_v63  ;;  %8536 = vrcp.f32 %v4790_v24 }
0x101e   : > { %8032 = vmatprep.subr.bf16.mxu1 %v8689_v63 }
0x101f   : > { %v8533_v31 = vpop.eup %8532 }
0x1020   : > { %v4804_v59 = vmul.f32 %v8533_v31, %v10823_v48  ;;  %v5100_v48 = vsel %vm4822_vm7, %v10932_v43, 0 }
0x1022   : > { %v4812_v35 = vpack.c.bf16 %v4804_v59, %v4804_v59 }
0x1023   : > { %v8535_v49 = vpop.eup %8534 }
0x1024   : > { %8017 = vmatmul.mubr.msk.bf16.vlgmr.msra.gmra.mrb[12].mxu0 %vm4818_vm8, %v4812_v35  ;;  %v4806_v23 = vmul.f32 %v8535_v49, %v10827_v58  ;;  %v5191_v58 = vpop.permute.xlu0 %5190 }
0x1025   : > { %8027 = vmatpush3.bf16.msra.mxu0 %v5008_v37  ;;  %8028 = vmatprep.mubr.msk.bf16.mxu0 %vm8690_vm5, %v8689_v63  ;;  %v5196_v12 = vsel %vm4352_vm4, %v5191_v58, 0 }
0x1026   : > { %8038 = vmatprep.subr.bf16.mxu0 %v8689_v63  ;;  %v4814_v13 = vpack.c.bf16 %v4806_v23, %v4806_v23 }
0x1027   : > { %v8537_v5 = vpop.eup %8536 }
0x1028   : > { %v4808_v44 = vmul.f32 %v8537_v5, %v10831_v28  ;;  %v5239_v17 = vpop.permute.xlu0 %5238 }
0x102a   : > { %v4816_v30 = vpack.c.bf16 %v4808_v44, %v4808_v44 }
0x102c   : > { %8029 = vmatmul.mubr.msk.bf16.vlgmr.msra.gmra.mrb[16].mxu0 %vm4818_vm8, %v4814_v13  ;;  %v5289_v62 = vpop.permute.xlu0 %5288 }
0x102d   : > { %8039 = vmatpush3.bf16.msra.mxu0 %v5100_v48  ;;  %8040 = vmatprep.mubr.msk.bf16.mxu0 %vm8690_vm5, %v8689_v63 }
0x102e   : > { %8050 = vmatprep.subr.bf16.mxu0 %v8689_v63 }
0x1030   : > { %v5339_v36 = vpop.permute.xlu0 %5338 }
0x1034   : > { %8041 = vmatmul.mubr.msk.bf16.vlgmr.msra.gmra.mrb[20].mxu0 %vm4818_vm8, %v4816_v30  ;;  %v5389_v15 = vpop.permute.xlu0 %5388 }
0x1035   : > { %8052 = vmatprep.mubr.msk.bf16.mxu0 %vm8690_vm5, %v8689_v63 }
0x1036   : > { %8051 = vmatpush3.bf16.xpose.msra.mxu0 %v5196_v12 }
0x1037   : > { %8062 = vmatprep.subr.bf16.mxu0 %v8689_v63 }
0x1038   : > { %v5439_v51 = vpop.permute.xlu0 %5438 }
0x103c   : > { %v5489_v31 = vpop.permute.xlu0 %5488 }
0x1041   : > { %v4781_v25 = vpop.xlane.xlu1 %4780 }
0x1042   : > { %8538 = vrcp.f32 %v4781_v25 }
0x1045   : > { %v4787_v8 = vpop.xlane.xlu1 %4786 }
0x1046   : > { %8540 = vrcp.f32 %v4787_v8 }
0x1049   : > { %v5189_v28 = vpop.permute.xlu1 %5188 }
0x104a   : > { %8053 = vmatmul.mubr.msk.bf16.vlgmr.msra.gmra.mrb[24].mxu0 %vm4352_vm4, %v5189_v28 }
0x104b   : > { %8064 = vmatprep.mubr.msk.bf16.mxu0 %vm8690_vm5, %v8689_v63 }
0x104c   : > { %v8539_v41 = vpop.eup %8538 }
0x104d   : > { %v4805_v14 = vmul.f32 %v8539_v41, %v10859_v11 }
0x104f   : > { %v4813_v27 = vpack.c.bf16 %v4805_v14, %v4805_v14 }
0x1050   : > { %v8541_v45 = vpop.eup %8540 }
0x1051   : > { %8023 = vmatmul.mubr.msk.bf16.vlgmr.msra.gmra.mrb[28].mxu1 %vm4818_vm8, %v4813_v27  ;;  %v4807_v6 = vmul.f32 %v8541_v45, %v10865_v57 }
0x1052   : > { %8033 = vmatpush3.bf16.msra.mxu1 %v5054_v26  ;;  %8034 = vmatprep.mubr.msk.bf16.mxu1 %vm8690_vm5, %v8689_v63 }
0x1053   : > { %8044 = vmatprep.subr.bf16.mxu1 %v8689_v63  ;;  %v4815_v11 = vpack.c.bf16 %v4807_v6, %v4807_v6 }
0x1059   : > { %8035 = vmatmul.mubr.msk.bf16.vlgmr.msra.gmra.mrb[32].mxu1 %vm4818_vm8, %v4815_v11 }
0x105a   : > { %8045 = vmatpush3.bf16.msra.mxu1 %v5146_v40  ;;  %8046 = vmatprep.mubr.msk.bf16.mxu1 %vm8690_vm5, %v8689_v63 }
0x105b   : > { %8056 = vmatprep.subr.bf16.mxu1 %v8689_v63 }
0x107a   : > { %v4793_v57 = vpop.xlane.xlu1 %4792 }
0x107b   : > { %8542 = vrcp.f32 %v4793_v57 }
0x107e   : > { %v5291_v39 = vpop.permute.xlu1 %5290 }
0x107f   : > { %v5296_v54 = vsel %vm4352_vm4, %v5291_v39, 0 }
0x1080   : > { %8063 = vmatpush3.bf16.xpose.msra.mxu0 %v5296_v54 }
0x1081   : > { %8074 = vmatprep.subr.bf16.mxu0 %v8689_v63 }
0x1082   : > { %v5341_v4 = vpop.permute.xlu1 %5340 }
0x1083   : > { %v5346_v61 = vsel %vm4352_vm4, %v5341_v4, 0 }
0x1085   : > { %v8543_v16 = vpop.eup %8542 }
0x1086   : > { %v4809_v33 = vmul.f32 %v8543_v16, %v10878_v42  ;;  %v5391_v32 = vpop.permute.xlu1 %5390 }
0x1087   : > { %8065 = vmatmul.mubr.msk.bf16.vlgmr.msra.gmra.mrb[28].mxu0 %vm4352_vm4, %v5289_v62  ;;  %v5396_v21 = vsel %vm4352_vm4, %v5391_v32, 0 }
0x1088   : > { %v4817_v0 = vpack.c.bf16 %v4809_v33, %v4809_v33  ;;  %8075 = vmatpush3.bf16.xpose.msra.mxu0 %v5396_v21  ;;  %8076 = vmatprep.mubr.msk.bf16.mxu0 %vm8690_vm5, %v8689_v63 }
0x1089   : > { %8086 = vmatprep.subr.bf16.mxu0 %v8689_v63 }
0x108a   : > { %8047 = vmatmul.mubr.msk.bf16.vlgmr.msra.gmra.mrb[36].mxu1 %vm4818_vm8, %v4817_v0  ;;  %v5441_v18 = vpop.permute.xlu1 %5440 }
0x108b   : > { %8057 = vmatpush3.bf16.xpose.msra.mxu1 %v5246_v9  ;;  %8058 = vmatprep.mubr.msk.bf16.mxu1 %vm8690_vm5, %v8689_v63  ;;  %v5446_v59 = vsel %vm4352_vm4, %v5441_v18, 0 }
0x108c   : > { %8068 = vmatprep.subr.bf16.mxu1 %v8689_v63 }
0x108e   : > { %v5491_v42 = vpop.permute.xlu1 %5490 }
0x108f   : > { %v5496_v24 = vsel %vm4352_vm4, %v5491_v42, 0  ;;  %8077 = vmatmul.mubr.msk.bf16.vlgmr.msra.gmra.mrb[32].mxu0 %vm4352_vm4, %v5389_v15 }
0x1090   : > { %8087 = vmatpush3.bf16.xpose.msra.mxu0 %v5496_v24  ;;  %8088 = vmatprep.mubr.msk.bf16.mxu0 %vm8690_vm5, %v8689_v63 }
0x1091   : > { %8098 = vmatprep.subr.bf16.mxu0 %v8689_v63 }
0x1092   : > { %8059 = vmatmul.mubr.msk.bf16.vlgmr.msra.gmra.mrb[40].mxu1 %vm4352_vm4, %v5239_v17  ;;  %v5541_v35 = vpop.permute.xlu1 %5540 }
0x1093   : > { %8069 = vmatpush3.bf16.xpose.msra.mxu1 %v5346_v61  ;;  %8070 = vmatprep.mubr.msk.bf16.mxu1 %vm8690_vm5, %v8689_v63  ;;  %v5546_v37 = vsel %vm4352_vm4, %v5541_v35, 0 }
0x1094   : > { %8080 = vmatprep.subr.bf16.mxu1 %v8689_v63 }
0x1096   : > { %v5539_v49 = vpop.permute.xlu1 %5538 }
0x1097   : > { %8089 = vmatmul.mubr.msk.bf16.vlgmr.msra.gmra.mrb[36].mxu0 %vm4352_vm4, %v5489_v31 }
0x1098   : > { %8100 = vmatprep.mubr.msk.bf16.mxu0 %vm8690_vm5, %v8689_v63 }
0x109a   : > { %8071 = vmatmul.mubr.msk.bf16.vlgmr.msra.gmra.mrb[44].mxu1 %vm4352_vm4, %v5339_v36 }
0x109b   : > { %8081 = vmatpush3.bf16.xpose.msra.mxu1 %v5446_v59  ;;  %8082 = vmatprep.mubr.msk.bf16.mxu1 %vm8690_vm5, %v8689_v63 }
0x109c   : > { %8092 = vmatprep.subr.bf16.mxu1 %v8689_v63 }
0x10a2   : > { %8083 = vmatmul.mubr.msk.bf16.vlgmr.msra.gmra.mrb[48].mxu1 %vm4352_vm4, %v5439_v51 }
0x10a3   : > { %8093 = vmatpush3.bf16.xpose.msra.mxu1 %v5546_v37  ;;  %8094 = vmatprep.mubr.msk.bf16.mxu1 %vm8690_vm5, %v8689_v63 }
0x10a4   : > { %8104 = vmatprep.subr.bf16.mxu1 %v8689_v63 }
0x10aa   : > { %8095 = vmatmul.mubr.msk.bf16.vlgmr.msra.gmra.mrb[52].mxu1 %vm4352_vm4, %v5539_v49 }
0x10ab   : > { %8106 = vmatprep.mubr.msk.bf16.mxu1 %vm8690_vm5, %v8689_v63 }
0x10e7   : > { %v11010_v23 = vpop.f32.mrb[8].mxu0 }
0x10e8   : > { %v8006_v56 = vpop.f32.mrb[9].mxu0 }
0x10e9   : > { %v4863_v13 = vpop.f32.mrb[10].mxu0 }
0x10ea   : > { %v8007_v48 = vpop.f32.mrb[11].mxu0 }
0x10ef   : > { %v11012_v5 = vpop.f32.mrb[24].mxu1 }
0x10f0   : > { %v8012_v44 = vpop.f32.mrb[25].mxu1 }
0x10f1   : > { %v4909_v58 = vpop.f32.mrb[26].mxu1 }
0x10f2   : > { %v8013_v30 = vpop.f32.mrb[27].mxu1 }
0x10f7   : > { %v11014_v12 = vpop.f32.mrb[12].mxu0 }
0x10f8   : > { %v8018_v47 = vpop.f32.mrb[13].mxu0 }
0x10f9   : > { %v4955_v25 = vpop.f32.mrb[14].mxu0 }
0x10fa   : > { %v8019_v8 = vpop.f32.mrb[15].mxu0 }
0x10ff   : > { %v11016_v28 = vpop.f32.mrb[16].mxu0 }
0x1100   : > { %v8030_v52 = vpop.f32.mrb[17].mxu0 }
0x1101   : > { %v5047_v41 = vpop.f32.mrb[18].mxu0 }
0x1102   : > { %v8031_v14 = vpop.f32.mrb[19].mxu0 }
0x1107   : > { %v11018_v27 = vpop.f32.mrb[20].mxu0 }
0x1108   : > { %v8042_v26 = vpop.f32.mrb[21].mxu0 }
0x1109   : > { %v5139_v45 = vpop.f32.mrb[22].mxu0 }
0x110a   : > { %v8043_v6 = vpop.f32.mrb[23].mxu0 }
0x111d   : > { %v5232_v19 = vpop.f32.mrb[24].mxu0 }
0x111e   : > { %v11021_v11 = vadd.f32 %v5232_v19, %v12011_v29  ;;  %v8054_v40 = vpop.f32.mrb[25].mxu0 }
0x111f   : > { %v5235_v17 = vpop.f32.mrb[26].mxu0 }
0x1120   : > { %v8055_v57 = vpop.f32.mrb[27].mxu0  ;;  %v5588_v39 = vsel %vm4721_vm6, %v11021_v11, -inf }
0x1121   : > { %5589 = vmax.xlane.f32.xlu0 %v5588_v39 }
0x1124   : > { %v11025_v62 = vpop.f32.mrb[28].mxu1 }
0x1125   : > { %v8024_v54 = vpop.f32.mrb[29].mxu1 }
0x1126   : > { %v5001_v4 = vpop.f32.mrb[30].mxu1 }
0x1127   : > { %v8025_v36 = vpop.f32.mrb[31].mxu1 }
0x112c   : > { %v11027_v16 = vpop.f32.mrb[32].mxu1 }
0x112d   : > { %v8036_v33 = vpop.f32.mrb[33].mxu1 }
0x112e   : > { %v5093_v32 = vpop.f32.mrb[34].mxu1 }
0x112f   : > { %v8037_v21 = vpop.f32.mrb[35].mxu1 }
0x115a   : > { %v5332_v0 = vpop.f32.mrb[28].mxu0 }
0x115b   : > { %v11030_v29 = vadd.f32 %v5332_v0, %v12015_v22  ;;  %v8066_v15 = vpop.f32.mrb[29].mxu0 }
0x115c   : > { %v5335_v9 = vpop.f32.mrb[30].mxu0 }
0x115d   : > { %v11032_v18 = vpop.f32.mrb[36].mxu1  ;;  %v5594_v42 = vsel %vm4721_vm6, %v11030_v29, -inf  ;;  %v8067_v51 = vpop.f32.mrb[31].mxu0 }
0x115e   : > { %5595 = vmax.xlane.f32.xlu0 %v5594_v42  ;;  %v8048_v24 = vpop.f32.mrb[37].mxu1 }
0x115f   : > { %v5185_v61 = vpop.f32.mrb[38].mxu1 }
0x1160   : > { %v8049_v31 = vpop.f32.mrb[39].mxu1 }
0x1162   : > { %v5432_v59 = vpop.f32.mrb[32].mxu0 }
0x1163   : > { %v8078_v35 = vpop.f32.mrb[33].mxu0  ;;  %v11042_v26 = vadd.f32 %v5432_v59, %v12013_v3 }
0x1164   : > { %v5435_v37 = vpop.f32.mrb[34].mxu0 }
0x1165   : > { %v5282_v49 = vpop.f32.mrb[40].mxu1  ;;  %v8079_v56 = vpop.f32.mrb[35].mxu0  ;;  %v5600_v40 = vsel %vm4721_vm6, %v11042_v26, -inf }
0x1166   : > { %v5283_v22 = vadd.f32 %v5282_v49, %v12012_v7  ;;  %v8060_v13 = vpop.f32.mrb[41].mxu1 }
0x1167   : > { %v5285_v48 = vpop.f32.mrb[42].mxu1 }
0x1168   : > { %v8061_v44 = vpop.f32.mrb[43].mxu1  ;;  %v5591_v58 = vsel %vm4721_vm6, %v5283_v22, -inf }
0x1169   : > { %5592 = vmax.xlane.f32.xlu1 %v5591_v58 }
0x116a   : > { %v5532_v30 = vpop.f32.mrb[36].mxu0 }
0x116b   : > { %v8090_v47 = vpop.f32.mrb[37].mxu0  ;;  %v5533_v19 = vadd.f32 %v5532_v30, %v12014_v53 }
0x116c   : > { %v5535_v25 = vpop.f32.mrb[38].mxu0 }
0x116d   : > { %v5382_v8 = vpop.f32.mrb[44].mxu1  ;;  %v8091_v52 = vpop.f32.mrb[39].mxu0  ;;  %v5606_v3 = vsel %vm4721_vm6, %v5533_v19, -inf }
0x116e   : > { %v11039_v41 = vadd.f32 %v5382_v8, %v12016_v55  ;;  %v8072_v14 = vpop.f32.mrb[45].mxu1 }
0x116f   : > { %v5385_v45 = vpop.f32.mrb[46].mxu1 }
0x1170   : > { %v8073_v7 = vpop.f32.mrb[47].mxu1  ;;  %v5597_v6 = vsel %vm4721_vm6, %v11039_v41, -inf }
0x1171   : > { %5598 = vmax.xlane.f32.xlu0 %v5597_v6 }
0x1175   : > { %5601 = vmax.xlane.f32.xlu0 %v5600_v40  ;;  %v5482_v17 = vpop.f32.mrb[48].mxu1 }
0x1176   : > { %v11050_v55 = vadd.f32 %v5482_v17, %v12017_v46  ;;  %v8084_v57 = vpop.f32.mrb[49].mxu1 }
0x1177   : > { %v5485_v39 = vpop.f32.mrb[50].mxu1 }
0x1178   : > { %v8085_v54 = vpop.f32.mrb[51].mxu1  ;;  %v5603_v4 = vsel %vm4721_vm6, %v11050_v55, -inf }
0x1179   : > { %5607 = vmax.xlane.f32.xlu0 %v5606_v3  ;;  %5604 = vmax.xlane.f32.xlu1 %v5603_v4 }
0x117d   : > { %v5582_v36 = vpop.f32.mrb[52].mxu1 }
0x117e   : > { %v8096_v53 = vpop.f32.mrb[53].mxu1  ;;  %v11062_v46 = vadd.f32 %v5582_v36, %v12018_v50 }
0x117f   : > { %v5585_v33 = vpop.f32.mrb[54].mxu1 }
0x1180   : > { %v8097_v32 = vpop.f32.mrb[55].mxu1  ;;  %v5609_v15 = vsel %vm4721_vm6, %v11062_v46, -inf }
0x118a   : > { %5732 = vrot.lane.b32.xlu1 %v10846_v38, %s8691_s2 }
0x118e   : > { %5780 = vrot.lane.b32.xlu1 %v10892_v34, %s8691_s2 }
0x118f   : > { %5684 = vrot.lane.b32.xlu0 %v10837_v20, %s8691_s2 }
0x11ae   : > { %v5590_v21 = vpop.xlane.xlu0 %5589 }
0x11af   : > { %v5612_v0 = vsub.f32 %v11021_v11, %v5590_v21 }
0x11b1   : > { %v5620_v9 = vmul.f32 1.442695, %v5612_v0 }
0x11b2   : > { %5610 = vmax.xlane.f32.xlu1 %v5609_v15 }
0x11b3   : > { %8544 = vpow2.f32 %v5620_v9 }
0x11bd   : > { %v11067_v42 = vpop.eup %8544 }
0x11be   : > { %v5636_v38 = vsel %vm4721_vm6, %v11067_v42, 0.0 }
0x11bf   : > { %5637 = vadd.xlane.f32.xlu0 %v5636_v38 }
0x11c3   : > { %5828 = vrot.lane.b32.xlu1 %v10907_v60, %s8691_s2 }
0x11eb   : > { %v5596_v50 = vpop.xlane.xlu0 %5595 }
0x11ec   : > { %v5614_v20 = vsub.f32 %v11030_v29, %v5596_v50 }
0x11ee   : > { %v5624_v34 = vmul.f32 1.442695, %v5614_v20 }
0x11f0   : > { %8546 = vpow2.f32 %v5624_v34 }
0x11f6   : > { %v5593_v11 = vpop.xlane.xlu1 %5592 }
0x11f7   : > { %v5613_v51 = vsub.f32 %v5283_v22, %v5593_v11 }
0x11f9   : > { %v5622_v24 = vmul.f32 1.442695, %v5613_v51 }
0x11fa   : > { %v11074_v61 = vpop.eup %8546 }
0x11fb   : > { %8548 = vpow2.f32 %v5622_v24  ;;  %v5642_v31 = vsel %vm4721_vm6, %v11074_v61, 0.0 }
0x11fc   : > { %5643 = vadd.xlane.f32.xlu0 %v5642_v31 }
0x11fe   : > { %v5599_v59 = vpop.xlane.xlu0 %5598 }
0x11ff   : > { %v5615_v25 = vsub.f32 %v11039_v41, %v5599_v59 }
0x1201   : > { %v5626_v8 = vmul.f32 1.442695, %v5615_v25 }
0x1202   : > { %v5602_v35 = vpop.xlane.xlu0 %5601 }
0x1203   : > { %v5616_v44 = vsub.f32 %v11042_v26, %v5602_v35 }
0x1205   : > { %v11078_v37 = vpop.eup %8548  ;;  %v5628_v58 = vmul.f32 1.442695, %v5616_v44 }
0x1206   : > { %v5608_v60 = vpop.xlane.xlu0 %5607  ;;  %v5605_v49 = vpop.xlane.xlu1 %5604  ;;  %v5639_v29 = vsel %vm4721_vm6, %v11078_v37, 0.0 }
0x1207   : > { %5640 = vadd.xlane.f32.xlu1 %v5639_v29  ;;  %v5618_v30 = vsub.f32 %v5533_v19, %v5608_v60  ;;  %8550 = vpow2.f32 %v5628_v58  ;;  %v5617_v52 = vsub.f32 %v11050_v55, %v5605_v49 }
0x1209   : > { %v5632_v47 = vmul.f32 1.442695, %v5618_v30  ;;  %v5630_v45 = vmul.f32 1.442695, %v5617_v52 }
0x120a   : > { %v5733_v56 = vpop.permute.xlu1 %5732  ;;  %v5685_v22 = vpop.permute.xlu0 %5684 }
0x120b   : > { %v5738_v13 = vsel %vm4822_vm7, %v5733_v56, 0  ;;  %v5690_v48 = vsel %vm4822_vm7, %v5685_v22, 0  ;;  %8552 = vpow2.f32 %v5632_v47 }
0x120c   : > { %8105 = vmatpush3.bf16.msra.mxu1 %v5738_v13  ;;  %8099 = vmatpush3.bf16.msra.mxu0 %v5690_v48  ;;  %8554 = vpow2.f32 %v5626_v8 }
0x120d   : > { %8110 = vmatprep.subr.bf16.mxu0 %v8689_v63  ;;  %8116 = vmatprep.subr.bf16.mxu1 %v8689_v63  ;;  %8556 = vpow2.f32 %v5630_v45 }
0x120e   : > { %v5781_v7 = vpop.permute.xlu1 %5780 }
0x120f   : > { %v5786_v33 = vsel %vm4822_vm7, %v5781_v7, 0 }
0x1211   : > { %v11093_v14 = vpop.eup %8550 }
0x1212   : > { %5876 = vrot.lane.b32.xlu0 %v10920_v1, %s8691_s2  ;;  %v5648_v1 = vsel %vm4721_vm6, %v11093_v14, 0.0 }
0x1218   : > { %5924 = vrot.lane.b32.xlu1 %v10949_v2, %s8691_s2  ;;  %v11097_v2 = vpop.eup %8552 }
0x1219   : > { %v5654_v26 = vsel %vm4721_vm6, %v11097_v2, 0.0  ;;  %v11101_v41 = vpop.eup %8554 }
0x121a   : > { %v5645_v6 = vsel %vm4721_vm6, %v11101_v41, 0.0  ;;  %v11105_v19 = vpop.eup %8556 }
0x121b   : > { %v5651_v17 = vsel %vm4721_vm6, %v11105_v19, 0.0 }
0x1231   : > { %5649 = vadd.xlane.f32.xlu0 %v5648_v1 }
0x1235   : > { %5655 = vadd.xlane.f32.xlu0 %v5654_v26 }
0x123c   : > { %5646 = vadd.xlane.f32.xlu1 %v5645_v6 }
0x123f   : > { %v5611_v40 = vpop.xlane.xlu1 %5610 }
0x1240   : > { %v5619_v55 = vsub.f32 %v11062_v46, %v5611_v40  ;;  %5652 = vadd.xlane.f32.xlu1 %v5651_v17 }
0x1242   : > { %v5634_v57 = vmul.f32 1.442695, %v5619_v55 }
0x1243   : > { %v5829_v32 = vpop.permute.xlu1 %5828 }
0x1244   : > { %8558 = vpow2.f32 %v5634_v57  ;;  %v5834_v20 = vsel %vm4822_vm7, %v5829_v32, 0 }
0x124b   : > { %5972 = vrot.lane.b32.xlu0 %v10932_v43, %s8691_s2 }
0x124c   : > { %v5638_v3 = vpop.xlane.xlu0 %5637 }
0x124d   : > { %8560 = vrcp.f32 %v5638_v3 }
0x124e   : > { %v11112_v39 = vpop.eup %8558 }
0x124f   : > { %v5657_v54 = vsel %vm4721_vm6, %v11112_v39, 0.0 }
0x1250   : > { %5658 = vadd.xlane.f32.xlu1 %v5657_v54 }
0x1257   : > { %v8561_v4 = vpop.eup %8560 }
0x1258   : > { %v5668_v36 = vmul.f32 %v8561_v4, %v11067_v42 }
0x125a   : > { %v5676_v53 = vpack.c.bf16 %v5668_v36, %v5668_v36 }
0x125c   : > { %8101 = vmatmul.mubr.msk.bf16.vlgmr.msra.gmra.mrb[40].mxu0 %vm4818_vm8, %v5676_v53 }
0x125d   : > { %8111 = vmatpush3.bf16.msra.mxu0 %v5786_v33  ;;  %8112 = vmatprep.mubr.msk.bf16.mxu0 %vm8690_vm5, %v8689_v63  ;;  %v12027_v33 = vld [vmem:[#allocation34_spill] sm:$0xff] }
0x125e   : > { %8122 = vmatprep.subr.bf16.mxu0 %v8689_v63 }
0x1261   : > { %6020 = vrot.lane.b32.xlu1 %v10963_v10, %s8691_s2 }
0x1289   : > { %v5644_v43 = vpop.xlane.xlu0 %5643 }
0x128a   : > { %8562 = vrcp.f32 %v5644_v43  ;;  %v12028_v43 = vld [vmem:[#allocation33_spill] sm:$0xff] }
0x128b   : > { %v7302_v32 = vcombine.low %v12028_v43, %v12027_v33 }
0x128d   : > { %v5877_v0 = vpop.permute.xlu0 %5876 }
0x128e   : > { %v5882_v42 = vsel %vm4822_vm7, %v5877_v0, 0  ;;  %v12030_v0 = vld [vmem:[#allocation35_spill] sm:$0xff] }
0x1294   : > { %v8563_v46 = vpop.eup %8562  ;;  %v5641_v21 = vpop.xlane.xlu1 %5640 }
0x1295   : > { %v5670_v15 = vmul.f32 %v8563_v46, %v11074_v61  ;;  %8564 = vrcp.f32 %v5641_v21  ;;  %v12029_v21 = vld [vmem:[#allocation36_spill] sm:$0xff] }
0x1297   : > { %v5678_v9 = vpack.c.bf16 %v5670_v15, %v5670_v15  ;;  %v7303_v15 = vcombine.low %v12030_v0, %v12029_v21 }
0x1298   : > { %v5925_v51 = vpop.permute.xlu1 %5924 }
0x1299   : > { %8113 = vmatmul.mubr.msk.bf16.vlgmr.msra.gmra.mrb[44].mxu0 %vm4818_vm8, %v5678_v9  ;;  %v5930_v58 = vsel %vm4822_vm7, %v5925_v51, 0 }
0x129a   : > { %8123 = vmatpush3.bf16.msra.mxu0 %v5882_v42  ;;  %8124 = vmatprep.mubr.msk.bf16.mxu0 %vm8690_vm5, %v8689_v63 }
0x129b   : > { %8134 = vmatprep.subr.bf16.mxu0 %v8689_v63 }
0x129f   : > { %v8565_v10 = vpop.eup %8564 }
0x12a0   : > { %v5669_v38 = vmul.f32 %v8565_v10, %v11078_v37 }
0x12a2   : > { %v5677_v50 = vpack.c.bf16 %v5669_v38, %v5669_v38  ;;  %v12031_v38 = vld [vmem:[#allocation38_spill] sm:$0xff] }
0x12a4   : > { %8107 = vmatmul.mubr.msk.bf16.vlgmr.msra.gmra.mrb[56].mxu1 %vm4818_vm8, %v5677_v50  ;;  %v12032_v50 = vld [vmem:[#allocation37_spill] sm:$0xff] }
0x12a5   : > { %8117 = vmatpush3.bf16.msra.mxu1 %v5834_v20  ;;  %8118 = vmatprep.mubr.msk.bf16.mxu1 %vm8690_vm5, %v8689_v63  ;;  %v7304_v20 = vcombine.low %v12032_v50, %v12031_v38 }
0x12a6   : > { %8128 = vmatprep.subr.bf16.mxu1 %v8689_v63 }
0x12be   : > { %v5650_v34 = vpop.xlane.xlu0 %5649 }
0x12bf   : > { %8566 = vrcp.f32 %v5650_v34 }
0x12c2   : > { %v5656_v11 = vpop.xlane.xlu0 %5655 }
0x12c3   : > { %8568 = vrcp.f32 %v5656_v11 }
0x12c6   : > { %v5973_v31 = vpop.permute.xlu0 %5972 }
0x12c7   : > { %v5978_v37 = vsel %vm4822_vm7, %v5973_v31, 0 }
0x12c9   : > { %v8567_v24 = vpop.eup %8566  ;;  %v5647_v61 = vpop.xlane.xlu1 %5646 }
0x12ca   : > { %v5672_v59 = vmul.f32 %v8567_v24, %v11093_v14  ;;  %8570 = vrcp.f32 %v5647_v61 }
0x12cc   : > { %v5680_v35 = vpack.c.bf16 %v5672_v59, %v5672_v59  ;;  %v12033_v59 = vld [vmem:[#allocation40_spill] sm:$0xff] }
0x12cd   : > { %v8569_v60 = vpop.eup %8568  ;;  %v5653_v49 = vpop.xlane.xlu1 %5652 }
0x12ce   : > { %8572 = vrcp.f32 %v5653_v49  ;;  %8125 = vmatmul.mubr.msk.bf16.vlgmr.msra.gmra.mrb[48].mxu0 %vm4818_vm8, %v5680_v35  ;;  %v5674_v29 = vmul.f32 %v8569_v60, %v11097_v2  ;;  %v12034_v35 = vld [vmem:[#allocation39_spill] sm:$0xff]  ;;  %v12035_v60 = vld [vmem:[#allocation42_spill] sm:$0xff]  ;;  %v12036_v49 = vld [vmem:[#allocation41_spill] sm:$0xff] }
0x12cf   : > { %8135 = vmatpush3.bf16.msra.mxu0 %v5978_v37  ;;  %8136 = vmatprep.mubr.msk.bf16.mxu0 %vm8690_vm5, %v8689_v63  ;;  %v7305_v37 = vcombine.low %v12034_v35, %v12033_v59 }
0x12d0   : > { %8146 = vmatprep.subr.bf16.mxu0 %v8689_v63  ;;  %v5682_v22 = vpack.c.bf16 %v5674_v29, %v5674_v29  ;;  %v7306_v29 = vcombine.low %v12036_v49, %v12035_v60 }
0x12d4   : > { %v8571_v56 = vpop.eup %8570 }
0x12d5   : > { %v5671_v13 = vmul.f32 %v8571_v56, %v11101_v41 }
0x12d6   : > { %8137 = vmatmul.mubr.msk.bf16.vlgmr.msra.gmra.mrb[52].mxu0 %vm4818_vm8, %v5682_v22 }
0x12d7   : > { %v5679_v48 = vpack.c.bf16 %v5671_v13, %v5671_v13  ;;  %8162 = vmatprep.mubr.msk.bf16.mxu0 %vm8690_vm5, %v8689_v63  ;;  %8147 = vmatpush3.bf16.msra.mxu0 %v7302_v32 }
0x12d8   : > { %v8573_v44 = vpop.eup %8572  ;;  %8148 = vmatprep.subr.bf16.mxu0 %v8689_v63 }
0x12d9   : > { %8119 = vmatmul.mubr.msk.bf16.vlgmr.msra.gmra.mrb[60].mxu1 %vm4818_vm8, %v5679_v48  ;;  %v5673_v30 = vmul.f32 %v8573_v44, %v11105_v19 }
0x12da   : > { %8129 = vmatpush3.bf16.msra.mxu1 %v5930_v58  ;;  %8130 = vmatprep.mubr.msk.bf16.mxu1 %vm8690_vm5, %v8689_v63  ;;  %v12037_v58 = vld [vmem:[#allocation44_spill] sm:$0xff] }
0x12db   : > { %8140 = vmatprep.subr.bf16.mxu1 %v8689_v63  ;;  %v5681_v25 = vpack.c.bf16 %v5673_v30, %v5673_v30  ;;  %8149 = vmatpush3.bf16.msra.mxu0 %v7303_v15  ;;  %v12038_v30 = vld [vmem:[#allocation43_spill] sm:$0xff] }
0x12dc   : > { %8150 = vmatprep.subr.bf16.mxu0 %v8689_v63 }
0x12dd   : > { %v5659_v47 = vpop.xlane.xlu1 %5658 }
0x12de   : > { %8574 = vrcp.f32 %v5659_v47  ;;  %v7307_v47 = vcombine.low %v12038_v30, %v12037_v58 }
0x12df   : > { %8151 = vmatpush3.bf16.msra.mxu0 %v7304_v20 }
0x12e0   : > { %8152 = vmatprep.subr.bf16.mxu0 %v8689_v63 }
0x12e1   : > { %8131 = vmatmul.mubr.msk.bf16.vlgmr.msra.gmra.mrb[64].mxu1 %vm4818_vm8, %v5681_v25  ;;  %v6021_v8 = vpop.permute.xlu1 %6020  ;;  %v12039_v25 = vld [vmem:[#allocation46_spill] sm:$0xff] }
0x12e2   : > { %v6026_v52 = vsel %vm4822_vm7, %v6021_v8, 0  ;;  %8142 = vmatprep.mubr.msk.bf16.mxu1 %vm8690_vm5, %v8689_v63  ;;  %v12040_v8 = vld [vmem:[#allocation45_spill] sm:$0xff] }
0x12e3   : > { %8141 = vmatpush3.bf16.msra.mxu1 %v6026_v52  ;;  %8153 = vmatpush3.bf16.msra.mxu0 %v7305_v37  ;;  %v7308_v52 = vcombine.low %v12040_v8, %v12039_v25  ;;  %v12043_v25 = vld [vmem:[#allocation26_spill] sm:$0xff] }
0x12e4   : > { %8154 = vmatprep.subr.bf16.mxu0 %v8689_v63  ;;  %v6255_v8 = vrot.slane %v12043_v25, 7 }
0x12e7   : > { %8155 = vmatpush3.bf16.msra.mxu0 %v7306_v29 }
0x12e8   : > { %v8575_v14 = vpop.eup %8574  ;;  %8156 = vmatprep.subr.bf16.mxu0 %v8689_v63 }
0x12e9   : > { %v5675_v45 = vmul.f32 %v8575_v14, %v11112_v39  ;;  %v12041_v14 = vld [vmem:[#allocation48_spill] sm:$0xff] }
0x12eb   : > { %v5683_v1 = vpack.c.bf16 %v5675_v45, %v5675_v45  ;;  %8157 = vmatpush3.bf16.msra.mxu0 %v7307_v47  ;;  %v12042_v45 = vld [vmem:[#allocation47_spill] sm:$0xff] }
0x12ec   : > { %8158 = vmatprep.subr.bf16.mxu0 %v8689_v63 }
0x12ed   : > { %8143 = vmatmul.mubr.msk.bf16.vlgmr.msra.gmra.mrb[68].mxu1 %vm4818_vm8, %v5683_v1  ;;  %v7309_v1 = vcombine.low %v12042_v45, %v12041_v14  ;;  %v12045_v14 = vld [vmem:[#allocation25_spill] sm:$0xff]  ;;  %v12046_v45 = vld [vmem:[#allocation28_spill] sm:$0xff] }
0x12ef   : > { %8159 = vmatpush3.bf16.msra.mxu0 %v7308_v52 }
0x12f0   : > { %8160 = vmatprep.subr.bf16.mxu0 %v8689_v63 }
0x12f3   : > { %8161 = vmatpush3.bf16.msra.mxu0 %v7309_v1  ;;  %v6259_v1 = vrot.slane %v12046_v45, 5  ;;  %v12071_v45 = vld [vmem:[#allocation68_spill] sm:$0xff] }
0x132f   : > { %v5726_v2 = vpop.f32.mrb[40].mxu0 }
0x1330   : > { %v8102_v26 = vpop.f32.mrb[41].mxu0 }
0x1331   : > { %v5729_v41 = vpop.f32.mrb[42].mxu0 }
0x1332   : > { %v8103_v7 = vpop.f32.mrb[43].mxu0 }
0x136c   : > { %v5822_v6 = vpop.f32.mrb[44].mxu0 }
0x136d   : > { %v8114_v19 = vpop.f32.mrb[45].mxu0 }
0x136e   : > { %v5825_v40 = vpop.f32.mrb[46].mxu0 }
0x136f   : > { %v8115_v17 = vpop.f32.mrb[47].mxu0 }
0x1377   : > { %v5774_v55 = vpop.f32.mrb[56].mxu1 }
0x1378   : > { %v8492_v57 = vpack.i.bf16 %v5822_v6, %v5774_v55  ;;  %v8108_v3 = vpop.f32.mrb[57].mxu1 }
0x1379   : > { %v5777_v54 = vpop.f32.mrb[58].mxu1 }
0x137a   : > { %8493 = vrot.lane.b32.xlu0 %v8492_v57, %s8691_s2  ;;  %v8109_v4 = vpop.f32.mrb[59].mxu1 }
0x13a1   : > { %v5918_v36 = vpop.f32.mrb[48].mxu0 }
0x13a2   : > { %v8126_v39 = vpop.f32.mrb[49].mxu0 }
0x13a3   : > { %v5921_v53 = vpop.f32.mrb[50].mxu0 }
0x13a4   : > { %v8127_v46 = vpop.f32.mrb[51].mxu0 }
0x13a9   : > { %v6014_v9 = vpop.f32.mrb[52].mxu0 }
0x13aa   : > { %v8138_v42 = vpop.f32.mrb[53].mxu0 }
0x13ab   : > { %v6017_v10 = vpop.f32.mrb[54].mxu0 }
0x13ac   : > { %v5870_v34 = vpop.f32.mrb[60].mxu1  ;;  %v8139_v11 = vpop.f32.mrb[55].mxu0 }
0x13ad   : > { %v8497_v51 = vpack.i.bf16 %v5870_v34, %v5726_v2  ;;  %v8120_v24 = vpop.f32.mrb[61].mxu1 }
0x13ae   : > { %v5873_v61 = vpop.f32.mrb[62].mxu1 }
0x13af   : > { %8498 = vrot.lane.b32.xlu1 %v8497_v51, %s8691_s2  ;;  %v8121_v31 = vpop.f32.mrb[63].mxu1 }
0x13b4   : > { %v5966_v56 = vpop.f32.mrb[64].mxu1 }
0x13b5   : > { %v8502_v22 = vpack.i.bf16 %v5966_v56, %v5918_v36  ;;  %v8132_v13 = vpop.f32.mrb[65].mxu1 }
0x13b6   : > { %v5969_v48 = vpop.f32.mrb[66].mxu1 }
0x13b7   : > { %8503 = vrot.lane.b32.xlu0 %v8502_v22, %s8691_s2  ;;  %v8133_v44 = vpop.f32.mrb[67].mxu1 }
0x13c0   : > { %v6062_v2 = vpop.f32.mrb[68].mxu1 }
0x13c1   : > { %v8507_v26 = vpack.i.bf16 %v6062_v2, %v6014_v9  ;;  %v8144_v41 = vpop.f32.mrb[69].mxu1 }
0x13c2   : > { %v6065_v7 = vpop.f32.mrb[70].mxu1 }
0x13c3   : > { %8508 = vrot.lane.b32.xlu1 %v8507_v26, %s8691_s2  ;;  %v8145_v6 = vpop.f32.mrb[71].mxu1  ;;  %v12047_v26 = vld [vmem:[#allocation29_spill] sm:$0xff] }
0x13c4   : > { %v6261_v41 = vrot.slane %v12047_v26, 4  ;;  %v12048_v6 = vld [vmem:[#allocation30_spill] sm:$0xff] }
0x13ec   : > { %v8494_v19 = vpop.permute.xlu0 %8493 }
0x13ed   : > { %v8495_v40 = vunpack.i.l.bf16 %v8494_v19  ;;  %v8496_v17 = vunpack.i.h.bf16 %v8494_v19  ;;  %v6263_v19 = vrot.slane %v12048_v6, 3  ;;  %v12074_v6 = vld [vmem:[#allocation69_spill] sm:$0xff] }
0x13ef   : > { %v6101_v55 = vsel %vm4352_vm4, %v11012_v5, %v8495_v40  ;;  %v6102_v57 = vsel %vm4352_vm4, %v11014_v12, %v8496_v17  ;;  %v12049_v17 = vld [vmem:[#allocation31_spill] sm:$0xff] }
0x13f0   : > { %v6109_v3 = vpack.c.bf16 %v6101_v55, %v6101_v55  ;;  %v6110_v54 = vpack.c.bf16 %v6102_v57, %v6102_v57  ;;  %v6265_v55 = vrot.slane %v12049_v17, 2  ;;  %v12076_v17 = vld [vmem:[#allocation70_spill] sm:$0xff] }
0x13f2   : > { %v6129_v39 = vunpack.c.l.b16 %v6109_v3  ;;  %v6130_v53 = vunpack.c.l.b16 %v6110_v54  ;;  %v12050_v3 = vld [vmem:[#allocation32_spill] sm:$0xff] }
0x13f3   : > { %v6267_v54 = vrot.slane %v12050_v3, 1 }
0x13f4   : > { %v6136_v5 = vrot.slane %v6129_v39, 7  ;;  %v6139_v0 = vrot.slane %v6130_v53, 6 }
0x1421   : > { %v8499_v63 = vpop.permute.xlu1 %8498 }
0x1422   : > { %v8501_v4 = vunpack.i.h.bf16 %v8499_v63  ;;  %v8500_v36 = vunpack.i.l.bf16 %v8499_v63  ;;  %v12051_v63 = vld [vmem:[#allocation147_spill] sm:$0xff] }
0x1424   : > { %v6103_v33 = vsel %vm4352_vm4, %v11025_v62, %v8501_v4  ;;  %v6100_v43 = vsel %vm4352_vm4, %v11010_v23, %v8500_v36  ;;  %v12052_v4 = vld [vmem:[#allocation16_spill] sm:$0xff] }
0x1425   : > { %v6111_v32 = vpack.c.bf16 %v6103_v33, %v6103_v33  ;;  %v6108_v46 = vpack.c.bf16 %v6100_v43, %v6100_v43  ;;  %v6119_v36 = vrot.slane %v12052_v4, %v12051_v63 }
0x1427   : > { %v6131_v21 = vunpack.c.l.b16 %v6111_v32  ;;  %v6128_v12 = vunpack.c.l.b16 %v6108_v46 }
0x1429   : > { %v6142_v15 = vrot.slane %v6131_v21, 5  ;;  %v6138_v9 = vsel %vm6137_vm9, %v6136_v5, %v6128_v12  ;;  %v8504_v42 = vpop.permute.xlu0 %8503  ;;  %v12053_v12 = vld [vmem:[#allocation51_spill] sm:$0xff] }
0x142a   : > { %v6141_v10 = vsel %vm6140_vm10, %v6139_v0, %v6138_v9  ;;  %v8506_v38 = vunpack.i.h.bf16 %v8504_v42  ;;  %v8505_v62 = vunpack.i.l.bf16 %v8504_v42  ;;  %v12054_v0 = vld [vmem:[#allocation49_spill] sm:$0xff]  ;;  %v12055_v9 = vld [vmem:[#allocation52_spill] sm:$0xff]  ;;  %v12056_v42 = vld [vmem:[#allocation50_spill] sm:$0xff] }
0x142b   : > { %v6144_v50 = vsel %vm6143_vm11, %v6142_v15, %v6141_v10  ;;  %v7311_v15 = vcombine.high %v12054_v0, %v12053_v12  ;;  %v7313_v10 = vcombine.high %v12056_v42, %v12055_v9 }
0x142c   : > { %v6105_v23 = vsel %vm4352_vm4, %v11027_v16, %v8506_v38  ;;  %v6104_v20 = vsel %vm4352_vm4, %v11016_v28, %v8505_v62  ;;  %v7310_v38 = vcombine.low %v12054_v0, %v12053_v12  ;;  %v7312_v62 = vcombine.low %v12056_v42, %v12055_v9  ;;  %v12083_v0 = vld [vmem:[#allocation80_spill] sm:$0xff] }
0x142d   : > { %v6113_v34 = vpack.c.bf16 %v6105_v23, %v6105_v23  ;;  %v6112_v11 = vpack.c.bf16 %v6104_v20, %v6104_v20  ;;  %v12058_v23 = vld [vmem:[#allocation53_spill] sm:$0xff]  ;;  %6475 = vmatprep.subr.bf16.mxu1 %v7311_v15  ;;  %6516 = vmatprep.subr.bf16.mxu0 %v7313_v10  ;;  %v12084_v15 = vld [vmem:[#allocation78_spill] sm:$0xff] }
0x142e   : > { %6476 = vmatpush1.bf16.msra.mxu1 %v7310_v38  ;;  %v7341_v9 = vcombine.high %v12084_v15, %v12083_v0  ;;  %v7340_v10 = vcombine.low %v12084_v15, %v12083_v0  ;;  %v8692_v38 = vmov 0   ;;  %v12117_v15 = vld [vmem:[#allocation121_spill] sm:$0xff] }
0x142f   : > { %v6133_v51 = vunpack.c.l.b16 %v6113_v34  ;;  %v6132_v24 = vunpack.c.l.b16 %v6112_v11  ;;  %v12059_v34 = vld [vmem:[#allocation56_spill] sm:$0xff]  ;;  %v12060_v11 = vld [vmem:[#allocation54_spill] sm:$0xff]  ;;  %6507 = vmatprep.mubr.bf16.mxu1 %v8692_v38 }
0x1431   : > { %v6148_v61 = vrot.slane %v6133_v51, 3  ;;  %v6145_v31 = vrot.slane %v6132_v24, 4  ;;  %v7317_v51 = vcombine.high %v12060_v11, %v12059_v34 }
0x1433   : > { %v6147_v59 = vsel %vm6146_vm12, %v6145_v31, %v6144_v50  ;;  %v12057_v50 = vld [vmem:[#allocation55_spill] sm:$0xff] }
0x1434   : > { %v6150_v35 = vsel %vm6149_vm13, %v6148_v61, %v6147_v59  ;;  %v7315_v20 = vcombine.high %v12058_v23, %v12057_v50  ;;  %v7314_v24 = vcombine.low %v12058_v23, %v12057_v50  ;;  %v7316_v61 = vcombine.low %v12060_v11, %v12059_v34  ;;  %v12061_v31 = vld [vmem:[#allocation59_spill] sm:$0xff]  ;;  %v12062_v59 = vld [vmem:[#allocation57_spill] sm:$0xff] }
0x1435   : > { %v8509_v37 = vpop.permute.xlu1 %8508 }
0x1436   : > { %v8511_v60 = vunpack.i.h.bf16 %v8509_v37  ;;  %v8510_v49 = vunpack.i.l.bf16 %v8509_v37  ;;  %6477 = vmatprep.subr.bf16.mxu1 %v7315_v20  ;;  %v12063_v37 = vld [vmem:[#allocation60_spill] sm:$0xff] }
0x1437   : > { %6478 = vmatpush1.bf16.msra.mxu1 %v7314_v24  ;;  %v12085_v20 = vld [vmem:[#allocation148_spill] sm:$0xff]  ;;  %v12086_v24 = vld [vmem:[#allocation149_spill] sm:$0xff] }
0x1438   : > { %v6107_v16 = vsel %vm4352_vm4, %v11032_v18, %v8511_v60  ;;  %v6106_v28 = vsel %vm4352_vm4, %v11018_v27, %v8510_v49  ;;  %v12044_v18 = vld [vmem:[#allocation27_spill] sm:$0xff]  ;;  %v6256_v27 = vsel %vm6137_vm9, %v6255_v8, %v12045_v14  ;;  %v12064_v60 = vld [vmem:[#allocation58_spill] sm:$0xff]  ;;  %v12070_v14 = vld [vmem:[#allocation65_spill] sm:$0xff]  ;;  %v6286_v34 = vrot.slane %v12052_v4, %v12085_v20 }
0x1439   : > { %v6115_v29 = vpack.c.bf16 %v6107_v16, %v6107_v16  ;;  %v6114_v56 = vpack.c.bf16 %v6106_v28, %v6106_v28  ;;  %v6257_v52 = vrot.slane %v12044_v18, 6  ;;  %v7321_v49 = vcombine.high %v12064_v60, %v12063_v37 }
0x143b   : > { %v6135_v22 = vunpack.c.l.b16 %v6115_v29  ;;  %v6134_v13 = vunpack.c.l.b16 %v6114_v56  ;;  %v6258_v2 = vsel %vm6140_vm10, %v6257_v52, %v6256_v27  ;;  %v12069_v52 = vld [vmem:[#allocation67_spill] sm:$0xff] }
0x143c   : > { %v6260_v7 = vsel %vm6143_vm11, %v6259_v1, %v6258_v2  ;;  %v7327_v27 = vcombine.high %v12070_v14, %v12069_v52  ;;  %v12072_v1 = vld [vmem:[#allocation66_spill] sm:$0xff]  ;;  %v7326_v26 = vcombine.low %v12070_v14, %v12069_v52  ;;  %v12099_v14 = vld [vmem:[#allocation85_spill] sm:$0xff] }
0x143d   : > { %v6154_v48 = vrot.slane %v6135_v22, 1  ;;  %v6151_v44 = vrot.slane %v6134_v13, 2  ;;  %v6262_v40 = vsel %vm6146_vm12, %v6261_v41, %v6260_v7  ;;  %v7318_v22 = vcombine.low %v12062_v59, %v12061_v31  ;;  %v12073_v7 = vld [vmem:[#allocation71_spill] sm:$0xff] }
0x143e   : > { %v6264_v57 = vsel %vm6149_vm13, %v6263_v19, %v6262_v40  ;;  %v7320_v13 = vcombine.low %v12064_v60, %v12063_v37  ;;  %v7329_v2 = vcombine.high %v12072_v1, %v12071_v45  ;;  %v7328_v41 = vcombine.low %v12072_v1, %v12071_v45  ;;  %v12075_v40 = vld [vmem:[#allocation72_spill] sm:$0xff]  ;;  %v12087_v37 = vld [vmem:[#allocation99_spill] sm:$0xff]  ;;  %v12088_v60 = vld [vmem:[#allocation98_spill] sm:$0xff] }
0x143f   : > { %v6153_v58 = vsel %vm6152_vm14, %v6151_v44, %v6150_v35  ;;  %v6266_v39 = vsel %vm6152_vm14, %v6265_v55, %v6264_v57  ;;  %v7319_v35 = vcombine.high %v12062_v59, %v12061_v31  ;;  %v12066_v44 = vld [vmem:[#allocation61_spill] sm:$0xff]  ;;  %v7331_v19 = vcombine.high %v12074_v6, %v12073_v7 }
0x1440   : > { %v6156_v30 = vsel %vm6155_vm15, %v6154_v48, %v6153_v58  ;;  %v6268_v33 = vsel %vm6155_vm15, %v6267_v54, %v6266_v39  ;;  %v12065_v48 = vld [vmem:[#allocation63_spill] sm:$0xff]  ;;  %v7333_v55 = vcombine.high %v12076_v17, %v12075_v40  ;;  %v7330_v57 = vcombine.low %v12074_v6, %v12073_v7  ;;  %v12101_v1 = vld [vmem:[#allocation117_spill] sm:$0xff]  ;;  %v12104_v7 = vld [vmem:[#allocation102_spill] sm:$0xff] }
0x1441   : > { %v6157_v47 = vpack.c.b16 %v6156_v30, %v6156_v30  ;;  %6479 = vmatprep.subr.bf16.mxu1 %v7319_v35  ;;  %v7323_v58 = vcombine.high %v12066_v44, %v12065_v48  ;;  %v12067_v30 = vld [vmem:[#allocation64_spill] sm:$0xff]  ;;  %v7322_v8 = vcombine.low %v12066_v44, %v12065_v48  ;;  %v7332_v3 = vcombine.low %v12076_v17, %v12075_v40  ;;  %v12077_v54 = vld [vmem:[#allocation75_spill] sm:$0xff]  ;;  %v12094_v44 = vld [vmem:[#allocation114_spill] sm:$0xff] }
0x1442   : > { %6480 = vmatpush1.bf16.msra.mxu1 %v7318_v22  ;;  %v12091_v22 = vld [vmem:[#allocation83_spill] sm:$0xff]  ;;  %v12106_v40 = vld [vmem:[#allocation134_spill] sm:$0xff] }
0x1443   : > { %8163 = vmatmul.mubr.bf16.vlgmr.msra.gmra.mrb[56].mxu0 %v6157_v47  ;;  %v12068_v47 = vld [vmem:[#allocation62_spill] sm:$0xff]  ;;  %6481 = vmatprep.subr.bf16.mxu1 %v7323_v58  ;;  %v12093_v48 = vld [vmem:[#allocation115_spill] sm:$0xff] }
0x1444   : > { %6517 = vmatpush1.bf16.msra.mxu0 %v7312_v62  ;;  %v7325_v25 = vcombine.high %v12068_v47, %v12067_v30  ;;  %v7324_v18 = vcombine.low %v12068_v47, %v12067_v30  ;;  %6548 = vmatprep.mubr.bf16.mxu0 %v8692_v38  ;;  %v7358_v58 = vcombine.low %v12094_v44, %v12093_v48  ;;  %v12095_v30 = vld [vmem:[#allocation101_spill] sm:$0xff]  ;;  %v12096_v47 = vld [vmem:[#allocation100_spill] sm:$0xff]  ;;  %v12120_v38 = vld [vmem:[#allocation106_spill] sm:$0xff] }
0x1445   : > { %6518 = vmatprep.subr.bf16.mxu0 %v7317_v51  ;;  %v12133_v44 = vld [vmem:[#allocation125_spill] sm:$0xff] }
0x1446   : > { %6482 = vmatpush1.bf16.msra.mxu1 %v7322_v8  ;;  %v12097_v8 = vld [vmem:[#allocation133_spill] sm:$0xff] }
0x1447   : > { %6483 = vmatprep.subr.bf16.mxu1 %v7327_v27  ;;  %v12100_v27 = vld [vmem:[#allocation84_spill] sm:$0xff] }
0x1448   : > { %6519 = vmatpush1.bf16.msra.mxu0 %v7316_v61  ;;  %v6291_v61 = vrot.slane %v12052_v4, %v12086_v24  ;;  %v7343_v45 = vcombine.low %v12100_v27, %v12099_v14  ;;  %v12139_v27 = vld [vmem:[#allocation95_spill] sm:$0xff] }
0x1449   : > { %6520 = vmatprep.subr.bf16.mxu0 %v7321_v49  ;;  %v7350_v49 = vcombine.low %v12088_v60, %v12087_v37  ;;  %v12127_v60 = vld [vmem:[#allocation109_spill] sm:$0xff] }
0x144a   : > { %6484 = vmatpush1.bf16.msra.mxu1 %v7326_v26 }
0x144b   : > { %6485 = vmatprep.subr.bf16.mxu1 %v7331_v19  ;;  %v12105_v19 = vld [vmem:[#allocation135_spill] sm:$0xff] }
0x144c   : > { %6521 = vmatpush1.bf16.msra.mxu0 %v7320_v13  ;;  %v12092_v13 = vld [vmem:[#allocation82_spill] sm:$0xff]  ;;  %v7368_v17 = vcombine.low %v12106_v40, %v12105_v19  ;;  %v12145_v40 = vld [vmem:[#allocation145_spill] sm:$0xff] }
0x144d   : > { %6522 = vmatprep.subr.bf16.mxu0 %v7325_v25  ;;  %v7351_v25 = vcombine.low %v12096_v47, %v12095_v30  ;;  %v12135_v47 = vld [vmem:[#allocation111_spill] sm:$0xff] }
0x144e   : > { %6486 = vmatpush1.bf16.msra.mxu1 %v7330_v57  ;;  %v12108_v57 = vld [vmem:[#allocation86_spill] sm:$0xff] }
0x1450   : > { %6523 = vmatpush1.bf16.msra.mxu0 %v7324_v18  ;;  %v12098_v18 = vld [vmem:[#allocation132_spill] sm:$0xff] }
0x1451   : > { %6524 = vmatprep.subr.bf16.mxu0 %v7329_v2  ;;  %v7367_v52 = vcombine.low %v12098_v18, %v12097_v8  ;;  %v12102_v2 = vld [vmem:[#allocation116_spill] sm:$0xff]  ;;  %v12137_v18 = vld [vmem:[#allocation143_spill] sm:$0xff] }
0x1452   : > { %v7359_v26 = vcombine.low %v12102_v2, %v12101_v1  ;;  %v12141_v2 = vld [vmem:[#allocation127_spill] sm:$0xff] }
0x1454   : > { %6525 = vmatpush1.bf16.msra.mxu0 %v7328_v41  ;;  %v12103_v41 = vld [vmem:[#allocation103_spill] sm:$0xff] }
0x1455   : > { %6526 = vmatprep.subr.bf16.mxu0 %v7333_v55  ;;  %v7352_v6 = vcombine.low %v12104_v7, %v12103_v41  ;;  %v12107_v55 = vld [vmem:[#allocation87_spill] sm:$0xff]  ;;  %v12143_v7 = vld [vmem:[#allocation113_spill] sm:$0xff] }
0x1458   : > { %6527 = vmatpush1.bf16.msra.mxu0 %v7332_v3  ;;  %v7344_v3 = vcombine.low %v12108_v57, %v12107_v55  ;;  %v12147_v57 = vld [vmem:[#allocation97_spill] sm:$0xff] }
0x1516   : > { %v6241_v53 = vpop.f32.mrb[56].mxu0 }
0x1517   : > { %v6242_v43 = vadd.f32 %v6241_v53, %v6119_v36  ;;  %v8164_v32 = vpop.f32.mrb[57].mxu0  ;;  %v12078_v36 = vld [vmem:[#allocation73_spill] sm:$0xff]  ;;  %v12079_v53 = vld [vmem:[#allocation76_spill] sm:$0xff] }
0x1518   : > { %v6244_v46 = vpop.f32.mrb[58].mxu0  ;;  %v7335_v39 = vcombine.high %v12078_v36, %v12077_v54  ;;  %v7334_v32 = vcombine.low %v12078_v36, %v12077_v54  ;;  %v12109_v54 = vld [vmem:[#allocation119_spill] sm:$0xff]  ;;  %v12110_v36 = vld [vmem:[#allocation118_spill] sm:$0xff] }
0x1519   : > { %v8165_v5 = vpop.f32.mrb[59].mxu0  ;;  %v6270_v21 = vadd.f32 %v6268_v33, %v6242_v43  ;;  %v12080_v33 = vld [vmem:[#allocation74_spill] sm:$0xff] }
0x151a   : > { %v7337_v43 = vcombine.high %v12080_v33, %v12079_v53  ;;  %v7336_v46 = vcombine.low %v12080_v33, %v12079_v53  ;;  %v12081_v5 = vld [vmem:[#allocation79_spill] sm:$0xff]  ;;  %6487 = vmatprep.subr.bf16.mxu1 %v7335_v39  ;;  %v7360_v39 = vcombine.low %v12110_v36, %v12109_v54  ;;  %v12111_v53 = vld [vmem:[#allocation105_spill] sm:$0xff]  ;;  %v12112_v33 = vld [vmem:[#allocation104_spill] sm:$0xff] }
0x151b   : > { %6271 = vadd.xlane.f32.xlu0 %v6270_v21  ;;  %6488 = vmatpush1.bf16.msra.mxu1 %v7334_v32  ;;  %v12113_v32 = vld [vmem:[#allocation137_spill] sm:$0xff] }
0x151c   : > { %6528 = vmatprep.subr.bf16.mxu0 %v7337_v43  ;;  %v7353_v43 = vcombine.low %v12112_v33, %v12111_v53  ;;  %v12149_v36 = vld [vmem:[#allocation129_spill] sm:$0xff]  ;;  %v12151_v33 = vld [vmem:[#allocation146_spill] sm:$0xff] }
0x151d   : > { %6529 = vmatpush1.bf16.msra.mxu0 %v7336_v46  ;;  %v12114_v46 = vld [vmem:[#allocation136_spill] sm:$0xff] }
0x151e   : > { %6530 = vmatprep.subr.bf16.mxu0 %v7341_v9  ;;  %v12118_v9 = vld [vmem:[#allocation120_spill] sm:$0xff] }
0x1521   : > { %6531 = vmatpush1.bf16.msra.mxu0 %v7340_v10  ;;  %v12119_v10 = vld [vmem:[#allocation107_spill] sm:$0xff] }
0x15a8   : > { %v6272_v16 = vpop.xlane.xlu0 %6271 }
0x15a9   : > { %v6274_v28 = vmul.f32 0.0078125, %v6272_v16  ;;  %v12089_v16 = vld [vmem:[#allocation131_spill] sm:$0xff] }
0x15ab   : > { %v6275_v29 = vsub.f32 %v6270_v21, %v6274_v28  ;;  %v12082_v21 = vld [vmem:[#allocation77_spill] sm:$0xff]  ;;  %v12090_v28 = vld [vmem:[#allocation130_spill] sm:$0xff] }
0x15ac   : > { %v7339_v12 = vcombine.high %v12082_v21, %v12081_v5  ;;  %v7338_v42 = vcombine.low %v12082_v21, %v12081_v5  ;;  %v7369_v5 = vcombine.low %v12114_v46, %v12113_v32  ;;  %v12115_v21 = vld [vmem:[#allocation89_spill] sm:$0xff] }
0x15ad   : > { %v6276_v56 = vmul.f32 %v6275_v29, %v6275_v29  ;;  %v12152_v32 = vld [vmem:[#allocation81_spill] sm:$0xff] }
0x15ae   : > { %6489 = vmatprep.subr.bf16.mxu1 %v7339_v12  ;;  %v12116_v12 = vld [vmem:[#allocation88_spill] sm:$0xff]  ;;  %v6298_v46 = vrot.slane %v12152_v32, %v12051_v63 }
0x15af   : > { %6277 = vadd.xlane.f32.xlu1 %v6276_v56  ;;  %6490 = vmatpush1.bf16.msra.mxu1 %v7338_v42  ;;  %v7366_v56 = vcombine.low %v12090_v28, %v12089_v16  ;;  %v7345_v0 = vcombine.low %v12116_v12, %v12115_v21  ;;  %v7361_v42 = vcombine.low %v12118_v9, %v12117_v15  ;;  %v12129_v28 = vld [vmem:[#allocation141_spill] sm:$0xff] }
0x15b0   : > { %7670 = vmatprep.subr.bf16.mxu1 %v7350_v49  ;;  %v12128_v49 = vld [vmem:[#allocation108_spill] sm:$0xff]  ;;  %v6302_v21 = vrot.slane %v12152_v32, %v12085_v20 }
0x15b1   : > { %7692 = vmatprep.subr.bf16.mxu0 %v7366_v56  ;;  %v7355_v16 = vcombine.low %v12128_v49, %v12127_v60  ;;  %v12130_v56 = vld [vmem:[#allocation140_spill] sm:$0xff] }
0x163c   : > { %v6278_v62 = vpop.xlane.xlu1 %6277 }
0x163d   : > { %v6279_v50 = vmul.f32 0.0078125, %v6278_v62  ;;  %v7354_v62 = vcombine.low %v12120_v38, %v12119_v10 }
0x163f   : > { %v6280_v23 = vadd.f32 1e-12, %v6279_v50  ;;  %v12121_v50 = vld [vmem:[#allocation139_spill] sm:$0xff] }
0x1641   : > { %8576 = vrsqrt.f32 %v6280_v23  ;;  %v12122_v23 = vld [vmem:[#allocation138_spill] sm:$0xff] }
0x164b   : > { %v8577_v11 = vpop.eup %8576 }
0x164c   : > { %v6282_v51 = vmul.f32 %v8577_v11, %v6275_v29  ;;  %v7342_v29 = vcombine.low %v12092_v13, %v12091_v22  ;;  %v12123_v11 = vld [vmem:[#allocation91_spill] sm:$0xff]  ;;  %v7371_v22 = vcombine.low %v12130_v56, %v12129_v28  ;;  %v12131_v13 = vld [vmem:[#allocation93_spill] sm:$0xff] }
0x164e   : > { %v6287_v31 = vmul.f32 %v6286_v34, %v6282_v51  ;;  %v7370_v34 = vcombine.low %v12122_v23, %v12121_v50  ;;  %v12124_v51 = vld [vmem:[#allocation90_spill] sm:$0xff] }
0x1650   : > { %v11294_v59 = vadd.f32 %v6291_v61, %v6287_v31  ;;  %v7346_v61 = vcombine.low %v12124_v51, %v12123_v11  ;;  %v12125_v31 = vld [vmem:[#allocation123_spill] sm:$0xff] }
0x1652   : > { %v6293_v35 = vpack.c.bf16 %v11294_v59, %v11294_v59 }
0x1654   : > { %6508 = vmatmul.mubr.bf16.vlgmr.msra.gmra.mrb[72].mxu1 %v6293_v35  ;;  %6549 = vmatmul.mubr.bf16.vlgmr.msra.gmra.mrb[60].mxu0 %v6293_v35  ;;  %v12126_v35 = vld [vmem:[#allocation122_spill] sm:$0xff] }
0x1655   : > { %7671 = vmatpush3.bf16.msra.mxu1 %v7342_v29  ;;  %7693 = vmatpush3.bf16.msra.mxu0 %v7358_v58  ;;  %v7362_v37 = vcombine.low %v12126_v35, %v12125_v31  ;;  %v12132_v29 = vld [vmem:[#allocation92_spill] sm:$0xff] }
0x1656   : > { %7672 = vmatprep.subr.bf16.mxu1 %v7351_v25  ;;  %7694 = vmatprep.subr.bf16.mxu0 %v7367_v52  ;;  %v7347_v48 = vcombine.low %v12132_v29, %v12131_v13  ;;  %v12134_v58 = vld [vmem:[#allocation124_spill] sm:$0xff]  ;;  %v12136_v25 = vld [vmem:[#allocation110_spill] sm:$0xff] }
0x1657   : > { %v7363_v30 = vcombine.low %v12134_v58, %v12133_v44  ;;  %v7356_v8 = vcombine.low %v12136_v25, %v12135_v47  ;;  %v12138_v52 = vld [vmem:[#allocation142_spill] sm:$0xff] }
0x1658   : > { %v7372_v14 = vcombine.low %v12138_v52, %v12137_v18 }
0x1659   : > { %7673 = vmatpush3.bf16.msra.mxu1 %v7343_v45  ;;  %7695 = vmatpush3.bf16.msra.mxu0 %v7359_v26  ;;  %v12140_v45 = vld [vmem:[#allocation94_spill] sm:$0xff] }
0x165a   : > { %7674 = vmatprep.subr.bf16.mxu1 %v7352_v6  ;;  %7696 = vmatprep.subr.bf16.mxu0 %v7368_v17  ;;  %v7348_v1 = vcombine.low %v12140_v45, %v12139_v27  ;;  %v12142_v26 = vld [vmem:[#allocation126_spill] sm:$0xff]  ;;  %v12144_v6 = vld [vmem:[#allocation112_spill] sm:$0xff] }
0x165b   : > { %v7364_v41 = vcombine.low %v12142_v26, %v12141_v2  ;;  %v7357_v19 = vcombine.low %v12144_v6, %v12143_v7  ;;  %v12146_v17 = vld [vmem:[#allocation144_spill] sm:$0xff] }
0x165c   : > { %v7373_v55 = vcombine.low %v12146_v17, %v12145_v40 }
0x165d   : > { %7675 = vmatpush3.bf16.msra.mxu1 %v7344_v3  ;;  %7697 = vmatpush3.bf16.msra.mxu0 %v7360_v39  ;;  %v12148_v3 = vld [vmem:[#allocation96_spill] sm:$0xff] }
0x165e   : > { %7676 = vmatprep.subr.bf16.mxu1 %v7353_v43  ;;  %7698 = vmatprep.subr.bf16.mxu0 %v7369_v5  ;;  %v7349_v54 = vcombine.low %v12148_v3, %v12147_v57  ;;  %v12150_v39 = vld [vmem:[#allocation128_spill] sm:$0xff]  ;;  %v6309_v43 = vsub.s32 3, %v12151_v33  ;;  %v6306_v5 = vrot.slane %v12152_v32, %v12086_v24 }
0x165f   : > { %v7365_v53 = vcombine.low %v12150_v39, %v12149_v36 }
0x1660   : > { %v6310_v12 = vrot.slane %v12152_v32, %v6309_v43  ;;  %v6600_v39 = vrot.slane %v12052_v4, %v6309_v43 }
0x1661   : > { %7677 = vmatpush3.bf16.msra.mxu1 %v7345_v0  ;;  %7699 = vmatpush3.bf16.msra.mxu0 %v7361_v42 }
0x1662   : > { %7678 = vmatprep.subr.bf16.mxu1 %v7354_v62  ;;  %7700 = vmatprep.subr.bf16.mxu0 %v7370_v34 }
0x1665   : > { %7679 = vmatpush3.bf16.msra.mxu1 %v7346_v61  ;;  %7701 = vmatpush3.bf16.msra.mxu0 %v7362_v37 }
0x1666   : > { %7680 = vmatprep.subr.bf16.mxu1 %v7355_v16  ;;  %7702 = vmatprep.subr.bf16.mxu0 %v7371_v22 }
0x1669   : > { %7681 = vmatpush3.bf16.msra.mxu1 %v7347_v48  ;;  %7703 = vmatpush3.bf16.msra.mxu0 %v7363_v30 }
0x166a   : > { %7682 = vmatprep.subr.bf16.mxu1 %v7356_v8  ;;  %7704 = vmatprep.subr.bf16.mxu0 %v7372_v14 }
0x166d   : > { %7683 = vmatpush3.bf16.msra.mxu1 %v7348_v1  ;;  %7705 = vmatpush3.bf16.msra.mxu0 %v7364_v41 }
0x166e   : > { %7684 = vmatprep.subr.bf16.mxu1 %v7357_v19  ;;  %7706 = vmatprep.subr.bf16.mxu0 %v7373_v55 }
0x1671   : > { %7685 = vmatpush3.bf16.msra.mxu1 %v7349_v54  ;;  %7707 = vmatpush3.bf16.msra.mxu0 %v7365_v53 }
0x1727   : > { %v6509_v0 = vpop.f32.mrb[72].mxu1  ;;  %v6550_v15 = vpop.f32.mrb[60].mxu0 }
0x1728   : > { %v6510_v9 = vadd.f32 %v6509_v0, %v6298_v46  ;;  %v6551_v42 = vadd.f32 %v6550_v15, %v6306_v5  ;;  %v6511_v10 = vpop.f32.mrb[73].mxu1  ;;  %v6552_v38 = vpop.f32.mrb[61].mxu0 }
0x1729   : > { %v6512_v62 = vadd.f32 %v6511_v10, %v6302_v21  ;;  %v6553_v50 = vadd.f32 %v6552_v38, %v6310_v12  ;;  %v6513_v23 = vpop.f32.mrb[74].mxu1  ;;  %v6554_v63 = vpop.f32.mrb[62].mxu0 }
0x172a   : > { %v6561_v34 = vmul.f32 0.044715, %v6510_v9  ;;  %v6563_v11 = vmul.f32 0.044715, %v6551_v42  ;;  %v6514_v24 = vpop.f32.mrb[75].mxu1  ;;  %v6555_v51 = vpop.f32.mrb[63].mxu0 }
0x172b   : > { %v6562_v61 = vmul.f32 0.044715, %v6512_v62  ;;  %v6564_v20 = vmul.f32 0.044715, %v6553_v50  ;;  %v6557_v18 = vmul.f32 0.5, %v6510_v9  ;;  %v6558_v27 = vmul.f32 0.5, %v6512_v62 }
0x172c   : > { %v6565_v31 = vmul.f32 %v6561_v34, %v6510_v9  ;;  %v6567_v35 = vmul.f32 %v6563_v11, %v6551_v42  ;;  %v6560_v2 = vmul.f32 0.5, %v6553_v50  ;;  %v6559_v6 = vmul.f32 0.5, %v6551_v42 }
0x172d   : > { %v6566_v37 = vmul.f32 %v6562_v61, %v6512_v62  ;;  %v6568_v60 = vmul.f32 %v6564_v20, %v6553_v50  ;;  %v6887_v24 = vsub.s32 4, %v12151_v33  ;;  %v6892_v51 = vsub.s32 5, %v12151_v33 }
0x172e   : > { %v6569_v49 = vmul.f32 %v6565_v31, %v6510_v9  ;;  %v6571_v16 = vmul.f32 %v6567_v35, %v6551_v42 }
0x172f   : > { %v6570_v28 = vmul.f32 %v6566_v37, %v6512_v62  ;;  %v6572_v56 = vmul.f32 %v6568_v60, %v6553_v50  ;;  %v6888_v61 = vrot.slane %v12052_v4, %v6887_v24 }
0x1730   : > { %v6573_v22 = vadd.f32 %v6569_v49, %v6510_v9  ;;  %v6575_v13 = vadd.f32 %v6571_v16, %v6551_v42 }
0x1731   : > { %v6574_v29 = vadd.f32 %v6570_v28, %v6512_v62  ;;  %v6576_v48 = vadd.f32 %v6572_v56, %v6553_v50 }
0x1732   : > { %v6577_v44 = vmul.f32 0.7978846, %v6573_v22  ;;  %v6579_v47 = vmul.f32 0.7978846, %v6575_v13 }
0x1733   : > { %v6578_v58 = vmul.f32 0.7978846, %v6574_v29  ;;  %v6580_v30 = vmul.f32 0.7978846, %v6576_v48 }
0x1734   : > { %8578 = vtanh.f32 %v6577_v44 }
0x1735   : > { %8580 = vtanh.f32 %v6578_v58 }
0x1736   : > { %8582 = vtanh.f32 %v6580_v30 }
0x1737   : > { %8584 = vtanh.f32 %v6579_v47 }
0x173e   : > { %v8579_v25 = vpop.eup %8578 }
0x173f   : > { %v8581_v8 = vpop.eup %8580  ;;  %v6585_v52 = vadd.f32 1.0, %v8579_v25 }
0x1740   : > { %v8583_v14 = vpop.eup %8582  ;;  %v6586_v45 = vadd.f32 1.0, %v8581_v8 }
0x1741   : > { %v8585_v1 = vpop.eup %8584  ;;  %v6588_v26 = vadd.f32 1.0, %v8583_v14  ;;  %v6589_v41 = vmul.f32 %v6585_v52, %v6557_v18 }
0x1742   : > { %v6590_v7 = vmul.f32 %v6586_v45, %v6558_v27  ;;  %v6587_v19 = vadd.f32 1.0, %v8585_v1 }
0x1743   : > { %v6592_v40 = vmul.f32 %v6588_v26, %v6560_v2  ;;  %v6593_v3 = vpack.c.bf16 %v6589_v41, %v6589_v41 }
0x1744   : > { %v6594_v17 = vpack.c.bf16 %v6590_v7, %v6590_v7  ;;  %v6591_v55 = vmul.f32 %v6587_v19, %v6559_v6 }
0x1745   : > { %v6596_v57 = vpack.c.bf16 %v6592_v40, %v6592_v40 }
0x1746   : > { %6825 = vmatprep.mubr.bf16.mxu1 %v6594_v17  ;;  %v6595_v54 = vpack.c.bf16 %v6591_v55, %v6591_v55 }
0x1747   : > { %6865 = vmatprep.mubr.bf16.mxu0 %v6596_v57  ;;  %6826 = vmatmul.mubr.bf16.vlgmr.msra.gmra.mrb[76].mxu1 %v6593_v3 }
0x1748   : > { %6866 = vmatmul.mubr.bf16.vlgmr.msra.gmra.mrb[64].mxu0 %v6595_v54 }
0x181a   : > { %v7686_v36 = vpop.f32.mrb[76].mxu1 }
0x181b   : > { %v7708_v53 = vpop.f32.mrb[64].mxu0  ;;  %v7687_v32 = vpop.f32.mrb[77].mxu1 }
0x181c   : > { %v7688_v46 = vadd.f32 %v7687_v32, %v7686_v36  ;;  %v7709_v5 = vpop.f32.mrb[65].mxu0  ;;  %v7689_v21 = vpop.f32.mrb[78].mxu1 }
0x181d   : > { %v7710_v12 = vadd.f32 %v7709_v5, %v7708_v53  ;;  %v7711_v0 = vpop.f32.mrb[66].mxu0  ;;  %v7690_v15 = vpop.f32.mrb[79].mxu1 }
0x181e   : > { %v6828_v9 = vadd.f32 %v7688_v46, %v6600_v39  ;;  %v7712_v42 = vpop.f32.mrb[67].mxu0 }
0x1820   : > { %v6868_v10 = vadd.f32 %v7710_v12, %v6828_v9 }
0x1822   : > { %v6873_v38 = vadd.f32 %v6868_v10, %v11294_v59  ;;  %v6893_v59 = vrot.slane %v12052_v4, %v6892_v51 }
0x1824   : > { %6874 = vadd.xlane.f32.xlu0 %v6873_v38 }
0x18b1   : > { %v6875_v62 = vpop.xlane.xlu0 %6874 }
0x18b2   : > { %v6876_v50 = vmul.f32 0.0078125, %v6875_v62 }
0x18b4   : > { %v6877_v23 = vsub.f32 %v6873_v38, %v6876_v50 }
0x18b6   : > { %v6878_v63 = vmul.f32 %v6877_v23, %v6877_v23 }
0x18b8   : > { %6879 = vadd.xlane.f32.xlu0 %v6878_v63 }
0x1945   : > { %v6880_v43 = vpop.xlane.xlu0 %6879 }
0x1946   : > { %v6881_v34 = vmul.f32 0.0078125, %v6880_v43 }
0x1948   : > { %v6882_v11 = vadd.f32 1e-12, %v6881_v34 }
0x194a   : > { %8586 = vrsqrt.f32 %v6882_v11 }
0x1954   : > { %v8587_v20 = vpop.eup %8586 }
0x1955   : > { %v6884_v31 = vmul.f32 %v8587_v20, %v6877_v23 }
0x1957   : > { %v6889_v35 = vmul.f32 %v6888_v61, %v6884_v31 }
0x1959   : > { %v6894_v37 = vadd.f32 %v6893_v59, %v6889_v35 }
0x195b   : > { %6895 = vst [vmem:[%s451_s0] sm:$0xff] %v6894_v37 }
0x195c PF: > { %s7375_s12 = sshll.u32 %s8670_s13, 7  ;;  %s12154_s29 = sld [smem:[#allocation210_spill]] }
0x195d   : > { %s6910_s18 = sshll.u32 %s451_s0, 4  ;;  %s12155_s19 = sand.u32 1, %s8658_s10   ;;  %s6911_s18 = int_to_ptr.vmem [resolvable:$true] %s6910_s18 }
0x195e   : > { %s6897_s20 = scalar_lea.sflag [#allocation4], %s12155_s19  ;;  %s8588_s17 = scalar_lea.vmem %s6911_s18, 128 }
0x195f   : > { %p8589_p4 = scmp.ne.s32.totalorder %s6911_s18, %s8588_s17  ;;  %s8693_s11 = smov [#allocation3]  }
0x1960   : > { %s8592_s14 = sshll.u32 %s8693_s11, 4  ;;  %s8593_s14 = int_to_ptr.vmem [resolvable:$false] %s8592_s14 }
0x1961   : > { %p8590_p5 = pnand %p8589_p4, %p8793_p3  ;;  %s8594_s22 = scalar_lea.vmem %s8593_s14, 256 }
0x1962   : > { %s11386_s24 = scalar_lea.hbm %s12154_s29, %s7375_s12  ;;  %p8595_p7 = scmp.lt.s32.totalorder %s6911_s18, %s8593_s14 }
0x1963   : > { %p8591_p6 = pneg %p8590_p5  ;;  %p8596_p8 = scmp.lt.s32.totalorder %s8594_s22, %s8588_s17 }
0x1965   : > { %p8597_p10 = por %p8596_p8, %p8595_p7 }
0x1967   : > { %p8598_p11 = pnand %p8597_p10, %p8591_p6 }
0x1969   : > { %8601 = shalt.err (!%p8598_p11)
}
0x196a   : > { %s8602_s13 = scalar_lea.hbm %s11386_s24, 128  ;;  %s8606_s16 = scalar_lea.hbm %s12154_s29, 256 }
0x196b   : > { %p8603_p12 = scmp.ne.s32.totalorder %s11386_s24, %s8602_s13  ;;  %p8607_p1 = scmp.lt.u32.totalorder %s11386_s24, %s12154_s29 }
0x196c   : > { %p8608_p2 = scmp.lt.u32.totalorder %s8606_s16, %s8602_s13  ;;  %p8610_p5 = scmp.lt.u32.totalorder %s8602_s13, %s11386_s24 }
0x196d   : > { %p8604_p13 = pnand %p8603_p12, %p8793_p3 }
0x196e   : > { %p8609_p4 = por %p8608_p2, %p8607_p1 }
0x196f   : > { %p8605_p0 = pneg %p8604_p13 }
0x1970   : > { %p8611_p6 = por %p8610_p5, %p8609_p4 }
0x1972   : > { %p8612_p7 = pnand %p8611_p6, %p8605_p0 }
0x1974   : > { %8615 = shalt.err (!%p8612_p7)
}
0x1975   : > { %8184 = dma.vmem_to_hbm [thread:$0]  (%p8793_p3), %s6911_s18, 128, %s11386_s24, %s6897_s20  }
0x1976 PF: > { %s12156_s25 = sld [smem:[#allocation10_spill]]  ;;  %s12157_s23 = sld [smem:[#allocation6_spill]] }
0x197c   : > { %p8190_p8 = scmp.ge.s32.totalorder %s12156_s25, 2  ;;  %s6922_s1 = sand.u32 1, %s12157_s23  }
0x197d   : > { %s6923_s2 = scalar_lea.sflag [#allocation4], %s6922_s1 }
0x197e   : > { %p8187_p10 = pnand %p8190_p8, %p8803_p9 }
0x1980   : > { %8649 = dma.done.wait (!%p8187_p10), %s6923_s2, 128  }
0x1981   : > { %8651 = vsyncadd (!%p8187_p10), %s6923_s2, 4294967168  ;;  %s22_s16 = sadd.s32 1, %s12156_s25   ;;  %s12159_s12 = sld [smem:[#allocation7_spill]] }
0x1982   : > { %p19_p11 = scmp.ge.s32.totalorder %s22_s16, 6   ;;  %s12160_s11 = sld [smem:[#allocation15_spill]] }
0x1983   : > { %s12161_s15 = sld [smem:[#allocation8_spill]]  ;;  %s12162_s13 = sld [smem:[#allocation9_spill]] }
0x1984   : > { %s12163_s14 = sld [smem:[#allocation11_spill]]  ;;  %s12164_s21 = sld [smem:[#allocation13_spill]] }
0x1985   : > { %s12165_s30 = smov %s8658_s10  ;;  %21 = sbr.rel (!%p19_p11) target bundleno = 10 (0xa), region = 127 }
0x1987   : > { %s12166_s10 = smov %s12159_s12 }
0x1989   : > { %s12167_s12 = smov %s12161_s15 }
0x198a   : > { %s12168_s15 = smov %s12164_s21 }
0x198c   :  { %6928 = vsyncpa [#allocation4], 1 }
0x198d   :  { %6930 = vsyncpa [#allocation4 + $0x1], 1 }

</bundles_post_ra>
